<compile_context>
chip_gen: v7x
topology: tpu7x:2x2x1
jax: 0.10.0
libtpu: 0.0.40
codegen_flags: <defaults>
</compile_context>

<pallas_src>
import numpy as np
import jax
import jax.numpy as jnp
from jax.experimental import pallas as pl
from jax.experimental.pallas import tpu as pltpu

# Small, self-consistent sizes (SEQ = maxlen, HID = LSTM/GRU hidden size).
BS, SEQ, VOCAB, EMB, HID = 2, 8, 50, 32, 16
LANES = 128
assert 8 * HID == LANES and EMB % 8 == 0

# Row offsets inside the single packed weight array (all 8-row aligned).
OFF_WIH_L = 0                      # (EMB, 128)   LSTM input proj, both dirs
OFF_WHH_L = OFF_WIH_L + EMB        # (2H, 128)    LSTM recurrent, block-diag
OFF_WIH_G = OFF_WHH_L + 2 * HID    # (2H, 128)    GRU input proj + aw_l column
OFF_WHH_G = OFF_WIH_G + 2 * HID    # (2H, 128)    GRU recurrent, block-diag
OFF_FC_W = OFF_WHH_G + 2 * HID     # (8H, 128)    fc weight, cols 16: zero
OFF_OUT_W = OFF_FC_W + 8 * HID     # (128, 128)   out weight, lane-broadcast
OFF_VEC = OFF_OUT_W + LANES        # (8, 128)     bias / small vector rows
PACK_ROWS = OFF_VEC + 8


def _rnn_attn_kernel(x_ref, w_ref, ab_l_ref, ab_g_ref, o_ref):
  f32 = jnp.float32
  seq, bs, emb = x_ref.shape
  H, H2 = HID, 2 * HID

  # ----- static views into the single packed weight DMA (free slices) -----
  wih_l = w_ref[OFF_WIH_L:OFF_WIH_L + emb, :]
  whh_l = w_ref[OFF_WHH_L:OFF_WHH_L + H2, :]
  wih_g = w_ref[OFF_WIH_G:OFF_WIH_G + H2, :]
  whh_g = w_ref[OFF_WHH_G:OFF_WHH_G + H2, :]
  fc_w = w_ref[OFF_FC_W:OFF_FC_W + 8 * H, :]
  out_w = w_ref[OFF_OUT_W:OFF_OUT_W + LANES, :]
  vec = w_ref[OFF_VEC:OFF_VEC + 8, :]
  b_l, b_g, bhh_g = vec[0:1, :], vec[1:2, :], vec[2:3, :]
  aw_g = vec[3:4, :H2]
  fc_b, out_b = vec[4:5, :], vec[5:6, :]

  # Lane masks for the gate-type-major interleaved layout [X_f(H) X_b(H)]...
  # (hoisted once; per-step fwd/bwd time alignment is then a pure VPU select).
  lane = jax.lax.broadcasted_iota(jnp.int32, (1, LANES), 1)
  fwd128 = (lane % H2) < H
  fwd2h = jax.lax.broadcasted_iota(jnp.int32, (1, H2), 1) < H

  x = x_ref[...]

  # ----- hoisted input projection for BOTH LSTM directions (one matmul) ---
  # lanes: [i_f i_b f_f f_b o_f o_b g_f g_b]  -> 8H = 128, lane dense.
  xp = (jnp.dot(x.reshape(seq * bs, emb), wih_l, preferred_element_type=f32)
        + b_l).reshape(seq, bs, LANES)

  # ----- bi-LSTM: one block-diagonal h @ W_hh MXU push per step -----------
  # state packed as [h_f | h_b]; fwd runs t=s, bwd runs t=seq-1-s.
  h = jnp.zeros((bs, H2), f32)
  c = jnp.zeros((bs, H2), f32)
  states_l = []
  for s in range(seq):
    pre = jnp.where(fwd128, xp[s], xp[seq - 1 - s])
    g = pre + jnp.dot(h, whh_l, preferred_element_type=f32)     # (bs, 128)
    sg = jax.nn.sigmoid(g[:, :6 * H])                           # i,f,o slab
    gg = jnp.tanh(g[:, 6 * H:])                                 # g slab
    c = sg[:, H2:2 * H2] * c + sg[:, :H2] * gg
    h = sg[:, 2 * H2:3 * H2] * jnp.tanh(c)
    states_l.append(h)

  # Time-aligned (seq, bs, 2H): fwd lanes from step t, bwd lanes from seq-1-t.
  h_lstm = jnp.stack(
      [jnp.where(fwd2h, states_l[t], states_l[seq - 1 - t])
       for t in range(seq)], axis=0)

  # ----- hoisted GRU input projection (both dirs); spare column 6H carries
  #       the LSTM attention logits (aw_l folded into the same matmul) ------
  # lanes: [r_f r_b z_f z_b n_f n_b | e_lstm | 0-pad]  -> 128, lane dense.
  hp = (jnp.dot(h_lstm.reshape(seq * bs, H2), wih_g,
                preferred_element_type=f32) + b_g).reshape(seq, bs, LANES)
  e_lstm = hp[:, :, 6 * H:6 * H + 1]                            # (seq, bs, 1)

  # ----- bi-GRU: one block-diagonal h @ W_hh MXU push per step ------------
  hg = jnp.zeros((bs, H2), f32)
  states_g = []
  for s in range(seq):
    gi = jnp.where(fwd128, hp[s], hp[seq - 1 - s])
    gh = jnp.dot(hg, whh_g, preferred_element_type=f32) + bhh_g
    rz = jax.nn.sigmoid(gi[:, :2 * H2] + gh[:, :2 * H2])        # [r | z]
    n = jnp.tanh(gi[:, 2 * H2:3 * H2] + rz[:, :H2] * gh[:, 2 * H2:3 * H2])
    z = rz[:, H2:2 * H2]
    hg = (1.0 - z) * n + z * hg
    states_g.append(hg)

  h_gru = jnp.stack(
      [jnp.where(fwd2h, states_g[t], states_g[seq - 1 - t])
       for t in range(seq)], axis=0)

  # ----- dual attention + pools + MLP head --------------------------------
  def attention(xseq, e_raw, ab):
    e = jnp.tanh(e_raw + ab)
    a = jnp.exp(e)
    inv = pl.reciprocal(jnp.sum(a, axis=0, keepdims=True), approx=True)
    a = a * inv + 1e-10
    return jnp.sum(xseq * a, axis=0)                            # (bs, 2H)

  e_gru = jnp.sum(h_gru * aw_g, axis=2, keepdims=True)
  h_attn_lstm = attention(h_lstm, e_lstm, ab_l_ref[...])
  h_attn_gru = attention(h_gru, e_gru, ab_g_ref[...])
  avg_pool = jnp.mean(h_gru, axis=0)
  max_pool = jnp.max(h_gru, axis=0)

  feat = jnp.concatenate([h_attn_lstm, h_attn_gru, avg_pool, max_pool],
                         axis=1)                                # (bs, 8H=128)
  hid = jnp.maximum(
      jnp.dot(feat, fc_w, preferred_element_type=f32) + fc_b, 0.0)
  # out_w's single real column is broadcast across all 128 lanes (rows >=16
  # are zero) -> the final store is an unmasked lane-dense (bs, 128) vst; the
  # wrapper reads column 0.
  o_ref[...] = jnp.dot(hid, out_w, preferred_element_type=f32) + out_b


def build_weight_pack(P):
  """Host-side (runs once at load time): pack all weights into one
  (PACK_ROWS, 128) f32 array, gate-type-major with fwd/bwd interleaved at H
  granularity.  LSTM cols: [i_f i_b f_f f_b o_f o_b g_f g_b];
  GRU cols: [r_f r_b z_f z_b n_f n_b | e_lstm(aw_l) | 0-pad]."""
  H = HID
  A = lambda t: np.asarray(t, np.float32)
  W = np.zeros((PACK_ROWS, LANES), np.float32)
  vec = np.zeros((8, LANES), np.float32)

  wih_lf, wih_lb = A(P['wih_lf']), A(P['wih_lb'])
  whh_lf, whh_lb = A(P['whh_lf']), A(P['whh_lb'])
  b_lf, b_lb = A(P['b_lf'])[0], A(P['b_lb'])[0]
  wih_gf, wih_gb = A(P['wih_gf']), A(P['wih_gb'])
  whh_gf, whh_gb = A(P['whh_gf']), A(P['whh_gb'])
  bih_gf, bih_gb = A(P['bih_gf'])[0], A(P['bih_gb'])[0]
  bhh_gf, bhh_gb = A(P['bhh_gf'])[0], A(P['bhh_gb'])[0]

  # LSTM: PyTorch gate column order [i f g o] -> target order (i, f, o, g).
  for dst, src in ((0, 0), (1, 1), (2, 3), (3, 2)):
    cf, cb, sc = 2 * dst * H, 2 * dst * H + H, src * H
    W[OFF_WIH_L:OFF_WIH_L + EMB, cf:cf + H] = wih_lf[:, sc:sc + H]
    W[OFF_WIH_L:OFF_WIH_L + EMB, cb:cb + H] = wih_lb[:, sc:sc + H]
    W[OFF_WHH_L:OFF_WHH_L + H, cf:cf + H] = whh_lf[:, sc:sc + H]
    W[OFF_WHH_L + H:OFF_WHH_L + 2 * H, cb:cb + H] = whh_lb[:, sc:sc + H]
    vec[0, cf:cf + H] = b_lf[sc:sc + H]
    vec[0, cb:cb + H] = b_lb[sc:sc + H]

  # GRU: gate order [r z n] in both source and target.
  for g in range(3):
    cf, cb, sc = 2 * g * H, 2 * g * H + H, g * H
    W[OFF_WIH_G:OFF_WIH_G + 2 * H, cf:cf + H] = wih_gf[:, sc:sc + H]
    W[OFF_WIH_G:OFF_WIH_G + 2 * H, cb:cb + H] = wih_gb[:, sc:sc + H]
    W[OFF_WHH_G:OFF_WHH_G + H, cf:cf + H] = whh_gf[:, sc:sc + H]
    W[OFF_WHH_G + H:OFF_WHH_G + 2 * H, cb:cb + H] = whh_gb[:, sc:sc + H]
    vec[1, cf:cf + H] = bih_gf[sc:sc + H]
    vec[1, cb:cb + H] = bih_gb[sc:sc + H]
    vec[2, cf:cf + H] = bhh_gf[sc:sc + H]
    vec[2, cb:cb + H] = bhh_gb[sc:sc + H]

  # Fold the LSTM attention logit weight into spare GRU-projection column 6H.
  W[OFF_WIH_G:OFF_WIH_G + 2 * H, 6 * H] = A(P['aw_l'])[0]

  # Head: fc padded to 128 output lanes; out weight broadcast across lanes.
  fc_w = A(P['fc_w'])                              # (8H, 16)
  W[OFF_FC_W:OFF_FC_W + 8 * H, :fc_w.shape[1]] = fc_w
  out_w = A(P['out_w'])                            # (16, 1)
  W[OFF_OUT_W:OFF_OUT_W + out_w.shape[0], :] = np.broadcast_to(
      out_w, (out_w.shape[0], LANES))
  vec[3, :2 * H] = A(P['aw_g'])[0]
  vec[4, :fc_w.shape[1]] = A(P['fc_b'])[0]
  vec[5, :] = A(P['out_b'])[0, 0]
  W[OFF_VEC:OFF_VEC + 8, :] = vec
  return jnp.asarray(W)


def rnn_attn_forward(x_ids, emb_table, wpack, ab_l, ab_g):
  bs, seq = x_ids.shape
  # TODO(synk): data-dependent embedding gather stays as plain-JAX glue.
  emb = emb_table[x_ids]
  x_tm = jnp.transpose(emb, (1, 0, 2)).astype(jnp.float32)     # (SEQ, BS, EMB)

  # One tile covers the whole toy batch; at production BS pick
  # batch_tile <= BS/2 (>= 2 "parallel" grid steps -> both v7x TensorCores)
  # and re-derive the tile for v7x's 64 MiB VMEM.
  batch_tile = bs
  grid = (bs // batch_tile,)

  out = pl.pallas_call(
      _rnn_attn_kernel,
      out_shape=jax.ShapeDtypeStruct((bs, LANES), jnp.float32),
      grid=grid,
      in_specs=[
          pl.BlockSpec((seq, batch_tile, x_tm.shape[2]), lambda b: (0, b, 0)),
          pl.BlockSpec((PACK_ROWS, LANES), lambda b: (0, 0)),
          pl.BlockSpec((seq, 1, 1), lambda b: (0, 0, 0)),
          pl.BlockSpec((seq, 1, 1), lambda b: (0, 0, 0)),
      ],
      out_specs=pl.BlockSpec((batch_tile, LANES), lambda b: (b, 0)),
      compiler_params=pltpu.CompilerParams(
          dimension_semantics=("parallel",),
          vmem_limit_bytes=32 * 1024 * 1024),
  )(x_tm, wpack, ab_l, ab_g)
  return out[:, 0]                                             # (BS,)


# ----------------- pure-JAX reference (mirrors the PyTorch module) ----------
def reference_forward(x_ids, P):
  x = P['emb'][x_ids].astype(jnp.float32)                      # (BS, SEQ, EMB)
  bs, seq, _ = x.shape
  H = HID

  def lstm_dir(inp, wih, whh, b, reverse):
    h = jnp.zeros((bs, H)); c = jnp.zeros((bs, H))
    outs = [None] * seq
    ts = range(seq - 1, -1, -1) if reverse else range(seq)
    for t in ts:
      g = inp[:, t, :] @ wih + h @ whh + b
      i_g = jax.nn.sigmoid(g[:, :H]); f_g = jax.nn.sigmoid(g[:, H:2 * H])
      g_g = jnp.tanh(g[:, 2 * H:3 * H]); o_g = jax.nn.sigmoid(g[:, 3 * H:])
      c = f_g * c + i_g * g_g
      h = o_g * jnp.tanh(c)
      outs[t] = h
    return jnp.stack(outs, axis=1)

  def gru_dir(inp, wih, whh, bih, bhh, reverse):
    h = jnp.zeros((bs, H))
    outs = [None] * seq
    ts = range(seq - 1, -1, -1) if reverse else range(seq)
    for t in ts:
      gi = inp[:, t, :] @ wih + bih
      gh = h @ whh + bhh
      r = jax.nn.sigmoid(gi[:, :H] + gh[:, :H])
      z = jax.nn.sigmoid(gi[:, H:2 * H] + gh[:, H:2 * H])
      n = jnp.tanh(gi[:, 2 * H:] + r * gh[:, 2 * H:])
      h = (1.0 - z) * n + z * h
      outs[t] = h
    return jnp.stack(outs, axis=1)

  h_lstm = jnp.concatenate(
      [lstm_dir(x, P['wih_lf'], P['whh_lf'], P['b_lf'], False),
       lstm_dir(x, P['wih_lb'], P['whh_lb'], P['b_lb'], True)], axis=2)
  h_gru = jnp.concatenate(
      [gru_dir(h_lstm, P['wih_gf'], P['whh_gf'], P['bih_gf'], P['bhh_gf'], False),
       gru_dir(h_lstm, P['wih_gb'], P['whh_gb'], P['bih_gb'], P['bhh_gb'], True)],
      axis=2)

  def attention(xseq, aw, ab):
    e = (xseq.reshape(bs * seq, 2 * H) @ aw.reshape(2 * H, 1)).reshape(bs, seq)
    e = jnp.tanh(e + ab.reshape(seq))
    a = jnp.exp(e)
    a = a / jnp.sum(a, axis=1, keepdims=True) + 1e-10
    return jnp.sum(xseq * a[:, :, None], axis=1)

  h_attn_lstm = attention(h_lstm, P['aw_l'], P['ab_l'])
  h_attn_gru = attention(h_gru, P['aw_g'], P['ab_g'])
  avg_pool = jnp.mean(h_gru, axis=1)
  max_pool = jnp.max(h_gru, axis=1)
  feat = jnp.concatenate([h_attn_lstm, h_attn_gru, avg_pool, max_pool], axis=1)
  hid = jax.nn.relu(feat @ P['fc_w'] + P['fc_b'])
  out = hid @ P['out_w'] + P['out_b']
  return out[:, 0]


def init_params(key):
  # Deterministic synthetic init; shapes follow the PyTorch module
  # (weights pre-transposed to (in, out); LSTM bias = b_ih + b_hh combined;
  # LSTM/GRU gates in standard PyTorch order - build_weight_pack reorders).
  ks = jax.random.split(key, 23)
  def w(k, shape, scale=0.1):
    return (scale * jax.random.normal(k, shape)).astype(jnp.float32)
  H = HID
  return dict(
      emb=w(ks[0], (VOCAB, EMB), 1.0),
      wih_lf=w(ks[1], (EMB, 4 * H)), whh_lf=w(ks[2], (H, 4 * H)),
      b_lf=w(ks[3], (1, 4 * H)),
      wih_lb=w(ks[4], (EMB, 4 * H)), whh_lb=w(ks[5], (H, 4 * H)),
      b_lb=w(ks[6], (1, 4 * H)),
      wih_gf=w(ks[7], (2 * H, 3 * H)), whh_gf=w(ks[8], (H, 3 * H)),
      bih_gf=w(ks[9], (1, 3 * H)), bhh_gf=w(ks[10], (1, 3 * H)),
      wih_gb=w(ks[11], (2 * H, 3 * H)), whh_gb=w(ks[12], (H, 3 * H)),
      bih_gb=w(ks[13], (1, 3 * H)), bhh_gb=w(ks[14], (1, 3 * H)),
      aw_l=w(ks[15], (1, 2 * H)), ab_l=w(ks[16], (SEQ, 1, 1)),
      aw_g=w(ks[17], (1, 2 * H)), ab_g=w(ks[18], (SEQ, 1, 1)),
      fc_w=w(ks[19], (8 * H, 16)), fc_b=w(ks[20], (1, 16)),
      out_w=w(ks[21], (16, 1)), out_b=w(ks[22], (1, 1)),
  )


if __name__ == "__main__":
  key = jax.random.PRNGKey(0)
  P = init_params(jax.random.fold_in(key, 1))
  x_ids = jax.random.randint(jax.random.fold_in(key, 2), (BS, SEQ), 0, VOCAB)

  # Weight prep hoisted out of the forward path: built once at load time,
  # one packed DMA per kernel launch instead of 18 small ones.
  wpack = build_weight_pack(P)

  out = jax.block_until_ready(
      rnn_attn_forward(x_ids, P['emb'], wpack, P['ab_l'], P['ab_g']))
  ref = jax.block_until_ready(reference_forward(x_ids, P))
  assert out.shape == (BS,)
  np.testing.assert_allclose(np.asarray(out), np.asarray(ref),
                             rtol=5e-3, atol=5e-3)
  print("KERNEL_OK")
</pallas_src>

<mosaic_0001>
module attributes {stable_mosaic.version = 11 : i64} {
  func.func @_rnn_attn_kernel(%arg0: i32, %arg1: memref<8x2x32xf32, #tpu.memory_space<vmem>>, %arg2: memref<392x128xf32, #tpu.memory_space<vmem>>, %arg3: memref<8x1x1xf32, #tpu.memory_space<vmem>>, %arg4: memref<8x1x1xf32, #tpu.memory_space<vmem>>, %arg5: memref<2x128xf32, #tpu.memory_space<vmem>>) attributes {dimension_semantics = [#tpu.dimension_semantics<parallel>], iteration_bounds = array<i64: 1>, scalar_prefetch = 0 : i64, scratch_operands = 0 : i64, tpu.core_type = #tpu.core_type<tc>, window_params = [{transform_indices = @transform_0, window_bounds = array<i64: 8, 2, 32>}, {pipeline_mode = #tpu.pipeline_mode<synchronous>, transform_indices = @transform_1, window_bounds = array<i64: 392, 128>}, {pipeline_mode = #tpu.pipeline_mode<synchronous>, transform_indices = @transform_2, window_bounds = array<i64: 8, 1, 1>}, {pipeline_mode = #tpu.pipeline_mode<synchronous>, transform_indices = @transform_3, window_bounds = array<i64: 8, 1, 1>}, {transform_indices = @transform_4, window_bounds = array<i64: 2, 128>}]} {
    %c0 = arith.constant 0 : index
    %c0_0 = arith.constant 0 : index
    %0 = vector.load %arg2[%c0, %c0_0] : memref<392x128xf32, #tpu.memory_space<vmem>>, vector<32x128xf32>
    %c32 = arith.constant 32 : index
    %c0_1 = arith.constant 0 : index
    %1 = vector.load %arg2[%c32, %c0_1] : memref<392x128xf32, #tpu.memory_space<vmem>>, vector<32x128xf32>
    %c64 = arith.constant 64 : index
    %c0_2 = arith.constant 0 : index
    %2 = vector.load %arg2[%c64, %c0_2] : memref<392x128xf32, #tpu.memory_space<vmem>>, vector<32x128xf32>
    %c96 = arith.constant 96 : index
    %c0_3 = arith.constant 0 : index
    %3 = vector.load %arg2[%c96, %c0_3] : memref<392x128xf32, #tpu.memory_space<vmem>>, vector<32x128xf32>
    %c128 = arith.constant 128 : index
    %c0_4 = arith.constant 0 : index
    %4 = vector.load %arg2[%c128, %c0_4] : memref<392x128xf32, #tpu.memory_space<vmem>>, vector<128x128xf32>
    %c256 = arith.constant 256 : index
    %c0_5 = arith.constant 0 : index
    %5 = vector.load %arg2[%c256, %c0_5] : memref<392x128xf32, #tpu.memory_space<vmem>>, vector<128x128xf32>
    %c384 = arith.constant 384 : index
    %c0_6 = arith.constant 0 : index
    %6 = vector.load %arg2[%c384, %c0_6] : memref<392x128xf32, #tpu.memory_space<vmem>>, vector<8x128xf32>
    %7 = vector.extract_strided_slice %6 {offsets = [0, 0], sizes = [1, 128], strides = [1, 1]} : vector<8x128xf32> to vector<1x128xf32>
    %8 = vector.extract_strided_slice %6 {offsets = [1, 0], sizes = [1, 128], strides = [1, 1]} : vector<8x128xf32> to vector<1x128xf32>
    %9 = vector.extract_strided_slice %6 {offsets = [2, 0], sizes = [1, 128], strides = [1, 1]} : vector<8x128xf32> to vector<1x128xf32>
    %10 = vector.extract_strided_slice %6 {offsets = [3, 0], sizes = [1, 32], strides = [1, 1]} : vector<8x128xf32> to vector<1x32xf32>
    %11 = vector.extract_strided_slice %6 {offsets = [4, 0], sizes = [1, 128], strides = [1, 1]} : vector<8x128xf32> to vector<1x128xf32>
    %12 = vector.extract_strided_slice %6 {offsets = [5, 0], sizes = [1, 128], strides = [1, 1]} : vector<8x128xf32> to vector<1x128xf32>
    %13 = tpu.iota {dimensions = array<i32: 1>} : vector<1x128xi32>
    %c32_i32 = arith.constant 32 : i32
    %c0_i32 = arith.constant 0 : i32
    %14 = arith.cmpi eq, %c32_i32, %c0_i32 : i32
    %c1_i32 = arith.constant 1 : i32
    %15 = arith.select %14, %c1_i32, %c32_i32 : i32
    %16 = vector.broadcast %15 : i32 to vector<1x128xi32>
    %17 = arith.remsi %13, %16 : vector<1x128xi32>
    %c0_i32_7 = arith.constant 0 : i32
    %18 = vector.broadcast %c0_i32_7 : i32 to vector<1x128xi32>
    %19 = arith.cmpi ne, %17, %18 : vector<1x128xi32>
    %c0_i32_8 = arith.constant 0 : i32
    %20 = vector.broadcast %c0_i32_8 : i32 to vector<1x128xi32>
    %21 = arith.cmpi slt, %17, %20 : vector<1x128xi32>
    %c0_i32_9 = arith.constant 0 : i32
    %22 = arith.cmpi slt, %15, %c0_i32_9 : i32
    %23 = vector.broadcast %22 : i1 to vector<1x128xi1>
    %24 = vector.broadcast %23 : vector<1x128xi1> to vector<1x128xi1>
    %25 = arith.xori %21, %24 : vector<1x128xi1>
    %26 = arith.andi %25, %19 : vector<1x128xi1>
    %27 = vector.broadcast %15 : i32 to vector<1x128xi32>
    %28 = arith.addi %17, %27 : vector<1x128xi32>
    %29 = arith.select %26, %28, %17 : vector<1x128xi1>, vector<1x128xi32>
    %c16_i32 = arith.constant 16 : i32
    %30 = vector.broadcast %c16_i32 : i32 to vector<1x128xi32>
    %31 = arith.cmpi slt, %29, %30 : vector<1x128xi32>
    %32 = tpu.iota {dimensions = array<i32: 1>} : vector<1x32xi32>
    %c16_i32_10 = arith.constant 16 : i32
    %33 = vector.broadcast %c16_i32_10 : i32 to vector<1x32xi32>
    %34 = arith.cmpi slt, %32, %33 : vector<1x32xi32>
    %c0_11 = arith.constant 0 : index
    %c0_12 = arith.constant 0 : index
    %c0_13 = arith.constant 0 : index
    %35 = vector.load %arg1[%c0_11, %c0_12, %c0_13] : memref<8x2x32xf32, #tpu.memory_space<vmem>>, vector<8x2x32xf32>
    %36 = vector.shape_cast %35 : vector<8x2x32xf32> to vector<16x32xf32>
    %cst = arith.constant dense<0.000000e+00> : vector<16x128xf32>
    %37 = tpu.matmul %36, %0, %cst {dimension_numbers = #tpu.dot_dimension_numbers<[1], [0], [0], [1], [0, 0, 1, 1], [], []>} : vector<16x32xf32>, vector<32x128xf32>, vector<16x128xf32> -> vector<16x128xf32>
    %38 = vector.broadcast %7 : vector<1x128xf32> to vector<16x128xf32>
    %39 = arith.addf %37, %38 : vector<16x128xf32>
    %40 = vector.shape_cast %39 : vector<16x128xf32> to vector<8x2x128xf32>
    %cst_14 = arith.constant 0.000000e+00 : f32
    %41 = vector.broadcast %cst_14 : f32 to vector<2x32xf32>
    %cst_15 = arith.constant 0.000000e+00 : f32
    %42 = vector.broadcast %cst_15 : f32 to vector<2x32xf32>
    %43 = vector.extract_strided_slice %40 {offsets = [0, 0, 0], sizes = [1, 2, 128], strides = [1, 1, 1]} : vector<8x2x128xf32> to vector<1x2x128xf32>
    %44 = vector.shape_cast %43 : vector<1x2x128xf32> to vector<2x128xf32>
    %45 = vector.extract_strided_slice %40 {offsets = [7, 0, 0], sizes = [1, 2, 128], strides = [1, 1, 1]} : vector<8x2x128xf32> to vector<1x2x128xf32>
    %46 = vector.shape_cast %45 : vector<1x2x128xf32> to vector<2x128xf32>
    %47 = vector.shape_cast %31 : vector<1x128xi1> to vector<1x128xi1>
    %48 = vector.broadcast %47 : vector<1x128xi1> to vector<2x128xi1>
    %49 = arith.select %48, %44, %46 : vector<2x128xi1>, vector<2x128xf32>
    %cst_16 = arith.constant dense<0.000000e+00> : vector<2x128xf32>
    %50 = tpu.matmul %41, %1, %cst_16 {dimension_numbers = #tpu.dot_dimension_numbers<[1], [0], [0], [1], [0, 0, 1, 1], [], []>} : vector<2x32xf32>, vector<32x128xf32>, vector<2x128xf32> -> vector<2x128xf32>
    %51 = arith.addf %49, %50 : vector<2x128xf32>
    %52 = vector.extract_strided_slice %51 {offsets = [0, 0], sizes = [2, 96], strides = [1, 1]} : vector<2x128xf32> to vector<2x96xf32>
    %53 = arith.negf %52 : vector<2x96xf32>
    %54 = math.exp %53 : vector<2x96xf32>
    %cst_17 = arith.constant 1.000000e+00 : f32
    %55 = vector.broadcast %cst_17 : f32 to vector<2x96xf32>
    %56 = arith.addf %55, %54 : vector<2x96xf32>
    %57 = arith.divf %55, %56 : vector<2x96xf32>
    %58 = vector.extract_strided_slice %51 {offsets = [0, 96], sizes = [2, 32], strides = [1, 1]} : vector<2x128xf32> to vector<2x32xf32>
    %59 = math.tanh %58 : vector<2x32xf32>
    %60 = vector.extract_strided_slice %57 {offsets = [0, 32], sizes = [2, 32], strides = [1, 1]} : vector<2x96xf32> to vector<2x32xf32>
    %61 = arith.mulf %60, %42 : vector<2x32xf32>
    %62 = vector.extract_strided_slice %57 {offsets = [0, 0], sizes = [2, 32], strides = [1, 1]} : vector<2x96xf32> to vector<2x32xf32>
    %63 = arith.mulf %62, %59 : vector<2x32xf32>
    %64 = arith.addf %61, %63 : vector<2x32xf32>
    %65 = vector.extract_strided_slice %57 {offsets = [0, 64], sizes = [2, 32], strides = [1, 1]} : vector<2x96xf32> to vector<2x32xf32>
    %66 = math.tanh %64 : vector<2x32xf32>
    %67 = arith.mulf %65, %66 : vector<2x32xf32>
    %68 = vector.extract_strided_slice %40 {offsets = [1, 0, 0], sizes = [1, 2, 128], strides = [1, 1, 1]} : vector<8x2x128xf32> to vector<1x2x128xf32>
    %69 = vector.shape_cast %68 : vector<1x2x128xf32> to vector<2x128xf32>
    %70 = vector.extract_strided_slice %40 {offsets = [6, 0, 0], sizes = [1, 2, 128], strides = [1, 1, 1]} : vector<8x2x128xf32> to vector<1x2x128xf32>
    %71 = vector.shape_cast %70 : vector<1x2x128xf32> to vector<2x128xf32>
    %72 = vector.shape_cast %31 : vector<1x128xi1> to vector<1x128xi1>
    %73 = vector.broadcast %72 : vector<1x128xi1> to vector<2x128xi1>
    %74 = arith.select %73, %69, %71 : vector<2x128xi1>, vector<2x128xf32>
    %cst_18 = arith.constant dense<0.000000e+00> : vector<2x128xf32>
    %75 = tpu.matmul %67, %1, %cst_18 {dimension_numbers = #tpu.dot_dimension_numbers<[1], [0], [0], [1], [0, 0, 1, 1], [], []>} : vector<2x32xf32>, vector<32x128xf32>, vector<2x128xf32> -> vector<2x128xf32>
    %76 = arith.addf %74, %75 : vector<2x128xf32>
    %77 = vector.extract_strided_slice %76 {offsets = [0, 0], sizes = [2, 96], strides = [1, 1]} : vector<2x128xf32> to vector<2x96xf32>
    %78 = arith.negf %77 : vector<2x96xf32>
    %79 = math.exp %78 : vector<2x96xf32>
    %cst_19 = arith.constant 1.000000e+00 : f32
    %80 = vector.broadcast %cst_19 : f32 to vector<2x96xf32>
    %81 = arith.addf %80, %79 : vector<2x96xf32>
    %82 = arith.divf %80, %81 : vector<2x96xf32>
    %83 = vector.extract_strided_slice %76 {offsets = [0, 96], sizes = [2, 32], strides = [1, 1]} : vector<2x128xf32> to vector<2x32xf32>
    %84 = math.tanh %83 : vector<2x32xf32>
    %85 = vector.extract_strided_slice %82 {offsets = [0, 32], sizes = [2, 32], strides = [1, 1]} : vector<2x96xf32> to vector<2x32xf32>
    %86 = arith.mulf %85, %64 : vector<2x32xf32>
    %87 = vector.extract_strided_slice %82 {offsets = [0, 0], sizes = [2, 32], strides = [1, 1]} : vector<2x96xf32> to vector<2x32xf32>
    %88 = arith.mulf %87, %84 : vector<2x32xf32>
    %89 = arith.addf %86, %88 : vector<2x32xf32>
    %90 = vector.extract_strided_slice %82 {offsets = [0, 64], sizes = [2, 32], strides = [1, 1]} : vector<2x96xf32> to vector<2x32xf32>
    %91 = math.tanh %89 : vector<2x32xf32>
    %92 = arith.mulf %90, %91 : vector<2x32xf32>
    %93 = vector.extract_strided_slice %40 {offsets = [2, 0, 0], sizes = [1, 2, 128], strides = [1, 1, 1]} : vector<8x2x128xf32> to vector<1x2x128xf32>
    %94 = vector.shape_cast %93 : vector<1x2x128xf32> to vector<2x128xf32>
    %95 = vector.extract_strided_slice %40 {offsets = [5, 0, 0], sizes = [1, 2, 128], strides = [1, 1, 1]} : vector<8x2x128xf32> to vector<1x2x128xf32>
    %96 = vector.shape_cast %95 : vector<1x2x128xf32> to vector<2x128xf32>
    %97 = vector.shape_cast %31 : vector<1x128xi1> to vector<1x128xi1>
    %98 = vector.broadcast %97 : vector<1x128xi1> to vector<2x128xi1>
    %99 = arith.select %98, %94, %96 : vector<2x128xi1>, vector<2x128xf32>
    %cst_20 = arith.constant dense<0.000000e+00> : vector<2x128xf32>
    %100 = tpu.matmul %92, %1, %cst_20 {dimension_numbers = #tpu.dot_dimension_numbers<[1], [0], [0], [1], [0, 0, 1, 1], [], []>} : vector<2x32xf32>, vector<32x128xf32>, vector<2x128xf32> -> vector<2x128xf32>
    %101 = arith.addf %99, %100 : vector<2x128xf32>
    %102 = vector.extract_strided_slice %101 {offsets = [0, 0], sizes = [2, 96], strides = [1, 1]} : vector<2x128xf32> to vector<2x96xf32>
    %103 = arith.negf %102 : vector<2x96xf32>
    %104 = math.exp %103 : vector<2x96xf32>
    %cst_21 = arith.constant 1.000000e+00 : f32
    %105 = vector.broadcast %cst_21 : f32 to vector<2x96xf32>
    %106 = arith.addf %105, %104 : vector<2x96xf32>
    %107 = arith.divf %105, %106 : vector<2x96xf32>
    %108 = vector.extract_strided_slice %101 {offsets = [0, 96], sizes = [2, 32], strides = [1, 1]} : vector<2x128xf32> to vector<2x32xf32>
    %109 = math.tanh %108 : vector<2x32xf32>
    %110 = vector.extract_strided_slice %107 {offsets = [0, 32], sizes = [2, 32], strides = [1, 1]} : vector<2x96xf32> to vector<2x32xf32>
    %111 = arith.mulf %110, %89 : vector<2x32xf32>
    %112 = vector.extract_strided_slice %107 {offsets = [0, 0], sizes = [2, 32], strides = [1, 1]} : vector<2x96xf32> to vector<2x32xf32>
    %113 = arith.mulf %112, %109 : vector<2x32xf32>
    %114 = arith.addf %111, %113 : vector<2x32xf32>
    %115 = vector.extract_strided_slice %107 {offsets = [0, 64], sizes = [2, 32], strides = [1, 1]} : vector<2x96xf32> to vector<2x32xf32>
    %116 = math.tanh %114 : vector<2x32xf32>
    %117 = arith.mulf %115, %116 : vector<2x32xf32>
    %118 = vector.extract_strided_slice %40 {offsets = [3, 0, 0], sizes = [1, 2, 128], strides = [1, 1, 1]} : vector<8x2x128xf32> to vector<1x2x128xf32>
    %119 = vector.shape_cast %118 : vector<1x2x128xf32> to vector<2x128xf32>
    %120 = vector.extract_strided_slice %40 {offsets = [4, 0, 0], sizes = [1, 2, 128], strides = [1, 1, 1]} : vector<8x2x128xf32> to vector<1x2x128xf32>
    %121 = vector.shape_cast %120 : vector<1x2x128xf32> to vector<2x128xf32>
    %122 = vector.shape_cast %31 : vector<1x128xi1> to vector<1x128xi1>
    %123 = vector.broadcast %122 : vector<1x128xi1> to vector<2x128xi1>
    %124 = arith.select %123, %119, %121 : vector<2x128xi1>, vector<2x128xf32>
    %cst_22 = arith.constant dense<0.000000e+00> : vector<2x128xf32>
    %125 = tpu.matmul %117, %1, %cst_22 {dimension_numbers = #tpu.dot_dimension_numbers<[1], [0], [0], [1], [0, 0, 1, 1], [], []>} : vector<2x32xf32>, vector<32x128xf32>, vector<2x128xf32> -> vector<2x128xf32>
    %126 = arith.addf %124, %125 : vector<2x128xf32>
    %127 = vector.extract_strided_slice %126 {offsets = [0, 0], sizes = [2, 96], strides = [1, 1]} : vector<2x128xf32> to vector<2x96xf32>
    %128 = arith.negf %127 : vector<2x96xf32>
    %129 = math.exp %128 : vector<2x96xf32>
    %cst_23 = arith.constant 1.000000e+00 : f32
    %130 = vector.broadcast %cst_23 : f32 to vector<2x96xf32>
    %131 = arith.addf %130, %129 : vector<2x96xf32>
    %132 = arith.divf %130, %131 : vector<2x96xf32>
    %133 = vector.extract_strided_slice %126 {offsets = [0, 96], sizes = [2, 32], strides = [1, 1]} : vector<2x128xf32> to vector<2x32xf32>
    %134 = math.tanh %133 : vector<2x32xf32>
    %135 = vector.extract_strided_slice %132 {offsets = [0, 32], sizes = [2, 32], strides = [1, 1]} : vector<2x96xf32> to vector<2x32xf32>
    %136 = arith.mulf %135, %114 : vector<2x32xf32>
    %137 = vector.extract_strided_slice %132 {offsets = [0, 0], sizes = [2, 32], strides = [1, 1]} : vector<2x96xf32> to vector<2x32xf32>
    %138 = arith.mulf %137, %134 : vector<2x32xf32>
    %139 = arith.addf %136, %138 : vector<2x32xf32>
    %140 = vector.extract_strided_slice %132 {offsets = [0, 64], sizes = [2, 32], strides = [1, 1]} : vector<2x96xf32> to vector<2x32xf32>
    %141 = math.tanh %139 : vector<2x32xf32>
    %142 = arith.mulf %140, %141 : vector<2x32xf32>
    %143 = vector.extract_strided_slice %40 {offsets = [4, 0, 0], sizes = [1, 2, 128], strides = [1, 1, 1]} : vector<8x2x128xf32> to vector<1x2x128xf32>
    %144 = vector.shape_cast %143 : vector<1x2x128xf32> to vector<2x128xf32>
    %145 = vector.extract_strided_slice %40 {offsets = [3, 0, 0], sizes = [1, 2, 128], strides = [1, 1, 1]} : vector<8x2x128xf32> to vector<1x2x128xf32>
    %146 = vector.shape_cast %145 : vector<1x2x128xf32> to vector<2x128xf32>
    %147 = vector.shape_cast %31 : vector<1x128xi1> to vector<1x128xi1>
    %148 = vector.broadcast %147 : vector<1x128xi1> to vector<2x128xi1>
    %149 = arith.select %148, %144, %146 : vector<2x128xi1>, vector<2x128xf32>
    %cst_24 = arith.constant dense<0.000000e+00> : vector<2x128xf32>
    %150 = tpu.matmul %142, %1, %cst_24 {dimension_numbers = #tpu.dot_dimension_numbers<[1], [0], [0], [1], [0, 0, 1, 1], [], []>} : vector<2x32xf32>, vector<32x128xf32>, vector<2x128xf32> -> vector<2x128xf32>
    %151 = arith.addf %149, %150 : vector<2x128xf32>
    %152 = vector.extract_strided_slice %151 {offsets = [0, 0], sizes = [2, 96], strides = [1, 1]} : vector<2x128xf32> to vector<2x96xf32>
    %153 = arith.negf %152 : vector<2x96xf32>
    %154 = math.exp %153 : vector<2x96xf32>
    %cst_25 = arith.constant 1.000000e+00 : f32
    %155 = vector.broadcast %cst_25 : f32 to vector<2x96xf32>
    %156 = arith.addf %155, %154 : vector<2x96xf32>
    %157 = arith.divf %155, %156 : vector<2x96xf32>
    %158 = vector.extract_strided_slice %151 {offsets = [0, 96], sizes = [2, 32], strides = [1, 1]} : vector<2x128xf32> to vector<2x32xf32>
    %159 = math.tanh %158 : vector<2x32xf32>
    %160 = vector.extract_strided_slice %157 {offsets = [0, 32], sizes = [2, 32], strides = [1, 1]} : vector<2x96xf32> to vector<2x32xf32>
    %161 = arith.mulf %160, %139 : vector<2x32xf32>
    %162 = vector.extract_strided_slice %157 {offsets = [0, 0], sizes = [2, 32], strides = [1, 1]} : vector<2x96xf32> to vector<2x32xf32>
    %163 = arith.mulf %162, %159 : vector<2x32xf32>
    %164 = arith.addf %161, %163 : vector<2x32xf32>
    %165 = vector.extract_strided_slice %157 {offsets = [0, 64], sizes = [2, 32], strides = [1, 1]} : vector<2x96xf32> to vector<2x32xf32>
    %166 = math.tanh %164 : vector<2x32xf32>
    %167 = arith.mulf %165, %166 : vector<2x32xf32>
    %168 = vector.extract_strided_slice %40 {offsets = [5, 0, 0], sizes = [1, 2, 128], strides = [1, 1, 1]} : vector<8x2x128xf32> to vector<1x2x128xf32>
    %169 = vector.shape_cast %168 : vector<1x2x128xf32> to vector<2x128xf32>
    %170 = vector.extract_strided_slice %40 {offsets = [2, 0, 0], sizes = [1, 2, 128], strides = [1, 1, 1]} : vector<8x2x128xf32> to vector<1x2x128xf32>
    %171 = vector.shape_cast %170 : vector<1x2x128xf32> to vector<2x128xf32>
    %172 = vector.shape_cast %31 : vector<1x128xi1> to vector<1x128xi1>
    %173 = vector.broadcast %172 : vector<1x128xi1> to vector<2x128xi1>
    %174 = arith.select %173, %169, %171 : vector<2x128xi1>, vector<2x128xf32>
    %cst_26 = arith.constant dense<0.000000e+00> : vector<2x128xf32>
    %175 = tpu.matmul %167, %1, %cst_26 {dimension_numbers = #tpu.dot_dimension_numbers<[1], [0], [0], [1], [0, 0, 1, 1], [], []>} : vector<2x32xf32>, vector<32x128xf32>, vector<2x128xf32> -> vector<2x128xf32>
    %176 = arith.addf %174, %175 : vector<2x128xf32>
    %177 = vector.extract_strided_slice %176 {offsets = [0, 0], sizes = [2, 96], strides = [1, 1]} : vector<2x128xf32> to vector<2x96xf32>
    %178 = arith.negf %177 : vector<2x96xf32>
    %179 = math.exp %178 : vector<2x96xf32>
    %cst_27 = arith.constant 1.000000e+00 : f32
    %180 = vector.broadcast %cst_27 : f32 to vector<2x96xf32>
    %181 = arith.addf %180, %179 : vector<2x96xf32>
    %182 = arith.divf %180, %181 : vector<2x96xf32>
    %183 = vector.extract_strided_slice %176 {offsets = [0, 96], sizes = [2, 32], strides = [1, 1]} : vector<2x128xf32> to vector<2x32xf32>
    %184 = math.tanh %183 : vector<2x32xf32>
    %185 = vector.extract_strided_slice %182 {offsets = [0, 32], sizes = [2, 32], strides = [1, 1]} : vector<2x96xf32> to vector<2x32xf32>
    %186 = arith.mulf %185, %164 : vector<2x32xf32>
    %187 = vector.extract_strided_slice %182 {offsets = [0, 0], sizes = [2, 32], strides = [1, 1]} : vector<2x96xf32> to vector<2x32xf32>
    %188 = arith.mulf %187, %184 : vector<2x32xf32>
    %189 = arith.addf %186, %188 : vector<2x32xf32>
    %190 = vector.extract_strided_slice %182 {offsets = [0, 64], sizes = [2, 32], strides = [1, 1]} : vector<2x96xf32> to vector<2x32xf32>
    %191 = math.tanh %189 : vector<2x32xf32>
    %192 = arith.mulf %190, %191 : vector<2x32xf32>
    %193 = vector.extract_strided_slice %40 {offsets = [6, 0, 0], sizes = [1, 2, 128], strides = [1, 1, 1]} : vector<8x2x128xf32> to vector<1x2x128xf32>
    %194 = vector.shape_cast %193 : vector<1x2x128xf32> to vector<2x128xf32>
    %195 = vector.extract_strided_slice %40 {offsets = [1, 0, 0], sizes = [1, 2, 128], strides = [1, 1, 1]} : vector<8x2x128xf32> to vector<1x2x128xf32>
    %196 = vector.shape_cast %195 : vector<1x2x128xf32> to vector<2x128xf32>
    %197 = vector.shape_cast %31 : vector<1x128xi1> to vector<1x128xi1>
    %198 = vector.broadcast %197 : vector<1x128xi1> to vector<2x128xi1>
    %199 = arith.select %198, %194, %196 : vector<2x128xi1>, vector<2x128xf32>
    %cst_28 = arith.constant dense<0.000000e+00> : vector<2x128xf32>
    %200 = tpu.matmul %192, %1, %cst_28 {dimension_numbers = #tpu.dot_dimension_numbers<[1], [0], [0], [1], [0, 0, 1, 1], [], []>} : vector<2x32xf32>, vector<32x128xf32>, vector<2x128xf32> -> vector<2x128xf32>
    %201 = arith.addf %199, %200 : vector<2x128xf32>
    %202 = vector.extract_strided_slice %201 {offsets = [0, 0], sizes = [2, 96], strides = [1, 1]} : vector<2x128xf32> to vector<2x96xf32>
    %203 = arith.negf %202 : vector<2x96xf32>
    %204 = math.exp %203 : vector<2x96xf32>
    %cst_29 = arith.constant 1.000000e+00 : f32
    %205 = vector.broadcast %cst_29 : f32 to vector<2x96xf32>
    %206 = arith.addf %205, %204 : vector<2x96xf32>
    %207 = arith.divf %205, %206 : vector<2x96xf32>
    %208 = vector.extract_strided_slice %201 {offsets = [0, 96], sizes = [2, 32], strides = [1, 1]} : vector<2x128xf32> to vector<2x32xf32>
    %209 = math.tanh %208 : vector<2x32xf32>
    %210 = vector.extract_strided_slice %207 {offsets = [0, 32], sizes = [2, 32], strides = [1, 1]} : vector<2x96xf32> to vector<2x32xf32>
    %211 = arith.mulf %210, %189 : vector<2x32xf32>
    %212 = vector.extract_strided_slice %207 {offsets = [0, 0], sizes = [2, 32], strides = [1, 1]} : vector<2x96xf32> to vector<2x32xf32>
    %213 = arith.mulf %212, %209 : vector<2x32xf32>
    %214 = arith.addf %211, %213 : vector<2x32xf32>
    %215 = vector.extract_strided_slice %207 {offsets = [0, 64], sizes = [2, 32], strides = [1, 1]} : vector<2x96xf32> to vector<2x32xf32>
    %216 = math.tanh %214 : vector<2x32xf32>
    %217 = arith.mulf %215, %216 : vector<2x32xf32>
    %218 = vector.extract_strided_slice %40 {offsets = [7, 0, 0], sizes = [1, 2, 128], strides = [1, 1, 1]} : vector<8x2x128xf32> to vector<1x2x128xf32>
    %219 = vector.shape_cast %218 : vector<1x2x128xf32> to vector<2x128xf32>
    %220 = vector.extract_strided_slice %40 {offsets = [0, 0, 0], sizes = [1, 2, 128], strides = [1, 1, 1]} : vector<8x2x128xf32> to vector<1x2x128xf32>
    %221 = vector.shape_cast %220 : vector<1x2x128xf32> to vector<2x128xf32>
    %222 = vector.shape_cast %31 : vector<1x128xi1> to vector<1x128xi1>
    %223 = vector.broadcast %222 : vector<1x128xi1> to vector<2x128xi1>
    %224 = arith.select %223, %219, %221 : vector<2x128xi1>, vector<2x128xf32>
    %cst_30 = arith.constant dense<0.000000e+00> : vector<2x128xf32>
    %225 = tpu.matmul %217, %1, %cst_30 {dimension_numbers = #tpu.dot_dimension_numbers<[1], [0], [0], [1], [0, 0, 1, 1], [], []>} : vector<2x32xf32>, vector<32x128xf32>, vector<2x128xf32> -> vector<2x128xf32>
    %226 = arith.addf %224, %225 : vector<2x128xf32>
    %227 = vector.extract_strided_slice %226 {offsets = [0, 0], sizes = [2, 96], strides = [1, 1]} : vector<2x128xf32> to vector<2x96xf32>
    %228 = arith.negf %227 : vector<2x96xf32>
    %229 = math.exp %228 : vector<2x96xf32>
    %cst_31 = arith.constant 1.000000e+00 : f32
    %230 = vector.broadcast %cst_31 : f32 to vector<2x96xf32>
    %231 = arith.addf %230, %229 : vector<2x96xf32>
    %232 = arith.divf %230, %231 : vector<2x96xf32>
    %233 = vector.extract_strided_slice %226 {offsets = [0, 96], sizes = [2, 32], strides = [1, 1]} : vector<2x128xf32> to vector<2x32xf32>
    %234 = math.tanh %233 : vector<2x32xf32>
    %235 = vector.extract_strided_slice %232 {offsets = [0, 32], sizes = [2, 32], strides = [1, 1]} : vector<2x96xf32> to vector<2x32xf32>
    %236 = arith.mulf %235, %214 : vector<2x32xf32>
    %237 = vector.extract_strided_slice %232 {offsets = [0, 0], sizes = [2, 32], strides = [1, 1]} : vector<2x96xf32> to vector<2x32xf32>
    %238 = arith.mulf %237, %234 : vector<2x32xf32>
    %239 = arith.addf %236, %238 : vector<2x32xf32>
    %240 = vector.extract_strided_slice %232 {offsets = [0, 64], sizes = [2, 32], strides = [1, 1]} : vector<2x96xf32> to vector<2x32xf32>
    %241 = math.tanh %239 : vector<2x32xf32>
    %242 = arith.mulf %240, %241 : vector<2x32xf32>
    %243 = vector.shape_cast %34 : vector<1x32xi1> to vector<1x32xi1>
    %244 = vector.broadcast %243 : vector<1x32xi1> to vector<2x32xi1>
    %245 = arith.select %244, %67, %242 : vector<2x32xi1>, vector<2x32xf32>
    %246 = vector.shape_cast %34 : vector<1x32xi1> to vector<1x32xi1>
    %247 = vector.broadcast %246 : vector<1x32xi1> to vector<2x32xi1>
    %248 = arith.select %247, %92, %217 : vector<2x32xi1>, vector<2x32xf32>
    %249 = vector.shape_cast %34 : vector<1x32xi1> to vector<1x32xi1>
    %250 = vector.broadcast %249 : vector<1x32xi1> to vector<2x32xi1>
    %251 = arith.select %250, %117, %192 : vector<2x32xi1>, vector<2x32xf32>
    %252 = vector.shape_cast %34 : vector<1x32xi1> to vector<1x32xi1>
    %253 = vector.broadcast %252 : vector<1x32xi1> to vector<2x32xi1>
    %254 = arith.select %253, %142, %167 : vector<2x32xi1>, vector<2x32xf32>
    %255 = vector.shape_cast %34 : vector<1x32xi1> to vector<1x32xi1>
    %256 = vector.broadcast %255 : vector<1x32xi1> to vector<2x32xi1>
    %257 = arith.select %256, %167, %142 : vector<2x32xi1>, vector<2x32xf32>
    %258 = vector.shape_cast %34 : vector<1x32xi1> to vector<1x32xi1>
    %259 = vector.broadcast %258 : vector<1x32xi1> to vector<2x32xi1>
    %260 = arith.select %259, %192, %117 : vector<2x32xi1>, vector<2x32xf32>
    %261 = vector.shape_cast %34 : vector<1x32xi1> to vector<1x32xi1>
    %262 = vector.broadcast %261 : vector<1x32xi1> to vector<2x32xi1>
    %263 = arith.select %262, %217, %92 : vector<2x32xi1>, vector<2x32xf32>
    %264 = vector.shape_cast %34 : vector<1x32xi1> to vector<1x32xi1>
    %265 = vector.broadcast %264 : vector<1x32xi1> to vector<2x32xi1>
    %266 = arith.select %265, %242, %67 : vector<2x32xi1>, vector<2x32xf32>
    %267 = vector.shape_cast %245 : vector<2x32xf32> to vector<1x2x32xf32>
    %268 = vector.shape_cast %248 : vector<2x32xf32> to vector<1x2x32xf32>
    %269 = vector.shape_cast %251 : vector<2x32xf32> to vector<1x2x32xf32>
    %270 = vector.shape_cast %254 : vector<2x32xf32> to vector<1x2x32xf32>
    %271 = vector.shape_cast %257 : vector<2x32xf32> to vector<1x2x32xf32>
    %272 = vector.shape_cast %260 : vector<2x32xf32> to vector<1x2x32xf32>
    %273 = vector.shape_cast %263 : vector<2x32xf32> to vector<1x2x32xf32>
    %274 = vector.shape_cast %266 : vector<2x32xf32> to vector<1x2x32xf32>
    %275 = tpu.concatenate %267, %268, %269, %270, %271, %272, %273, %274 in 0 : vector<1x2x32xf32>, vector<1x2x32xf32>, vector<1x2x32xf32>, vector<1x2x32xf32>, vector<1x2x32xf32>, vector<1x2x32xf32>, vector<1x2x32xf32>, vector<1x2x32xf32> -> vector<8x2x32xf32>
    %276 = vector.shape_cast %275 : vector<8x2x32xf32> to vector<16x32xf32>
    %cst_32 = arith.constant dense<0.000000e+00> : vector<16x128xf32>
    %277 = tpu.matmul %276, %2, %cst_32 {dimension_numbers = #tpu.dot_dimension_numbers<[1], [0], [0], [1], [0, 0, 1, 1], [], []>} : vector<16x32xf32>, vector<32x128xf32>, vector<16x128xf32> -> vector<16x128xf32>
    %278 = vector.broadcast %8 : vector<1x128xf32> to vector<16x128xf32>
    %279 = arith.addf %277, %278 : vector<16x128xf32>
    %280 = vector.shape_cast %279 : vector<16x128xf32> to vector<8x2x128xf32>
    %281 = vector.extract_strided_slice %280 {offsets = [0, 0, 96], sizes = [8, 2, 1], strides = [1, 1, 1]} : vector<8x2x128xf32> to vector<8x2x1xf32>
    %cst_33 = arith.constant 0.000000e+00 : f32
    %282 = vector.broadcast %cst_33 : f32 to vector<2x32xf32>
    %283 = vector.extract_strided_slice %280 {offsets = [0, 0, 0], sizes = [1, 2, 128], strides = [1, 1, 1]} : vector<8x2x128xf32> to vector<1x2x128xf32>
    %284 = vector.shape_cast %283 : vector<1x2x128xf32> to vector<2x128xf32>
    %285 = vector.extract_strided_slice %280 {offsets = [7, 0, 0], sizes = [1, 2, 128], strides = [1, 1, 1]} : vector<8x2x128xf32> to vector<1x2x128xf32>
    %286 = vector.shape_cast %285 : vector<1x2x128xf32> to vector<2x128xf32>
    %287 = vector.shape_cast %31 : vector<1x128xi1> to vector<1x128xi1>
    %288 = vector.broadcast %287 : vector<1x128xi1> to vector<2x128xi1>
    %289 = arith.select %288, %284, %286 : vector<2x128xi1>, vector<2x128xf32>
    %cst_34 = arith.constant dense<0.000000e+00> : vector<2x128xf32>
    %290 = tpu.matmul %282, %3, %cst_34 {dimension_numbers = #tpu.dot_dimension_numbers<[1], [0], [0], [1], [0, 0, 1, 1], [], []>} : vector<2x32xf32>, vector<32x128xf32>, vector<2x128xf32> -> vector<2x128xf32>
    %291 = vector.broadcast %9 : vector<1x128xf32> to vector<2x128xf32>
    %292 = arith.addf %290, %291 : vector<2x128xf32>
    %293 = vector.extract_strided_slice %289 {offsets = [0, 0], sizes = [2, 64], strides = [1, 1]} : vector<2x128xf32> to vector<2x64xf32>
    %294 = vector.extract_strided_slice %292 {offsets = [0, 0], sizes = [2, 64], strides = [1, 1]} : vector<2x128xf32> to vector<2x64xf32>
    %295 = arith.addf %293, %294 : vector<2x64xf32>
    %296 = arith.negf %295 : vector<2x64xf32>
    %297 = math.exp %296 : vector<2x64xf32>
    %cst_35 = arith.constant 1.000000e+00 : f32
    %298 = vector.broadcast %cst_35 : f32 to vector<2x64xf32>
    %299 = arith.addf %298, %297 : vector<2x64xf32>
    %300 = arith.divf %298, %299 : vector<2x64xf32>
    %301 = vector.extract_strided_slice %289 {offsets = [0, 64], sizes = [2, 32], strides = [1, 1]} : vector<2x128xf32> to vector<2x32xf32>
    %302 = vector.extract_strided_slice %300 {offsets = [0, 0], sizes = [2, 32], strides = [1, 1]} : vector<2x64xf32> to vector<2x32xf32>
    %303 = vector.extract_strided_slice %292 {offsets = [0, 64], sizes = [2, 32], strides = [1, 1]} : vector<2x128xf32> to vector<2x32xf32>
    %304 = arith.mulf %302, %303 : vector<2x32xf32>
    %305 = arith.addf %301, %304 : vector<2x32xf32>
    %306 = math.tanh %305 : vector<2x32xf32>
    %307 = vector.extract_strided_slice %300 {offsets = [0, 32], sizes = [2, 32], strides = [1, 1]} : vector<2x64xf32> to vector<2x32xf32>
    %cst_36 = arith.constant 1.000000e+00 : f32
    %308 = vector.broadcast %cst_36 : f32 to vector<2x32xf32>
    %309 = arith.subf %308, %307 : vector<2x32xf32>
    %310 = arith.mulf %309, %306 : vector<2x32xf32>
    %311 = arith.mulf %307, %282 : vector<2x32xf32>
    %312 = arith.addf %310, %311 : vector<2x32xf32>
    %313 = vector.extract_strided_slice %280 {offsets = [1, 0, 0], sizes = [1, 2, 128], strides = [1, 1, 1]} : vector<8x2x128xf32> to vector<1x2x128xf32>
    %314 = vector.shape_cast %313 : vector<1x2x128xf32> to vector<2x128xf32>
    %315 = vector.extract_strided_slice %280 {offsets = [6, 0, 0], sizes = [1, 2, 128], strides = [1, 1, 1]} : vector<8x2x128xf32> to vector<1x2x128xf32>
    %316 = vector.shape_cast %315 : vector<1x2x128xf32> to vector<2x128xf32>
    %317 = vector.shape_cast %31 : vector<1x128xi1> to vector<1x128xi1>
    %318 = vector.broadcast %317 : vector<1x128xi1> to vector<2x128xi1>
    %319 = arith.select %318, %314, %316 : vector<2x128xi1>, vector<2x128xf32>
    %cst_37 = arith.constant dense<0.000000e+00> : vector<2x128xf32>
    %320 = tpu.matmul %312, %3, %cst_37 {dimension_numbers = #tpu.dot_dimension_numbers<[1], [0], [0], [1], [0, 0, 1, 1], [], []>} : vector<2x32xf32>, vector<32x128xf32>, vector<2x128xf32> -> vector<2x128xf32>
    %321 = vector.broadcast %9 : vector<1x128xf32> to vector<2x128xf32>
    %322 = arith.addf %320, %321 : vector<2x128xf32>
    %323 = vector.extract_strided_slice %319 {offsets = [0, 0], sizes = [2, 64], strides = [1, 1]} : vector<2x128xf32> to vector<2x64xf32>
    %324 = vector.extract_strided_slice %322 {offsets = [0, 0], sizes = [2, 64], strides = [1, 1]} : vector<2x128xf32> to vector<2x64xf32>
    %325 = arith.addf %323, %324 : vector<2x64xf32>
    %326 = arith.negf %325 : vector<2x64xf32>
    %327 = math.exp %326 : vector<2x64xf32>
    %cst_38 = arith.constant 1.000000e+00 : f32
    %328 = vector.broadcast %cst_38 : f32 to vector<2x64xf32>
    %329 = arith.addf %328, %327 : vector<2x64xf32>
    %330 = arith.divf %328, %329 : vector<2x64xf32>
    %331 = vector.extract_strided_slice %319 {offsets = [0, 64], sizes = [2, 32], strides = [1, 1]} : vector<2x128xf32> to vector<2x32xf32>
    %332 = vector.extract_strided_slice %330 {offsets = [0, 0], sizes = [2, 32], strides = [1, 1]} : vector<2x64xf32> to vector<2x32xf32>
    %333 = vector.extract_strided_slice %322 {offsets = [0, 64], sizes = [2, 32], strides = [1, 1]} : vector<2x128xf32> to vector<2x32xf32>
    %334 = arith.mulf %332, %333 : vector<2x32xf32>
    %335 = arith.addf %331, %334 : vector<2x32xf32>
    %336 = math.tanh %335 : vector<2x32xf32>
    %337 = vector.extract_strided_slice %330 {offsets = [0, 32], sizes = [2, 32], strides = [1, 1]} : vector<2x64xf32> to vector<2x32xf32>
    %cst_39 = arith.constant 1.000000e+00 : f32
    %338 = vector.broadcast %cst_39 : f32 to vector<2x32xf32>
    %339 = arith.subf %338, %337 : vector<2x32xf32>
    %340 = arith.mulf %339, %336 : vector<2x32xf32>
    %341 = arith.mulf %337, %312 : vector<2x32xf32>
    %342 = arith.addf %340, %341 : vector<2x32xf32>
    %343 = vector.extract_strided_slice %280 {offsets = [2, 0, 0], sizes = [1, 2, 128], strides = [1, 1, 1]} : vector<8x2x128xf32> to vector<1x2x128xf32>
    %344 = vector.shape_cast %343 : vector<1x2x128xf32> to vector<2x128xf32>
    %345 = vector.extract_strided_slice %280 {offsets = [5, 0, 0], sizes = [1, 2, 128], strides = [1, 1, 1]} : vector<8x2x128xf32> to vector<1x2x128xf32>
    %346 = vector.shape_cast %345 : vector<1x2x128xf32> to vector<2x128xf32>
    %347 = vector.shape_cast %31 : vector<1x128xi1> to vector<1x128xi1>
    %348 = vector.broadcast %347 : vector<1x128xi1> to vector<2x128xi1>
    %349 = arith.select %348, %344, %346 : vector<2x128xi1>, vector<2x128xf32>
    %cst_40 = arith.constant dense<0.000000e+00> : vector<2x128xf32>
    %350 = tpu.matmul %342, %3, %cst_40 {dimension_numbers = #tpu.dot_dimension_numbers<[1], [0], [0], [1], [0, 0, 1, 1], [], []>} : vector<2x32xf32>, vector<32x128xf32>, vector<2x128xf32> -> vector<2x128xf32>
    %351 = vector.broadcast %9 : vector<1x128xf32> to vector<2x128xf32>
    %352 = arith.addf %350, %351 : vector<2x128xf32>
    %353 = vector.extract_strided_slice %349 {offsets = [0, 0], sizes = [2, 64], strides = [1, 1]} : vector<2x128xf32> to vector<2x64xf32>
    %354 = vector.extract_strided_slice %352 {offsets = [0, 0], sizes = [2, 64], strides = [1, 1]} : vector<2x128xf32> to vector<2x64xf32>
    %355 = arith.addf %353, %354 : vector<2x64xf32>
    %356 = arith.negf %355 : vector<2x64xf32>
    %357 = math.exp %356 : vector<2x64xf32>
    %cst_41 = arith.constant 1.000000e+00 : f32
    %358 = vector.broadcast %cst_41 : f32 to vector<2x64xf32>
    %359 = arith.addf %358, %357 : vector<2x64xf32>
    %360 = arith.divf %358, %359 : vector<2x64xf32>
    %361 = vector.extract_strided_slice %349 {offsets = [0, 64], sizes = [2, 32], strides = [1, 1]} : vector<2x128xf32> to vector<2x32xf32>
    %362 = vector.extract_strided_slice %360 {offsets = [0, 0], sizes = [2, 32], strides = [1, 1]} : vector<2x64xf32> to vector<2x32xf32>
    %363 = vector.extract_strided_slice %352 {offsets = [0, 64], sizes = [2, 32], strides = [1, 1]} : vector<2x128xf32> to vector<2x32xf32>
    %364 = arith.mulf %362, %363 : vector<2x32xf32>
    %365 = arith.addf %361, %364 : vector<2x32xf32>
    %366 = math.tanh %365 : vector<2x32xf32>
    %367 = vector.extract_strided_slice %360 {offsets = [0, 32], sizes = [2, 32], strides = [1, 1]} : vector<2x64xf32> to vector<2x32xf32>
    %cst_42 = arith.constant 1.000000e+00 : f32
    %368 = vector.broadcast %cst_42 : f32 to vector<2x32xf32>
    %369 = arith.subf %368, %367 : vector<2x32xf32>
    %370 = arith.mulf %369, %366 : vector<2x32xf32>
    %371 = arith.mulf %367, %342 : vector<2x32xf32>
    %372 = arith.addf %370, %371 : vector<2x32xf32>
    %373 = vector.extract_strided_slice %280 {offsets = [3, 0, 0], sizes = [1, 2, 128], strides = [1, 1, 1]} : vector<8x2x128xf32> to vector<1x2x128xf32>
    %374 = vector.shape_cast %373 : vector<1x2x128xf32> to vector<2x128xf32>
    %375 = vector.extract_strided_slice %280 {offsets = [4, 0, 0], sizes = [1, 2, 128], strides = [1, 1, 1]} : vector<8x2x128xf32> to vector<1x2x128xf32>
    %376 = vector.shape_cast %375 : vector<1x2x128xf32> to vector<2x128xf32>
    %377 = vector.shape_cast %31 : vector<1x128xi1> to vector<1x128xi1>
    %378 = vector.broadcast %377 : vector<1x128xi1> to vector<2x128xi1>
    %379 = arith.select %378, %374, %376 : vector<2x128xi1>, vector<2x128xf32>
    %cst_43 = arith.constant dense<0.000000e+00> : vector<2x128xf32>
    %380 = tpu.matmul %372, %3, %cst_43 {dimension_numbers = #tpu.dot_dimension_numbers<[1], [0], [0], [1], [0, 0, 1, 1], [], []>} : vector<2x32xf32>, vector<32x128xf32>, vector<2x128xf32> -> vector<2x128xf32>
    %381 = vector.broadcast %9 : vector<1x128xf32> to vector<2x128xf32>
    %382 = arith.addf %380, %381 : vector<2x128xf32>
    %383 = vector.extract_strided_slice %379 {offsets = [0, 0], sizes = [2, 64], strides = [1, 1]} : vector<2x128xf32> to vector<2x64xf32>
    %384 = vector.extract_strided_slice %382 {offsets = [0, 0], sizes = [2, 64], strides = [1, 1]} : vector<2x128xf32> to vector<2x64xf32>
    %385 = arith.addf %383, %384 : vector<2x64xf32>
    %386 = arith.negf %385 : vector<2x64xf32>
    %387 = math.exp %386 : vector<2x64xf32>
    %cst_44 = arith.constant 1.000000e+00 : f32
    %388 = vector.broadcast %cst_44 : f32 to vector<2x64xf32>
    %389 = arith.addf %388, %387 : vector<2x64xf32>
    %390 = arith.divf %388, %389 : vector<2x64xf32>
    %391 = vector.extract_strided_slice %379 {offsets = [0, 64], sizes = [2, 32], strides = [1, 1]} : vector<2x128xf32> to vector<2x32xf32>
    %392 = vector.extract_strided_slice %390 {offsets = [0, 0], sizes = [2, 32], strides = [1, 1]} : vector<2x64xf32> to vector<2x32xf32>
    %393 = vector.extract_strided_slice %382 {offsets = [0, 64], sizes = [2, 32], strides = [1, 1]} : vector<2x128xf32> to vector<2x32xf32>
    %394 = arith.mulf %392, %393 : vector<2x32xf32>
    %395 = arith.addf %391, %394 : vector<2x32xf32>
    %396 = math.tanh %395 : vector<2x32xf32>
    %397 = vector.extract_strided_slice %390 {offsets = [0, 32], sizes = [2, 32], strides = [1, 1]} : vector<2x64xf32> to vector<2x32xf32>
    %cst_45 = arith.constant 1.000000e+00 : f32
    %398 = vector.broadcast %cst_45 : f32 to vector<2x32xf32>
    %399 = arith.subf %398, %397 : vector<2x32xf32>
    %400 = arith.mulf %399, %396 : vector<2x32xf32>
    %401 = arith.mulf %397, %372 : vector<2x32xf32>
    %402 = arith.addf %400, %401 : vector<2x32xf32>
    %403 = vector.extract_strided_slice %280 {offsets = [4, 0, 0], sizes = [1, 2, 128], strides = [1, 1, 1]} : vector<8x2x128xf32> to vector<1x2x128xf32>
    %404 = vector.shape_cast %403 : vector<1x2x128xf32> to vector<2x128xf32>
    %405 = vector.extract_strided_slice %280 {offsets = [3, 0, 0], sizes = [1, 2, 128], strides = [1, 1, 1]} : vector<8x2x128xf32> to vector<1x2x128xf32>
    %406 = vector.shape_cast %405 : vector<1x2x128xf32> to vector<2x128xf32>
    %407 = vector.shape_cast %31 : vector<1x128xi1> to vector<1x128xi1>
    %408 = vector.broadcast %407 : vector<1x128xi1> to vector<2x128xi1>
    %409 = arith.select %408, %404, %406 : vector<2x128xi1>, vector<2x128xf32>
    %cst_46 = arith.constant dense<0.000000e+00> : vector<2x128xf32>
    %410 = tpu.matmul %402, %3, %cst_46 {dimension_numbers = #tpu.dot_dimension_numbers<[1], [0], [0], [1], [0, 0, 1, 1], [], []>} : vector<2x32xf32>, vector<32x128xf32>, vector<2x128xf32> -> vector<2x128xf32>
    %411 = vector.broadcast %9 : vector<1x128xf32> to vector<2x128xf32>
    %412 = arith.addf %410, %411 : vector<2x128xf32>
    %413 = vector.extract_strided_slice %409 {offsets = [0, 0], sizes = [2, 64], strides = [1, 1]} : vector<2x128xf32> to vector<2x64xf32>
    %414 = vector.extract_strided_slice %412 {offsets = [0, 0], sizes = [2, 64], strides = [1, 1]} : vector<2x128xf32> to vector<2x64xf32>
    %415 = arith.addf %413, %414 : vector<2x64xf32>
    %416 = arith.negf %415 : vector<2x64xf32>
    %417 = math.exp %416 : vector<2x64xf32>
    %cst_47 = arith.constant 1.000000e+00 : f32
    %418 = vector.broadcast %cst_47 : f32 to vector<2x64xf32>
    %419 = arith.addf %418, %417 : vector<2x64xf32>
    %420 = arith.divf %418, %419 : vector<2x64xf32>
    %421 = vector.extract_strided_slice %409 {offsets = [0, 64], sizes = [2, 32], strides = [1, 1]} : vector<2x128xf32> to vector<2x32xf32>
    %422 = vector.extract_strided_slice %420 {offsets = [0, 0], sizes = [2, 32], strides = [1, 1]} : vector<2x64xf32> to vector<2x32xf32>
    %423 = vector.extract_strided_slice %412 {offsets = [0, 64], sizes = [2, 32], strides = [1, 1]} : vector<2x128xf32> to vector<2x32xf32>
    %424 = arith.mulf %422, %423 : vector<2x32xf32>
    %425 = arith.addf %421, %424 : vector<2x32xf32>
    %426 = math.tanh %425 : vector<2x32xf32>
    %427 = vector.extract_strided_slice %420 {offsets = [0, 32], sizes = [2, 32], strides = [1, 1]} : vector<2x64xf32> to vector<2x32xf32>
    %cst_48 = arith.constant 1.000000e+00 : f32
    %428 = vector.broadcast %cst_48 : f32 to vector<2x32xf32>
    %429 = arith.subf %428, %427 : vector<2x32xf32>
    %430 = arith.mulf %429, %426 : vector<2x32xf32>
    %431 = arith.mulf %427, %402 : vector<2x32xf32>
    %432 = arith.addf %430, %431 : vector<2x32xf32>
    %433 = vector.extract_strided_slice %280 {offsets = [5, 0, 0], sizes = [1, 2, 128], strides = [1, 1, 1]} : vector<8x2x128xf32> to vector<1x2x128xf32>
    %434 = vector.shape_cast %433 : vector<1x2x128xf32> to vector<2x128xf32>
    %435 = vector.extract_strided_slice %280 {offsets = [2, 0, 0], sizes = [1, 2, 128], strides = [1, 1, 1]} : vector<8x2x128xf32> to vector<1x2x128xf32>
    %436 = vector.shape_cast %435 : vector<1x2x128xf32> to vector<2x128xf32>
    %437 = vector.shape_cast %31 : vector<1x128xi1> to vector<1x128xi1>
    %438 = vector.broadcast %437 : vector<1x128xi1> to vector<2x128xi1>
    %439 = arith.select %438, %434, %436 : vector<2x128xi1>, vector<2x128xf32>
    %cst_49 = arith.constant dense<0.000000e+00> : vector<2x128xf32>
    %440 = tpu.matmul %432, %3, %cst_49 {dimension_numbers = #tpu.dot_dimension_numbers<[1], [0], [0], [1], [0, 0, 1, 1], [], []>} : vector<2x32xf32>, vector<32x128xf32>, vector<2x128xf32> -> vector<2x128xf32>
    %441 = vector.broadcast %9 : vector<1x128xf32> to vector<2x128xf32>
    %442 = arith.addf %440, %441 : vector<2x128xf32>
    %443 = vector.extract_strided_slice %439 {offsets = [0, 0], sizes = [2, 64], strides = [1, 1]} : vector<2x128xf32> to vector<2x64xf32>
    %444 = vector.extract_strided_slice %442 {offsets = [0, 0], sizes = [2, 64], strides = [1, 1]} : vector<2x128xf32> to vector<2x64xf32>
    %445 = arith.addf %443, %444 : vector<2x64xf32>
    %446 = arith.negf %445 : vector<2x64xf32>
    %447 = math.exp %446 : vector<2x64xf32>
    %cst_50 = arith.constant 1.000000e+00 : f32
    %448 = vector.broadcast %cst_50 : f32 to vector<2x64xf32>
    %449 = arith.addf %448, %447 : vector<2x64xf32>
    %450 = arith.divf %448, %449 : vector<2x64xf32>
    %451 = vector.extract_strided_slice %439 {offsets = [0, 64], sizes = [2, 32], strides = [1, 1]} : vector<2x128xf32> to vector<2x32xf32>
    %452 = vector.extract_strided_slice %450 {offsets = [0, 0], sizes = [2, 32], strides = [1, 1]} : vector<2x64xf32> to vector<2x32xf32>
    %453 = vector.extract_strided_slice %442 {offsets = [0, 64], sizes = [2, 32], strides = [1, 1]} : vector<2x128xf32> to vector<2x32xf32>
    %454 = arith.mulf %452, %453 : vector<2x32xf32>
    %455 = arith.addf %451, %454 : vector<2x32xf32>
    %456 = math.tanh %455 : vector<2x32xf32>
    %457 = vector.extract_strided_slice %450 {offsets = [0, 32], sizes = [2, 32], strides = [1, 1]} : vector<2x64xf32> to vector<2x32xf32>
    %cst_51 = arith.constant 1.000000e+00 : f32
    %458 = vector.broadcast %cst_51 : f32 to vector<2x32xf32>
    %459 = arith.subf %458, %457 : vector<2x32xf32>
    %460 = arith.mulf %459, %456 : vector<2x32xf32>
    %461 = arith.mulf %457, %432 : vector<2x32xf32>
    %462 = arith.addf %460, %461 : vector<2x32xf32>
    %463 = vector.extract_strided_slice %280 {offsets = [6, 0, 0], sizes = [1, 2, 128], strides = [1, 1, 1]} : vector<8x2x128xf32> to vector<1x2x128xf32>
    %464 = vector.shape_cast %463 : vector<1x2x128xf32> to vector<2x128xf32>
    %465 = vector.extract_strided_slice %280 {offsets = [1, 0, 0], sizes = [1, 2, 128], strides = [1, 1, 1]} : vector<8x2x128xf32> to vector<1x2x128xf32>
    %466 = vector.shape_cast %465 : vector<1x2x128xf32> to vector<2x128xf32>
    %467 = vector.shape_cast %31 : vector<1x128xi1> to vector<1x128xi1>
    %468 = vector.broadcast %467 : vector<1x128xi1> to vector<2x128xi1>
    %469 = arith.select %468, %464, %466 : vector<2x128xi1>, vector<2x128xf32>
    %cst_52 = arith.constant dense<0.000000e+00> : vector<2x128xf32>
    %470 = tpu.matmul %462, %3, %cst_52 {dimension_numbers = #tpu.dot_dimension_numbers<[1], [0], [0], [1], [0, 0, 1, 1], [], []>} : vector<2x32xf32>, vector<32x128xf32>, vector<2x128xf32> -> vector<2x128xf32>
    %471 = vector.broadcast %9 : vector<1x128xf32> to vector<2x128xf32>
    %472 = arith.addf %470, %471 : vector<2x128xf32>
    %473 = vector.extract_strided_slice %469 {offsets = [0, 0], sizes = [2, 64], strides = [1, 1]} : vector<2x128xf32> to vector<2x64xf32>
    %474 = vector.extract_strided_slice %472 {offsets = [0, 0], sizes = [2, 64], strides = [1, 1]} : vector<2x128xf32> to vector<2x64xf32>
    %475 = arith.addf %473, %474 : vector<2x64xf32>
    %476 = arith.negf %475 : vector<2x64xf32>
    %477 = math.exp %476 : vector<2x64xf32>
    %cst_53 = arith.constant 1.000000e+00 : f32
    %478 = vector.broadcast %cst_53 : f32 to vector<2x64xf32>
    %479 = arith.addf %478, %477 : vector<2x64xf32>
    %480 = arith.divf %478, %479 : vector<2x64xf32>
    %481 = vector.extract_strided_slice %469 {offsets = [0, 64], sizes = [2, 32], strides = [1, 1]} : vector<2x128xf32> to vector<2x32xf32>
    %482 = vector.extract_strided_slice %480 {offsets = [0, 0], sizes = [2, 32], strides = [1, 1]} : vector<2x64xf32> to vector<2x32xf32>
    %483 = vector.extract_strided_slice %472 {offsets = [0, 64], sizes = [2, 32], strides = [1, 1]} : vector<2x128xf32> to vector<2x32xf32>
    %484 = arith.mulf %482, %483 : vector<2x32xf32>
    %485 = arith.addf %481, %484 : vector<2x32xf32>
    %486 = math.tanh %485 : vector<2x32xf32>
    %487 = vector.extract_strided_slice %480 {offsets = [0, 32], sizes = [2, 32], strides = [1, 1]} : vector<2x64xf32> to vector<2x32xf32>
    %cst_54 = arith.constant 1.000000e+00 : f32
    %488 = vector.broadcast %cst_54 : f32 to vector<2x32xf32>
    %489 = arith.subf %488, %487 : vector<2x32xf32>
    %490 = arith.mulf %489, %486 : vector<2x32xf32>
    %491 = arith.mulf %487, %462 : vector<2x32xf32>
    %492 = arith.addf %490, %491 : vector<2x32xf32>
    %493 = vector.extract_strided_slice %280 {offsets = [7, 0, 0], sizes = [1, 2, 128], strides = [1, 1, 1]} : vector<8x2x128xf32> to vector<1x2x128xf32>
    %494 = vector.shape_cast %493 : vector<1x2x128xf32> to vector<2x128xf32>
    %495 = vector.extract_strided_slice %280 {offsets = [0, 0, 0], sizes = [1, 2, 128], strides = [1, 1, 1]} : vector<8x2x128xf32> to vector<1x2x128xf32>
    %496 = vector.shape_cast %495 : vector<1x2x128xf32> to vector<2x128xf32>
    %497 = vector.shape_cast %31 : vector<1x128xi1> to vector<1x128xi1>
    %498 = vector.broadcast %497 : vector<1x128xi1> to vector<2x128xi1>
    %499 = arith.select %498, %494, %496 : vector<2x128xi1>, vector<2x128xf32>
    %cst_55 = arith.constant dense<0.000000e+00> : vector<2x128xf32>
    %500 = tpu.matmul %492, %3, %cst_55 {dimension_numbers = #tpu.dot_dimension_numbers<[1], [0], [0], [1], [0, 0, 1, 1], [], []>} : vector<2x32xf32>, vector<32x128xf32>, vector<2x128xf32> -> vector<2x128xf32>
    %501 = vector.broadcast %9 : vector<1x128xf32> to vector<2x128xf32>
    %502 = arith.addf %500, %501 : vector<2x128xf32>
    %503 = vector.extract_strided_slice %499 {offsets = [0, 0], sizes = [2, 64], strides = [1, 1]} : vector<2x128xf32> to vector<2x64xf32>
    %504 = vector.extract_strided_slice %502 {offsets = [0, 0], sizes = [2, 64], strides = [1, 1]} : vector<2x128xf32> to vector<2x64xf32>
    %505 = arith.addf %503, %504 : vector<2x64xf32>
    %506 = arith.negf %505 : vector<2x64xf32>
    %507 = math.exp %506 : vector<2x64xf32>
    %cst_56 = arith.constant 1.000000e+00 : f32
    %508 = vector.broadcast %cst_56 : f32 to vector<2x64xf32>
    %509 = arith.addf %508, %507 : vector<2x64xf32>
    %510 = arith.divf %508, %509 : vector<2x64xf32>
    %511 = vector.extract_strided_slice %499 {offsets = [0, 64], sizes = [2, 32], strides = [1, 1]} : vector<2x128xf32> to vector<2x32xf32>
    %512 = vector.extract_strided_slice %510 {offsets = [0, 0], sizes = [2, 32], strides = [1, 1]} : vector<2x64xf32> to vector<2x32xf32>
    %513 = vector.extract_strided_slice %502 {offsets = [0, 64], sizes = [2, 32], strides = [1, 1]} : vector<2x128xf32> to vector<2x32xf32>
    %514 = arith.mulf %512, %513 : vector<2x32xf32>
    %515 = arith.addf %511, %514 : vector<2x32xf32>
    %516 = math.tanh %515 : vector<2x32xf32>
    %517 = vector.extract_strided_slice %510 {offsets = [0, 32], sizes = [2, 32], strides = [1, 1]} : vector<2x64xf32> to vector<2x32xf32>
    %cst_57 = arith.constant 1.000000e+00 : f32
    %518 = vector.broadcast %cst_57 : f32 to vector<2x32xf32>
    %519 = arith.subf %518, %517 : vector<2x32xf32>
    %520 = arith.mulf %519, %516 : vector<2x32xf32>
    %521 = arith.mulf %517, %492 : vector<2x32xf32>
    %522 = arith.addf %520, %521 : vector<2x32xf32>
    %523 = vector.shape_cast %34 : vector<1x32xi1> to vector<1x32xi1>
    %524 = vector.broadcast %523 : vector<1x32xi1> to vector<2x32xi1>
    %525 = arith.select %524, %312, %522 : vector<2x32xi1>, vector<2x32xf32>
    %526 = vector.shape_cast %34 : vector<1x32xi1> to vector<1x32xi1>
    %527 = vector.broadcast %526 : vector<1x32xi1> to vector<2x32xi1>
    %528 = arith.select %527, %342, %492 : vector<2x32xi1>, vector<2x32xf32>
    %529 = vector.shape_cast %34 : vector<1x32xi1> to vector<1x32xi1>
    %530 = vector.broadcast %529 : vector<1x32xi1> to vector<2x32xi1>
    %531 = arith.select %530, %372, %462 : vector<2x32xi1>, vector<2x32xf32>
    %532 = vector.shape_cast %34 : vector<1x32xi1> to vector<1x32xi1>
    %533 = vector.broadcast %532 : vector<1x32xi1> to vector<2x32xi1>
    %534 = arith.select %533, %402, %432 : vector<2x32xi1>, vector<2x32xf32>
    %535 = vector.shape_cast %34 : vector<1x32xi1> to vector<1x32xi1>
    %536 = vector.broadcast %535 : vector<1x32xi1> to vector<2x32xi1>
    %537 = arith.select %536, %432, %402 : vector<2x32xi1>, vector<2x32xf32>
    %538 = vector.shape_cast %34 : vector<1x32xi1> to vector<1x32xi1>
    %539 = vector.broadcast %538 : vector<1x32xi1> to vector<2x32xi1>
    %540 = arith.select %539, %462, %372 : vector<2x32xi1>, vector<2x32xf32>
    %541 = vector.shape_cast %34 : vector<1x32xi1> to vector<1x32xi1>
    %542 = vector.broadcast %541 : vector<1x32xi1> to vector<2x32xi1>
    %543 = arith.select %542, %492, %342 : vector<2x32xi1>, vector<2x32xf32>
    %544 = vector.shape_cast %34 : vector<1x32xi1> to vector<1x32xi1>
    %545 = vector.broadcast %544 : vector<1x32xi1> to vector<2x32xi1>
    %546 = arith.select %545, %522, %312 : vector<2x32xi1>, vector<2x32xf32>
    %547 = vector.shape_cast %525 : vector<2x32xf32> to vector<1x2x32xf32>
    %548 = vector.shape_cast %528 : vector<2x32xf32> to vector<1x2x32xf32>
    %549 = vector.shape_cast %531 : vector<2x32xf32> to vector<1x2x32xf32>
    %550 = vector.shape_cast %534 : vector<2x32xf32> to vector<1x2x32xf32>
    %551 = vector.shape_cast %537 : vector<2x32xf32> to vector<1x2x32xf32>
    %552 = vector.shape_cast %540 : vector<2x32xf32> to vector<1x2x32xf32>
    %553 = vector.shape_cast %543 : vector<2x32xf32> to vector<1x2x32xf32>
    %554 = vector.shape_cast %546 : vector<2x32xf32> to vector<1x2x32xf32>
    %555 = tpu.concatenate %547, %548, %549, %550, %551, %552, %553, %554 in 0 : vector<1x2x32xf32>, vector<1x2x32xf32>, vector<1x2x32xf32>, vector<1x2x32xf32>, vector<1x2x32xf32>, vector<1x2x32xf32>, vector<1x2x32xf32>, vector<1x2x32xf32> -> vector<8x2x32xf32>
    %556 = vector.shape_cast %10 : vector<1x32xf32> to vector<1x1x32xf32>
    %557 = vector.broadcast %556 : vector<1x1x32xf32> to vector<8x2x32xf32>
    %558 = arith.mulf %555, %557 : vector<8x2x32xf32>
    %cst_58 = arith.constant dense<0.000000e+00> : vector<8x2xf32>
    %559 = vector.multi_reduction <add>, %558, %cst_58 [2] : vector<8x2x32xf32> to vector<8x2xf32>
    %560 = vector.shape_cast %559 : vector<8x2xf32> to vector<8x2x1xf32>
    %c0_59 = arith.constant 0 : index
    %c0_60 = arith.constant 0 : index
    %c0_61 = arith.constant 0 : index
    %561 = vector.load %arg3[%c0_59, %c0_60, %c0_61] : memref<8x1x1xf32, #tpu.memory_space<vmem>>, vector<8x1x1xf32>
    %562 = vector.broadcast %561 : vector<8x1x1xf32> to vector<8x2x1xf32>
    %563 = arith.addf %281, %562 : vector<8x2x1xf32>
    %564 = math.tanh %563 : vector<8x2x1xf32>
    %565 = math.exp %564 : vector<8x2x1xf32>
    %cst_62 = arith.constant dense<0.000000e+00> : vector<2x1xf32>
    %566 = vector.multi_reduction <add>, %565, %cst_62 [0] : vector<8x2x1xf32> to vector<2x1xf32>
    %567 = vector.shape_cast %566 : vector<2x1xf32> to vector<1x2x1xf32>
    %568 = tpu.reciprocal %567 {approx = true} : vector<1x2x1xf32> -> vector<1x2x1xf32>
    %569 = vector.broadcast %568 : vector<1x2x1xf32> to vector<8x2x1xf32>
    %570 = arith.mulf %565, %569 : vector<8x2x1xf32>
    %cst_63 = arith.constant 1.000000e-10 : f32
    %571 = vector.broadcast %cst_63 : f32 to vector<8x2x1xf32>
    %572 = arith.addf %570, %571 : vector<8x2x1xf32>
    %573 = vector.broadcast %572 : vector<8x2x1xf32> to vector<8x2x32xf32>
    %574 = arith.mulf %275, %573 : vector<8x2x32xf32>
    %cst_64 = arith.constant dense<0.000000e+00> : vector<2x32xf32>
    %575 = vector.multi_reduction <add>, %574, %cst_64 [0] : vector<8x2x32xf32> to vector<2x32xf32>
    %c0_65 = arith.constant 0 : index
    %c0_66 = arith.constant 0 : index
    %c0_67 = arith.constant 0 : index
    %576 = vector.load %arg4[%c0_65, %c0_66, %c0_67] : memref<8x1x1xf32, #tpu.memory_space<vmem>>, vector<8x1x1xf32>
    %577 = vector.broadcast %576 : vector<8x1x1xf32> to vector<8x2x1xf32>
    %578 = arith.addf %560, %577 : vector<8x2x1xf32>
    %579 = math.tanh %578 : vector<8x2x1xf32>
    %580 = math.exp %579 : vector<8x2x1xf32>
    %cst_68 = arith.constant dense<0.000000e+00> : vector<2x1xf32>
    %581 = vector.multi_reduction <add>, %580, %cst_68 [0] : vector<8x2x1xf32> to vector<2x1xf32>
    %582 = vector.shape_cast %581 : vector<2x1xf32> to vector<1x2x1xf32>
    %583 = tpu.reciprocal %582 {approx = true} : vector<1x2x1xf32> -> vector<1x2x1xf32>
    %584 = vector.broadcast %583 : vector<1x2x1xf32> to vector<8x2x1xf32>
    %585 = arith.mulf %580, %584 : vector<8x2x1xf32>
    %cst_69 = arith.constant 1.000000e-10 : f32
    %586 = vector.broadcast %cst_69 : f32 to vector<8x2x1xf32>
    %587 = arith.addf %585, %586 : vector<8x2x1xf32>
    %588 = vector.broadcast %587 : vector<8x2x1xf32> to vector<8x2x32xf32>
    %589 = arith.mulf %555, %588 : vector<8x2x32xf32>
    %cst_70 = arith.constant dense<0.000000e+00> : vector<2x32xf32>
    %590 = vector.multi_reduction <add>, %589, %cst_70 [0] : vector<8x2x32xf32> to vector<2x32xf32>
    %cst_71 = arith.constant dense<0.000000e+00> : vector<2x32xf32>
    %591 = vector.multi_reduction <add>, %555, %cst_71 [0] : vector<8x2x32xf32> to vector<2x32xf32>
    %cst_72 = arith.constant 8.000000e+00 : f32
    %592 = vector.broadcast %cst_72 : f32 to vector<2x32xf32>
    %593 = arith.divf %591, %592 : vector<2x32xf32>
    %cst_73 = arith.constant dense<0xFF800000> : vector<2x32xf32>
    %594 = vector.multi_reduction <maximumf>, %555, %cst_73 [0] : vector<8x2x32xf32> to vector<2x32xf32>
    %595 = tpu.concatenate %575, %590, %593, %594 in 1 : vector<2x32xf32>, vector<2x32xf32>, vector<2x32xf32>, vector<2x32xf32> -> vector<2x128xf32>
    %cst_74 = arith.constant dense<0.000000e+00> : vector<2x128xf32>
    %596 = tpu.matmul %595, %4, %cst_74 {dimension_numbers = #tpu.dot_dimension_numbers<[1], [0], [0], [1], [0, 0, 1, 1], [], []>} : vector<2x128xf32>, vector<128x128xf32>, vector<2x128xf32> -> vector<2x128xf32>
    %597 = vector.broadcast %11 : vector<1x128xf32> to vector<2x128xf32>
    %598 = arith.addf %596, %597 : vector<2x128xf32>
    %cst_75 = arith.constant 0.000000e+00 : f32
    %599 = vector.broadcast %cst_75 : f32 to vector<2x128xf32>
    %600 = arith.maximumf %598, %599 : vector<2x128xf32>
    %cst_76 = arith.constant dense<0.000000e+00> : vector<2x128xf32>
    %601 = tpu.matmul %600, %5, %cst_76 {dimension_numbers = #tpu.dot_dimension_numbers<[1], [0], [0], [1], [0, 0, 1, 1], [], []>} : vector<2x128xf32>, vector<128x128xf32>, vector<2x128xf32> -> vector<2x128xf32>
    %602 = vector.broadcast %12 : vector<1x128xf32> to vector<2x128xf32>
    %603 = arith.addf %601, %602 : vector<2x128xf32>
    %c0_77 = arith.constant 0 : index
    %c0_78 = arith.constant 0 : index
    %604 = vector.load %arg5[%c0_77, %c0_78] : memref<2x128xf32, #tpu.memory_space<vmem>>, vector<2x128xf32>
    tpu.vector_store %arg5[%c0_77, %c0_78], %603 {strides = array<i32>} : memref<2x128xf32, #tpu.memory_space<vmem>>, vector<2x128xf32>,
    return
  }
  func.func @transform_0(%arg0: i32) -> (i32, i32, i32) {
    %c0_i32 = arith.constant 0 : i32
    %c0_i32_0 = arith.constant 0 : i32
    %c0_i32_1 = arith.constant 0 : i32
    return %c0_i32, %arg0, %c0_i32_0 : i32, i32, i32
  }
  func.func @transform_1(%arg0: i32) -> (i32, i32) {
    %c0_i32 = arith.constant 0 : i32
    %c0_i32_0 = arith.constant 0 : i32
    %c0_i32_1 = arith.constant 0 : i32
    return %c0_i32, %c0_i32_0 : i32, i32
  }
  func.func @transform_2(%arg0: i32) -> (i32, i32, i32) {
    %c0_i32 = arith.constant 0 : i32
    %c0_i32_0 = arith.constant 0 : i32
    %c0_i32_1 = arith.constant 0 : i32
    %c0_i32_2 = arith.constant 0 : i32
    return %c0_i32, %c0_i32_0, %c0_i32_1 : i32, i32, i32
  }
  func.func @transform_3(%arg0: i32) -> (i32, i32, i32) {
    %c0_i32 = arith.constant 0 : i32
    %c0_i32_0 = arith.constant 0 : i32
    %c0_i32_1 = arith.constant 0 : i32
    %c0_i32_2 = arith.constant 0 : i32
    return %c0_i32, %c0_i32_0, %c0_i32_1 : i32, i32, i32
  }
  func.func @transform_4(%arg0: i32) -> (i32, i32) {
    %c0_i32 = arith.constant 0 : i32
    %c0_i32_0 = arith.constant 0 : i32
    return %arg0, %c0_i32 : i32, i32
  }
}

</mosaic_0001>

<bundles_post_ra>
// kernel: tpu_custom_call.1
= control target key start
LH: loop header
LB: loop body
LE: loop exit
PB: predicated region body
PF: predicated region fallthrough
CT: control target
= control target key end

     0   :  { %9 = vsyncpa [#allocation3], 0  ;;  %s4559_s0 = inlined_call_operand.vmem [shape: f32[8,2,32], index: 0, kind: input, shape index: {}]   ;;  %s4560_s1 = inlined_call_operand.hbm [shape: f32[392,128], index: 1, kind: input, shape index: {}]   ;;  %s4561_s2 = inlined_call_operand.vmem [shape: f32[8,1,1], index: 2, kind: input, shape index: {}]   ;;  %s4562_s3 = inlined_call_operand.vmem [shape: f32[8,1,1], index: 3, kind: input, shape index: {}]   ;;  %s4563_s4 = inlined_call_operand.hbm [shape: f32[2,128], index: 4, kind: output, shape index: {}]  }
   0x1   :  { %10 = vsyncpa [#allocation4], 0  ;;  %s3706_s15 = smov [#allocation2]   ;;  %s3658_s19 = scalar_lea.hbm %s4560_s1, 6272 }
   0x2   :  { %s18_s16 = sshll.u32 %s3706_s15, 4  ;;  %p3659_p0 = scmp.ne.s32.totalorder %s4560_s1, %s3658_s19  ;;  %s19_s16 = int_to_ptr.vmem [resolvable:$true] %s18_s16 }
   0x3   :  { %p3662_p1 = scmp.lt.u32.totalorder %s3658_s19, %s4560_s1 }
   0x5   :  { %p3664_p2 = pnand %p3662_p1, %p3659_p0 }
   0x7   :  { %3667 = shalt.err (!%p3664_p2)
}
   0x8   :  { %s3668_s24 = scalar_lea.vmem %s19_s16, 6272  ;;  %p3673_p4 = scmp.lt.s32.totalorder %s19_s16, %s19_s16 }
   0x9   :  { %p3669_p3 = scmp.ne.s32.totalorder %s19_s16, %s3668_s24  ;;  %p3674_p5 = scmp.lt.s32.totalorder %s3668_s24, %s3668_s24 }
   0xb   :  { %p3675_p6 = por %p3674_p5, %p3673_p4 }
   0xd   :  { %p3676_p7 = pnand %p3675_p6, %p3669_p3 }
   0xf   :  { %3679 = shalt.err (!%p3676_p7)
}
  0x10   :  { %s3707_s25 = smov 128   ;;  %s3708_s26 = smov 8  }
  0x11   :  { %24 = dma.hbm_to_vmem [thread:$0]  %s4560_s1, 6272, %s19_s16, [#allocation3], %s3707_s25, %s3707_s25, %s3708_s26  }
  0x12   :  { %3702 = dma.done.wait [#allocation3], 6272  }
  0x13   :  { %3703 = vsyncadd [#allocation3], 4294961024  ;;  %v81_v0 = vlaneseq  ;;  %v3709_v1 = vmov 1983009808   ;;  %v3710_v3 = vmov 0.0|0.0   ;;  %vm3711_vm0 = vmmov 0  }
  0x14   :  { %v120_v2 = vunpack.c.l.s4 %v3709_v1  ;;  %3306 = vmatprep.subr.bf16.mxu1 %v3710_v3  ;;  %v3712_v4 = vmov 0.0   ;;  %v32_v7 = vld [vmem:[#allocation2] sm:$0xff]  ;;  %v33_v8 = vld [vmem:[#allocation2 + $0x8] sm:$0xff]  ;;  %v34_v9 = vld [vmem:[#allocation2 + $0x10] sm:$0xff]  ;;  %vm151_vm1 = vcmask 261120   ;;  %s3714_s18 = smov 64  }
  0x15   :  { %3049 = vmatprep.mubr.msk.f32.mxu1 %vm3711_vm0, %v3712_v4  ;;  %v3761_v5 = vshrl.u32 %v81_v0, 7  ;;  %v3298_v11 = vpack.c.bf16 %v33_v8, %v32_v7  ;;  %v35_v12 = vld [vmem:[#allocation2 + $0x18] sm:$0xff]  ;;  %v97_v13 = vld [vmem:[%s4559_s0] sm:$0x3]  ;;  %v98_v14 = vld [vmem:[%s4559_s0 + $0x2] sm:$0x3] }
  0x16   :  { %v121_v6 = vunpack.c.0.s8 %v120_v2  ;;  %v3302_v15 = vpack.c.bf16 %v35_v12, %v34_v9  ;;  %v99_v16 = vld [vmem:[%s4559_s0 + $0x4] sm:$0x3]  ;;  %v100_v17 = vld [vmem:[%s4559_s0 + $0x6] sm:$0x3]  ;;  %v117_v18 = vcombine.low %v97_v13, %v98_v14  ;;  %v101_v19 = vld [vmem:[%s4559_s0 + $0x8] sm:$0x3] }
  0x17   :  { %3299 = vmatprep.subr.bf16.mxu0 %v3298_v11  ;;  %v118_v20 = vcombine.low %v99_v16, %v100_v17  ;;  %v102_v21 = vld [vmem:[%s4559_s0 + $0xa] sm:$0x3]  ;;  %v103_v22 = vld [vmem:[%s4559_s0 + $0xc] sm:$0x3]  ;;  %v104_v23 = vld [vmem:[%s4559_s0 + $0xe] sm:$0x3] }
  0x18   :  { %v3764_v10 = vsub.s32 %v121_v6, %v3761_v5  ;;  %3301 = vmatpush3.bf16.msra.mxu0 %v3298_v11  ;;  %v134_v25 = vcombine.low %v101_v19, %v102_v21  ;;  %v135_v26 = vcombine.low %v103_v22, %v104_v23  ;;  %v36_v27 = vld [vmem:[#allocation2 + $0x20] sm:$0xff]  ;;  %v37_v28 = vld [vmem:[#allocation2 + $0x28] sm:$0xff]  ;;  %v38_v29 = vld [vmem:[#allocation2 + $0x30] sm:$0xff]  ;;  %v107_v38 = vsub.s32 0, %v3761_v5  ;;  %s3713_s0 = smov 32   ;;  %s3715_s19 = smov 96  }
  0x19   :  { %3303 = vmatprep.subr.bf16.mxu0 %v3302_v15  ;;  %v3792_v31 = vpack.c.bf16 %v37_v28, %v36_v27  ;;  %v39_v32 = vld [vmem:[#allocation2 + $0x38] sm:$0xff]  ;;  %v3819_v39 = vld [vmem:[#allocation2 + $0x180] sm:$0xff]  ;;  %v3823_v41 = vand.u32 127, %v81_v0  ;;  %v2109_v54 = vsub.s32 3, %v3761_v5  ;;  %vm2119_vm4 = vcmask 254976  }
  0x1a   :  { %v125_v24 = vrot.slane %v117_v18, %v3764_v10  ;;  %v132_v30 = vrot.slane %v118_v20, %v3764_v10  ;;  %v142_v33 = vrot.slane %v134_v25, %v3764_v10  ;;  %v149_v34 = vrot.slane %v135_v26, %v3764_v10 }
  0x1b   :  { %3308 = vmatpush3.bf16.msra.mxu1 %v3792_v31  ;;  %v3797_v36 = vpack.c.bf16 %v39_v32, %v38_v29  ;;  %v108_v40 = vrot.slane %v3819_v39, %v107_v38  ;;  %v87_v45 = vand.u32 31, %v3823_v41  ;;  %vm96_vm3 = vcmp.lt.s32.totalorder %v3823_v41, 16  ;;  %v2892_v41 = vld [vmem:[%s4561_s2 + $0x4] ss:$0 sm:$0xff] }
  0x1c   :  { %v133_v35 = vcombine.low %v125_v24, %v132_v30  ;;  %3305 = vmatpush3.bf16.msra.mxu0 %v3302_v15  ;;  %v150_v37 = vcombine.low %v142_v33, %v149_v34  ;;  %3309 = vmatprep.subr.bf16.mxu1 %v3710_v3  ;;  %vm2544_vm5 = vcmask 1024   ;;  %vm2304_vm6 = vcmask 788224  }
  0x1d   :  { %3312 = vmatprep.subr.bf16.mxu0 %v3710_v3  ;;  %vm3835_vm2 = vcmp.lt.s32.totalorder %v87_v45, 16  ;;  %vm2685_vm7 = vcmask 523264   ;;  %vm2687_vm8 = vcmask 785408  }
  0x1e   :  { %3038 = vmatprep.mubr.msk.f32.mxu0 %vm151_vm1, %v133_v35 }
  0x1f   :  { %3039 = vmatmul.mubr.msk.f32.vlgmr.msra.gmra.mrb[0].mxu0 %vm151_vm1, %v150_v37  ;;  %3311 = vmatpush3.bf16.msra.mxu1 %v3797_v36 }
  0x20   :  { %3314 = vmatpush3.bf16.msra.mxu0 %v3792_v31  ;;  %3060 = vmatprep.mubr.msk.f32.mxu0 %vm3711_vm0, %v3712_v4 }
  0x21   :  { %3315 = vmatprep.subr.bf16.mxu0 %v3710_v3  ;;  %3318 = vmatprep.subr.bf16.mxu1 %v3710_v3 }
  0x22   :  { %3050 = vmatmul.mubr.f32.vlgmr.msra.gmra.mrb[0].mxu1 %v3712_v4 }
  0x23   :  { %3320 = vmatpush3.bf16.msra.mxu1 %v3792_v31  ;;  %3071 = vmatprep.mubr.msk.f32.mxu1 %vm3711_vm0, %v3712_v4 }
  0x24   :  { %3317 = vmatpush3.bf16.msra.mxu0 %v3797_v36  ;;  %3321 = vmatprep.subr.bf16.mxu1 %v3710_v3 }
  0x25   :  { %3324 = vmatprep.subr.bf16.mxu0 %v3710_v3 }
  0x27   :  { %3323 = vmatpush3.bf16.msra.mxu1 %v3797_v36 }
  0x28   :  { %3330 = vmatprep.subr.bf16.mxu1 %v3710_v3 }
  0xf2   :  { %v3040_v42 = vpop.f32.mrb[0].mxu0 }
  0xf3   :  { %v228_v43 = vadd.f32 %v3040_v42, %v108_v40  ;;  %v222_v44 = vpop.f32.mrb[1].mxu0 }
  0xf4   :  { %v223_v46 = vadd.f32 %v222_v44, %v108_v40 }
  0xf5   :  { %v250_v47 = vcombine.high %v228_v43, %v228_v43  ;;  %v3827_v48 = vrot.slane %v228_v43, %v3764_v10  ;;  %v347_v49 = vpop.f32.mrb[0].mxu1 }
  0xf6   :  { %v233_v50 = vcombine.high %v223_v46, %v223_v46  ;;  %v3830_v51 = vrot.slane %v223_v46, %v3764_v10  ;;  %v3051_v52 = vpop.f32.mrb[1].mxu1 }
  0xf7   :  { %v3833_v53 = vrot.slane %v250_v47, %v3764_v10  ;;  %v3841_v55 = vcombine.high %v3827_v48, %v3827_v48 }
  0xf8   :  { %v3844_v56 = vrot.slane %v233_v50, %v3764_v10  ;;  %v3848_v57 = vcombine.high %v3830_v51, %v3830_v51 }
  0xf9   :  { %v3852_v58 = vcombine.high %v3833_v53, %v3833_v53 }
  0xfa   :  { %v376_v59 = vsel %vm3835_vm2, %v3848_v57, %v3833_v53  ;;  %v477_v60 = vsel %vm3835_vm2, %v3844_v56, %v3841_v55  ;;  %v3864_v61 = vcombine.high %v3844_v56, %v3844_v56  ;;  %v780_v62 = vsel %vm3835_vm2, %v3841_v55, %v3844_v56 }
  0xfb   :  { %v277_v63 = vsel %vm3835_vm2, %v3830_v51, %v3852_v58  ;;  %v881_v0 = vsel %vm3835_vm2, %v3833_v53, %v3848_v57  ;;  %v982_v1 = vsel %vm3835_vm2, %v3852_v58, %v3830_v51  ;;  %v44_v51 = vld [vmem:[#allocation2 + $0x60] sm:$0xff]  ;;  %v45_v58 = vld [vmem:[#allocation2 + $0x68] sm:$0xff] }
  0xfc   :  { %v351_v2 = vadd.f32 %v347_v49, %v277_v63  ;;  %v578_v6 = vsel %vm3835_vm2, %v3864_v61, %v3827_v48  ;;  %v679_v7 = vsel %vm3835_vm2, %v3827_v48, %v3864_v61 }
  0xfe   :  { %3477 = vtanh.f32 %v351_v2  ;;  %v2856_v9 = vmul.f32 -1.442695, %v351_v2 }
 0x100   :  { %3479 = vpow2.f32 %v2856_v9 }
 0x108   :  { %v3478_v8 = vpop.eup %3477 }
 0x109   :  { %361 = vrot.lane.b32.xlu0 %v3478_v8, %s3713_s0 }
 0x10a   :  { %v3480_v11 = vpop.eup %3479 }
 0x10b   :  { %v355_v12 = vadd.f32 1.0, %v3480_v11 }
 0x10d   :  { %3481 = vrcp.f32 %v355_v12 }
 0x117   :  { %v3482_v13 = vpop.eup %3481 }
 0x118   :  { %v359_v16 = vmul.f32 0.0, %v3482_v13 }
 0x17b   :  { %v362_v14 = vpop.permute.xlu0 %361 }
 0x17c   :  { %v364_v15 = vmul.f32 %v3482_v13, %v362_v14 }
 0x17e   :  { %366 = vrot.lane.b32.xlu0 %v364_v15, %s3713_s0 }
 0x1f0   :  { %v367_v17 = vpop.permute.xlu0 %366 }
 0x1f1   :  { %v369_v18 = vadd.f32 %v367_v17, %v359_v16 }
 0x1f3   :  { %3483 = vtanh.f32 %v369_v18 }
 0x1fd   :  { %v3484_v19 = vpop.eup %3483 }
 0x1fe   :  { %372 = vrot.lane.b32.xlu1 %v3484_v19, %s3713_s0 }
 0x270   :  { %v373_v20 = vpop.permute.xlu1 %372 }
 0x271   :  { %v375_v21 = vmul.f32 %v3482_v13, %v373_v20 }
 0x273   :  { %378 = vrot.lane.b32.xlu1 %v375_v21, %s3714_s18 }
 0x2e5   :  { %v3894_v22 = vpop.permute.xlu1 %378 }
 0x2e6   :  { %3061 = vmatmul.mubr.msk.f32.vlgmr.msra.gmra.mrb[2].mxu0 %vm151_vm1, %v3894_v22 }
 0x2e7   :  { %3326 = vmatpush3.bf16.msra.mxu0 %v3792_v31  ;;  %3082 = vmatprep.mubr.msk.f32.mxu0 %vm3711_vm0, %v3712_v4 }
 0x2e8   :  { %3327 = vmatprep.subr.bf16.mxu0 %v3710_v3 }
 0x2eb   :  { %3329 = vmatpush3.bf16.msra.mxu0 %v3797_v36 }
 0x2ec   :  { %3336 = vmatprep.subr.bf16.mxu0 %v3710_v3 }
 0x3b9   :  { %v448_v23 = vpop.f32.mrb[2].mxu0 }
 0x3ba   :  { %v452_v24 = vadd.f32 %v448_v23, %v376_v59  ;;  %v3062_v25 = vpop.f32.mrb[3].mxu0 }
 0x3bc   :  { %3485 = vtanh.f32 %v452_v24  ;;  %v2858_v27 = vmul.f32 -1.442695, %v452_v24 }
 0x3be   :  { %3487 = vpow2.f32 %v2858_v27 }
 0x3c6   :  { %v3486_v26 = vpop.eup %3485 }
 0x3c7   :  { %462 = vrot.lane.b32.xlu0 %v3486_v26, %s3713_s0 }
 0x3c8   :  { %v3488_v28 = vpop.eup %3487 }
 0x3c9   :  { %v456_v29 = vadd.f32 1.0, %v3488_v28 }
 0x3cb   :  { %3489 = vrcp.f32 %v456_v29 }
 0x3d5   :  { %v3490_v30 = vpop.eup %3489 }
 0x3d6   :  { %v460_v34 = vmul.f32 %v3490_v30, %v369_v18 }
 0x439   :  { %v463_v32 = vpop.permute.xlu0 %462 }
 0x43a   :  { %v465_v33 = vmul.f32 %v3490_v30, %v463_v32 }
 0x43c   :  { %467 = vrot.lane.b32.xlu1 %v465_v33, %s3713_s0 }
 0x4ae   :  { %v468_v35 = vpop.permute.xlu1 %467 }
 0x4af   :  { %v470_v37 = vadd.f32 %v468_v35, %v460_v34 }
 0x4b1   :  { %3491 = vtanh.f32 %v470_v37 }
 0x4bb   :  { %v3492_v38 = vpop.eup %3491 }
 0x4bc   :  { %473 = vrot.lane.b32.xlu0 %v3492_v38, %s3713_s0 }
 0x52e   :  { %v474_v40 = vpop.permute.xlu0 %473 }
 0x52f   :  { %v476_v42 = vmul.f32 %v3490_v30, %v474_v40 }
 0x531   :  { %479 = vrot.lane.b32.xlu1 %v476_v42, %s3714_s18 }
 0x5a3   :  { %v3908_v43 = vpop.permute.xlu1 %479 }
 0x5a4   :  { %3072 = vmatmul.mubr.msk.f32.vlgmr.msra.gmra.mrb[2].mxu1 %vm151_vm1, %v3908_v43 }
 0x5a5   :  { %3332 = vmatpush3.bf16.msra.mxu1 %v3792_v31  ;;  %3093 = vmatprep.mubr.msk.f32.mxu1 %vm3711_vm0, %v3712_v4 }
 0x5a6   :  { %3333 = vmatprep.subr.bf16.mxu1 %v3710_v3 }
 0x5a9   :  { %3335 = vmatpush3.bf16.msra.mxu1 %v3797_v36 }
 0x5aa   :  { %3342 = vmatprep.subr.bf16.mxu1 %v3710_v3 }
 0x677   :  { %v549_v44 = vpop.f32.mrb[2].mxu1 }
 0x678   :  { %v553_v45 = vadd.f32 %v549_v44, %v477_v60  ;;  %v3073_v46 = vpop.f32.mrb[3].mxu1 }
 0x67a   :  { %3493 = vtanh.f32 %v553_v45  ;;  %v2860_v49 = vmul.f32 -1.442695, %v553_v45 }
 0x67c   :  { %3495 = vpow2.f32 %v2860_v49 }
 0x684   :  { %v3494_v47 = vpop.eup %3493 }
 0x685   :  { %563 = vrot.lane.b32.xlu0 %v3494_v47, %s3713_s0 }
 0x686   :  { %v3496_v50 = vpop.eup %3495 }
 0x687   :  { %v557_v52 = vadd.f32 1.0, %v3496_v50 }
 0x689   :  { %3497 = vrcp.f32 %v557_v52 }
 0x693   :  { %v3498_v59 = vpop.eup %3497 }
 0x694   :  { %v561_v8 = vmul.f32 %v3498_v59, %v470_v37 }
 0x6f7   :  { %v564_v63 = vpop.permute.xlu0 %563 }
 0x6f8   :  { %v566_v2 = vmul.f32 %v3498_v59, %v564_v63 }
 0x6fa   :  { %568 = vrot.lane.b32.xlu1 %v566_v2, %s3713_s0 }
 0x76c   :  { %v569_v9 = vpop.permute.xlu1 %568 }
 0x76d   :  { %v571_v11 = vadd.f32 %v569_v9, %v561_v8 }
 0x76f   :  { %3499 = vtanh.f32 %v571_v11 }
 0x779   :  { %v3500_v60 = vpop.eup %3499 }
 0x77a   :  { %574 = vrot.lane.b32.xlu0 %v3500_v60, %s3713_s0 }
 0x7ec   :  { %v575_v12 = vpop.permute.xlu0 %574 }
 0x7ed   :  { %v577_v13 = vmul.f32 %v3498_v59, %v575_v12 }
 0x7ef   :  { %580 = vrot.lane.b32.xlu1 %v577_v13, %s3714_s18 }
 0x861   :  { %v3927_v14 = vpop.permute.xlu1 %580 }
 0x862   :  { %3083 = vmatmul.mubr.msk.f32.vlgmr.msra.gmra.mrb[4].mxu0 %vm151_vm1, %v3927_v14 }
 0x863   :  { %3338 = vmatpush3.bf16.msra.mxu0 %v3792_v31  ;;  %3104 = vmatprep.mubr.msk.f32.mxu0 %vm3711_vm0, %v3712_v4 }
 0x864   :  { %3339 = vmatprep.subr.bf16.mxu0 %v3710_v3 }
 0x867   :  { %3341 = vmatpush3.bf16.msra.mxu0 %v3797_v36 }
 0x868   :  { %3348 = vmatprep.subr.bf16.mxu0 %v3710_v3 }
 0x935   :  { %v650_v15 = vpop.f32.mrb[4].mxu0 }
 0x936   :  { %v654_v16 = vadd.f32 %v650_v15, %v578_v6  ;;  %v3084_v17 = vpop.f32.mrb[5].mxu0 }
 0x938   :  { %3501 = vtanh.f32 %v654_v16  ;;  %v2862_v19 = vmul.f32 -1.442695, %v654_v16 }
 0x93a   :  { %3503 = vpow2.f32 %v2862_v19 }
 0x942   :  { %v3502_v18 = vpop.eup %3501 }
 0x943   :  { %664 = vrot.lane.b32.xlu0 %v3502_v18, %s3713_s0 }
 0x944   :  { %v3504_v20 = vpop.eup %3503 }
 0x945   :  { %v658_v21 = vadd.f32 1.0, %v3504_v20 }
 0x947   :  { %3505 = vrcp.f32 %v658_v21 }
 0x951   :  { %v3506_v23 = vpop.eup %3505 }
 0x952   :  { %v662_v26 = vmul.f32 %v3506_v23, %v571_v11 }
 0x9b5   :  { %v665_v24 = vpop.permute.xlu0 %664 }
 0x9b6   :  { %v667_v25 = vmul.f32 %v3506_v23, %v665_v24 }
 0x9b8   :  { %669 = vrot.lane.b32.xlu1 %v667_v25, %s3713_s0 }
 0xa2a   :  { %v670_v27 = vpop.permute.xlu1 %669 }
 0xa2b   :  { %v672_v28 = vadd.f32 %v670_v27, %v662_v26 }
 0xa2d   :  { %3507 = vtanh.f32 %v672_v28 }
 0xa37   :  { %v3508_v6 = vpop.eup %3507 }
 0xa38   :  { %675 = vrot.lane.b32.xlu0 %v3508_v6, %s3713_s0 }
 0xaaa   :  { %v676_v29 = vpop.permute.xlu0 %675 }
 0xaab   :  { %v678_v30 = vmul.f32 %v3506_v23, %v676_v29 }
 0xaad   :  { %681 = vrot.lane.b32.xlu1 %v678_v30, %s3714_s18 }
 0xb1f   :  { %v3946_v32 = vpop.permute.xlu1 %681 }
 0xb20   :  { %3094 = vmatmul.mubr.msk.f32.vlgmr.msra.gmra.mrb[4].mxu1 %vm151_vm1, %v3946_v32 }
 0xb21   :  { %3344 = vmatpush3.bf16.msra.mxu1 %v3792_v31  ;;  %3115 = vmatprep.mubr.msk.f32.mxu1 %vm3711_vm0, %v3712_v4 }
 0xb22   :  { %3345 = vmatprep.subr.bf16.mxu1 %v3710_v3 }
 0xb25   :  { %3347 = vmatpush3.bf16.msra.mxu1 %v3797_v36 }
 0xbf3   :  { %v751_v33 = vpop.f32.mrb[4].mxu1 }
 0xbf4   :  { %v755_v34 = vadd.f32 %v751_v33, %v679_v7  ;;  %v3095_v35 = vpop.f32.mrb[5].mxu1 }
 0xbf6   :  { %3509 = vtanh.f32 %v755_v34  ;;  %v2864_v38 = vmul.f32 -1.442695, %v755_v34 }
 0xbf8   :  { %3511 = vpow2.f32 %v2864_v38 }
 0xc00   :  { %v3510_v37 = vpop.eup %3509 }
 0xc01   :  { %765 = vrot.lane.b32.xlu0 %v3510_v37, %s3713_s0 }
 0xc02   :  { %v3512_v40 = vpop.eup %3511 }
 0xc03   :  { %v759_v42 = vadd.f32 1.0, %v3512_v40 }
 0xc05   :  { %3513 = vrcp.f32 %v759_v42 }
 0xc0f   :  { %v3514_v44 = vpop.eup %3513 }
 0xc10   :  { %v763_v47 = vmul.f32 %v3514_v44, %v672_v28 }
 0xc73   :  { %v766_v45 = vpop.permute.xlu0 %765 }
 0xc74   :  { %v768_v46 = vmul.f32 %v3514_v44, %v766_v45 }
 0xc76   :  { %770 = vrot.lane.b32.xlu1 %v768_v46, %s3713_s0 }
 0xce8   :  { %v771_v49 = vpop.permute.xlu1 %770 }
 0xce9   :  { %v773_v50 = vadd.f32 %v771_v49, %v763_v47 }
 0xceb   :  { %3515 = vtanh.f32 %v773_v50 }
 0xcf5   :  { %v3516_v48 = vpop.eup %3515 }
 0xcf6   :  { %776 = vrot.lane.b32.xlu0 %v3516_v48, %s3713_s0 }
 0xd68   :  { %v777_v61 = vpop.permute.xlu0 %776 }
 0xd69   :  { %v779_v7 = vmul.f32 %v3514_v44, %v777_v61  ;;  %v4009_v61 = vpack.c.bf16 %v45_v58, %v44_v51 }
 0xd6b   :  { %782 = vrot.lane.b32.xlu1 %v779_v7, %s3714_s18  ;;  %v47_v7 = vld [vmem:[#allocation2 + $0x78] sm:$0xff] }
 0xddd   :  { %v3964_v52 = vpop.permute.xlu1 %782 }
 0xdde   :  { %3105 = vmatmul.mubr.msk.f32.vlgmr.msra.gmra.mrb[6].mxu0 %vm151_vm1, %v3964_v52 }
 0xddf   :  { %3350 = vmatpush3.bf16.msra.mxu0 %v3792_v31  ;;  %3126 = vmatprep.mubr.msk.f32.mxu0 %vm3711_vm0, %v3712_v4 }
 0xde0   :  { %3351 = vmatprep.subr.bf16.mxu0 %v3710_v3 }
 0xde3   :  { %3353 = vmatpush3.bf16.msra.mxu0 %v3797_v36 }
 0xde4   :  { %3362 = vmatprep.subr.bf16.mxu0 %v3710_v3 }
 0xeb1   :  { %v852_v59 = vpop.f32.mrb[6].mxu0 }
 0xeb2   :  { %v856_v63 = vadd.f32 %v852_v59, %v780_v62  ;;  %v3106_v2 = vpop.f32.mrb[7].mxu0 }
 0xeb3   :  { %v40_v2 = vld [vmem:[#allocation2 + $0x40] sm:$0xff] }
 0xeb4   :  { %3517 = vtanh.f32 %v856_v63  ;;  %v2866_v31 = vmul.f32 -1.442695, %v856_v63 }
 0xeb6   :  { %3519 = vpow2.f32 %v2866_v31 }
 0xebe   :  { %v3518_v8 = vpop.eup %3517 }
 0xebf   :  { %866 = vrot.lane.b32.xlu0 %v3518_v8, %s3713_s0  ;;  %v41_v8 = vld [vmem:[#allocation2 + $0x48] sm:$0xff] }
 0xec0   :  { %v3520_v9 = vpop.eup %3519  ;;  %v3354_v31 = vpack.c.bf16 %v41_v8, %v40_v2 }
 0xec1   :  { %v860_v11 = vadd.f32 1.0, %v3520_v9  ;;  %v42_v9 = vld [vmem:[#allocation2 + $0x50] sm:$0xff] }
 0xec2   :  { %3355 = vmatprep.subr.bf16.mxu1 %v3354_v31 }
 0xec3   :  { %3521 = vrcp.f32 %v860_v11  ;;  %v43_v11 = vld [vmem:[#allocation2 + $0x58] sm:$0xff] }
 0xecd   :  { %v3522_v36 = vpop.eup %3521 }
 0xece   :  { %v864_v13 = vmul.f32 %v3522_v36, %v773_v50 }
 0xf31   :  { %v867_v60 = vpop.permute.xlu0 %866 }
 0xf32   :  { %v869_v12 = vmul.f32 %v3522_v36, %v867_v60 }
 0xf34   :  { %871 = vrot.lane.b32.xlu1 %v869_v12, %s3713_s0 }
 0xfa6   :  { %v872_v15 = vpop.permute.xlu1 %871 }
 0xfa7   :  { %v874_v16 = vadd.f32 %v872_v15, %v864_v13  ;;  %v1276_v13 = vsub.s32 2, %v3761_v5 }
 0xfa9   :  { %3523 = vtanh.f32 %v874_v16  ;;  %v4029_v15 = vrot.slane %v3819_v39, %v1276_v13 }
 0xfb3   :  { %v3524_v55 = vpop.eup %3523 }
 0xfb4   :  { %877 = vrot.lane.b32.xlu0 %v3524_v55, %s3713_s0 }
0x1026   :  { %v878_v56 = vpop.permute.xlu0 %877 }
0x1027   :  { %v880_v62 = vmul.f32 %v3522_v36, %v878_v56  ;;  %v3358_v36 = vpack.c.bf16 %v43_v11, %v42_v9 }
0x1029   :  { %883 = vrot.lane.b32.xlu1 %v880_v62, %s3714_s18 }
0x109b   :  { %v3983_v17 = vpop.permute.xlu1 %883 }
0x109c   :  { %3116 = vmatmul.mubr.msk.f32.vlgmr.msra.gmra.mrb[6].mxu1 %vm151_vm1, %v3983_v17  ;;  %v4038_v62 = vsel %vm96_vm3, %v3927_v14, %v3983_v17 }
0x109d   :  { %3357 = vmatpush3.bf16.msra.mxu1 %v3354_v31 }
0x109e   :  { %3359 = vmatprep.subr.bf16.mxu1 %v3358_v36 }
0x10a1   :  { %3361 = vmatpush3.bf16.msra.mxu1 %v3358_v36 }
0x10a2   :  { %3368 = vmatprep.subr.bf16.mxu1 %v3710_v3 }
0x116f   :  { %v953_v18 = vpop.f32.mrb[6].mxu1 }
0x1170   :  { %v957_v19 = vadd.f32 %v953_v18, %v881_v0  ;;  %v3117_v20 = vpop.f32.mrb[7].mxu1  ;;  %v4044_v18 = vsel %vm96_vm3, %v3983_v17, %v3927_v14 }
0x1171   :  { %v4056_v20 = vsel %vm96_vm3, %v3964_v52, %v3946_v32 }
0x1172   :  { %3525 = vtanh.f32 %v957_v19  ;;  %v2868_v23 = vmul.f32 -1.442695, %v957_v19  ;;  %v4050_v19 = vsel %vm96_vm3, %v3946_v32, %v3964_v52 }
0x1174   :  { %3527 = vpow2.f32 %v2868_v23  ;;  %v1133_v23 = vcombine.low %v4056_v20, %v4044_v18 }
0x117c   :  { %v3526_v21 = vpop.eup %3525 }
0x117d   :  { %967 = vrot.lane.b32.xlu0 %v3526_v21, %s3713_s0  ;;  %v1117_v21 = vcombine.low %v4038_v62, %v4050_v19 }
0x117e   :  { %v3528_v24 = vpop.eup %3527 }
0x117f   :  { %v961_v25 = vadd.f32 1.0, %v3528_v24 }
0x1181   :  { %3529 = vrcp.f32 %v961_v25 }
0x118b   :  { %v3530_v26 = vpop.eup %3529 }
0x118c   :  { %v965_v6 = vmul.f32 %v3530_v26, %v874_v16 }
0x11ef   :  { %v968_v27 = vpop.permute.xlu0 %967 }
0x11f0   :  { %v970_v28 = vmul.f32 %v3530_v26, %v968_v27  ;;  %v1131_v27 = vrot.slane %v1117_v21, %v3764_v10 }
0x11f2   :  { %972 = vrot.lane.b32.xlu1 %v970_v28, %s3713_s0 }
0x1264   :  { %v973_v29 = vpop.permute.xlu1 %972 }
0x1265   :  { %v975_v30 = vadd.f32 %v973_v29, %v965_v6 }
0x1267   :  { %3531 = vtanh.f32 %v975_v30 }
0x1271   :  { %v3532_v53 = vpop.eup %3531 }
0x1272   :  { %978 = vrot.lane.b32.xlu0 %v3532_v53, %s3713_s0 }
0x12e4   :  { %v979_v57 = vpop.permute.xlu0 %978 }
0x12e5   :  { %v981_v0 = vmul.f32 %v3530_v26, %v979_v57 }
0x12e7   :  { %984 = vrot.lane.b32.xlu1 %v981_v0, %s3714_s18 }
0x1359   :  { %v3996_v33 = vpop.permute.xlu1 %984 }
0x135a   :  { %3127 = vmatmul.mubr.msk.f32.vlgmr.msra.gmra.mrb[8].mxu0 %vm151_vm1, %v3996_v33  ;;  %v4066_v17 = vsel %vm96_vm3, %v3908_v43, %v3996_v33  ;;  %v4072_v24 = vsel %vm96_vm3, %v3996_v33, %v3908_v43  ;;  %v1141_v43 = vrot.slane %v1133_v23, %v3764_v10 }
0x135b   :  { %3148 = vmatprep.mubr.msk.f32.mxu0 %vm3711_vm0, %v3712_v4  ;;  %3364 = vmatpush3.bf16.msra.mxu0 %v4009_v61 }
0x135c   :  { %3365 = vmatprep.subr.bf16.mxu0 %v3710_v3 }
0x142d   :  { %v1054_v34 = vpop.f32.mrb[8].mxu0 }
0x142e   :  { %v1058_v35 = vadd.f32 %v1054_v34, %v982_v1  ;;  %v3128_v37 = vpop.f32.mrb[9].mxu0  ;;  %v46_v1 = vld [vmem:[#allocation2 + $0x70] sm:$0xff] }
0x142f   :  { %v4012_v59 = vpack.c.bf16 %v47_v7, %v46_v1 }
0x1430   :  { %3533 = vtanh.f32 %v1058_v35  ;;  %v2870_v40 = vmul.f32 -1.442695, %v1058_v35 }
0x1431   :  { %3367 = vmatpush3.bf16.msra.mxu0 %v4012_v59 }
0x1432   :  { %3535 = vpow2.f32 %v2870_v40  ;;  %3374 = vmatprep.subr.bf16.mxu0 %v3710_v3 }
0x1434   :  { %3149 = vmatmul.mubr.f32.vlgmr.msra.gmra.mrb[10].mxu0 %v3712_v4 }
0x1435   :  { %3376 = vmatpush3.bf16.msra.mxu0 %v4009_v61  ;;  %3170 = vmatprep.mubr.msk.f32.mxu0 %vm3711_vm0, %v3712_v4 }
0x1436   :  { %3377 = vmatprep.subr.bf16.mxu0 %v3710_v3 }
0x1439   :  { %3379 = vmatpush3.bf16.msra.mxu0 %v4012_v59 }
0x143a   :  { %v3534_v38 = vpop.eup %3533  ;;  %3386 = vmatprep.subr.bf16.mxu0 %v3710_v3 }
0x143b   :  { %1068 = vrot.lane.b32.xlu0 %v3534_v38, %s3713_s0 }
0x143c   :  { %v3536_v42 = vpop.eup %3535 }
0x143d   :  { %v1062_v44 = vadd.f32 1.0, %v3536_v42 }
0x143f   :  { %3537 = vrcp.f32 %v1062_v44 }
0x1449   :  { %v3538_v45 = vpop.eup %3537 }
0x144a   :  { %v1066_v49 = vmul.f32 %v3538_v45, %v975_v30 }
0x14ad   :  { %v1069_v46 = vpop.permute.xlu0 %1068 }
0x14ae   :  { %v1071_v47 = vmul.f32 %v3538_v45, %v1069_v46 }
0x14b0   :  { %1073 = vrot.lane.b32.xlu1 %v1071_v47, %s3713_s0 }
0x1507   :  { %v1344_v16 = vpop.f32.mrb[10].mxu0 }
0x1508   :  { %v1345_v55 = vadd.f32 %v1344_v16, %v4029_v15  ;;  %v3150_v56 = vpop.f32.mrb[11].mxu0 }
0x1522   :  { %v1074_v50 = vpop.permute.xlu1 %1073 }
0x1523   :  { %v1076_v48 = vadd.f32 %v1074_v50, %v1066_v49 }
0x1525   :  { %3539 = vtanh.f32 %v1076_v48 }
0x152f   :  { %v3540_v63 = vpop.eup %3539 }
0x1530   :  { %1079 = vrot.lane.b32.xlu0 %v3540_v63, %s3713_s0 }
0x1534   :  { %1356 = vrot.lane.b32.xlu0 %v1345_v55, %s3714_s18 }
0x15a2   :  { %v1080_v60 = vpop.permute.xlu0 %1079 }
0x15a3   :  { %v1082_v12 = vmul.f32 %v3538_v45, %v1080_v60 }
0x15a5   :  { %1087 = vrot.lane.b32.xlu1 %v1082_v12, %s3714_s18 }
0x15a6   :  { %v1357_v47 = vpop.permute.xlu0 %1356 }
0x1617   :  { %v1088_v14 = vpop.permute.xlu1 %1087 }
0x1618   :  { %v4077_v32 = vsel %vm96_vm3, %v3894_v22, %v1088_v14  ;;  %v4082_v52 = vsel %vm96_vm3, %v1088_v14, %v3894_v22  ;;  %v1106_v22 = vsub.s32 1, %v3761_v5 }
0x1619   :  { %v1116_v25 = vcombine.low %v4077_v32, %v4066_v17  ;;  %v1134_v26 = vcombine.low %v4072_v24, %v4082_v52 }
0x161a   :  { %v1107_v53 = vrot.slane %v3819_v39, %v1106_v22 }
0x161b   :  { %v1124_v28 = vrot.slane %v1116_v25, %v3764_v10  ;;  %v1148_v6 = vrot.slane %v1134_v26, %v3764_v10 }
0x161d   :  { %v1132_v29 = vcombine.low %v1124_v28, %v1131_v27  ;;  %v1149_v30 = vcombine.low %v1141_v43, %v1148_v6 }
0x161f   :  { %3137 = vmatprep.mubr.msk.f32.mxu1 %vm151_vm1, %v1132_v29 }
0x1620   :  { %3138 = vmatmul.mubr.msk.f32.vlgmr.msra.gmra.mrb[8].mxu1 %vm151_vm1, %v1149_v30 }
0x1621   :  { %3370 = vmatpush3.bf16.msra.mxu1 %v4009_v61  ;;  %3159 = vmatprep.mubr.msk.f32.mxu1 %vm3711_vm0, %v3712_v4 }
0x1622   :  { %3371 = vmatprep.subr.bf16.mxu1 %v3710_v3 }
0x1625   :  { %3373 = vmatpush3.bf16.msra.mxu1 %v4012_v59 }
0x1626   :  { %3380 = vmatprep.subr.bf16.mxu1 %v3710_v3 }
0x16f3   :  { %v3139_v57 = vpop.f32.mrb[8].mxu1 }
0x16f4   :  { %v4102_v0 = vadd.f32 %v3139_v57, %v1107_v53  ;;  %v1220_v33 = vpop.f32.mrb[9].mxu1 }
0x16f5   :  { %v4106_v35 = vadd.f32 %v1220_v33, %v1107_v53 }
0x16f6   :  { %v1248_v34 = vcombine.high %v4102_v0, %v4102_v0 }
0x16f7   :  { %v4117_v40 = vrot.slane %v4106_v35, %v3764_v10 }
0x16f8   :  { %v4109_v37 = vrot.slane %v1248_v34, %v3764_v10  ;;  %v4163_v34 = vrot.slane %v4102_v0, %v3764_v10 }
0x16f9   :  { %v4140_v60 = vcombine.high %v4117_v40, %v4117_v40 }
0x16fa   :  { %v4113_v38 = vcombine.high %v4109_v37, %v4109_v37 }
0x16fb   :  { %v1374_v12 = vsel %vm3835_vm2, %v4140_v60, %v4109_v37 }
0x16fc   :  { %v1273_v39 = vsel %vm3835_vm2, %v4117_v40, %v4113_v38 }
0x16fd   :  { %v1348_v42 = vadd.f32 %v1345_v55, %v1273_v39 }
0x16ff   :  { %v2873_v44 = vmul.f32 -1.442695, %v1348_v42 }
0x1701   :  { %3541 = vpow2.f32 %v2873_v44  ;;  %v4172_v44 = vcombine.high %v4163_v34, %v4163_v34 }
0x170b   :  { %v3542_v45 = vpop.eup %3541 }
0x170c   :  { %v1352_v46 = vadd.f32 1.0, %v3542_v45 }
0x170e   :  { %3543 = vrcp.f32 %v1352_v46 }
0x1718   :  { %v3544_v49 = vpop.eup %3543 }
0x1719   :  { %v1359_v50 = vmul.f32 %v3544_v49, %v1357_v47  ;;  %v1366_v1 = vsub.f32 1.0, %v3544_v49  ;;  %v1372_v63 = vmul.f32 0.0, %v3544_v49 }
0x171b   :  { %1361 = vrot.lane.b32.xlu1 %v1359_v50, %s3714_s18 }
0x178d   :  { %v1362_v48 = vpop.permute.xlu1 %1361 }
0x178e   :  { %v1364_v51 = vadd.f32 %v1362_v48, %v1273_v39  ;;  %v1231_v39 = vcombine.high %v4106_v35, %v4106_v35 }
0x1790   :  { %3545 = vtanh.f32 %v1364_v51  ;;  %v4168_v42 = vrot.slane %v1231_v39, %v3764_v10 }
0x1792   :  { %v1476_v45 = vsel %vm3835_vm2, %v4168_v42, %v4172_v44 }
0x179a   :  { %v3546_v58 = vpop.eup %3545 }
0x179b   :  { %1368 = vrot.lane.b32.xlu0 %v3546_v58, %s3715_s19 }
0x180d   :  { %v1369_v7 = vpop.permute.xlu0 %1368 }
0x180e   :  { %v1371_v2 = vmul.f32 %v1369_v7, %v1366_v1 }
0x1810   :  { %v1373_v8 = vadd.f32 %v1372_v63, %v1371_v2 }
0x1812   :  { %1376 = vrot.lane.b32.xlu1 %v1373_v8, %s3715_s19 }
0x1884   :  { %v4126_v31 = vpop.permute.xlu1 %1376 }
0x1885   :  { %3160 = vmatmul.mubr.msk.f32.vlgmr.msra.gmra.mrb[10].mxu1 %vm151_vm1, %v4126_v31 }
0x1886   :  { %3382 = vmatpush3.bf16.msra.mxu1 %v4009_v61  ;;  %3181 = vmatprep.mubr.msk.f32.mxu1 %vm3711_vm0, %v3712_v4 }
0x1887   :  { %3383 = vmatprep.subr.bf16.mxu1 %v3710_v3 }
0x188a   :  { %3385 = vmatpush3.bf16.msra.mxu1 %v4012_v59 }
0x188b   :  { %3392 = vmatprep.subr.bf16.mxu1 %v3710_v3 }
0x1958   :  { %v1446_v9 = vpop.f32.mrb[10].mxu1 }
0x1959   :  { %v1447_v11 = vadd.f32 %v1446_v9, %v4029_v15  ;;  %v3161_v36 = vpop.f32.mrb[11].mxu1 }
0x195b   :  { %1458 = vrot.lane.b32.xlu0 %v1447_v11, %s3714_s18  ;;  %v1450_v13 = vadd.f32 %v1447_v11, %v1374_v12 }
0x195d   :  { %v2875_v16 = vmul.f32 -1.442695, %v1450_v13 }
0x195f   :  { %3547 = vpow2.f32 %v2875_v16  ;;  %v4195_v16 = vcombine.high %v4168_v42, %v4168_v42 }
0x1969   :  { %v3548_v55 = vpop.eup %3547 }
0x196a   :  { %v1454_v56 = vadd.f32 1.0, %v3548_v55  ;;  %v1578_v55 = vsel %vm3835_vm2, %v4195_v16, %v4163_v34 }
0x196c   :  { %3549 = vrcp.f32 %v1454_v56 }
0x1976   :  { %v3550_v21 = vpop.eup %3549 }
0x1977   :  { %v1468_v43 = vsub.f32 1.0, %v3550_v21  ;;  %v1474_v6 = vmul.f32 %v3550_v21, %v1373_v8 }
0x19cd   :  { %v1459_v23 = vpop.permute.xlu0 %1458 }
0x19ce   :  { %v1461_v14 = vmul.f32 %v3550_v21, %v1459_v23 }
0x19d0   :  { %1463 = vrot.lane.b32.xlu1 %v1461_v14, %s3714_s18 }
0x1a42   :  { %v1464_v25 = vpop.permute.xlu1 %1463 }
0x1a43   :  { %v1466_v26 = vadd.f32 %v1464_v25, %v1374_v12 }
0x1a45   :  { %3551 = vtanh.f32 %v1466_v26 }
0x1a4f   :  { %v3552_v27 = vpop.eup %3551 }
0x1a50   :  { %1470 = vrot.lane.b32.xlu0 %v3552_v27, %s3715_s19 }
0x1ac2   :  { %v1471_v28 = vpop.permute.xlu0 %1470 }
0x1ac3   :  { %v1473_v29 = vmul.f32 %v1471_v28, %v1468_v43 }
0x1ac5   :  { %v1475_v30 = vadd.f32 %v1474_v6, %v1473_v29 }
0x1ac7   :  { %1478 = vrot.lane.b32.xlu1 %v1475_v30, %s3715_s19 }
0x1b39   :  { %v4149_v22 = vpop.permute.xlu1 %1478 }
0x1b3a   :  { %3171 = vmatmul.mubr.msk.f32.vlgmr.msra.gmra.mrb[12].mxu0 %vm151_vm1, %v4149_v22 }
0x1b3b   :  { %3388 = vmatpush3.bf16.msra.mxu0 %v4009_v61  ;;  %3192 = vmatprep.mubr.msk.f32.mxu0 %vm3711_vm0, %v3712_v4 }
0x1b3c   :  { %3389 = vmatprep.subr.bf16.mxu0 %v3710_v3 }
0x1b3f   :  { %3391 = vmatpush3.bf16.msra.mxu0 %v4012_v59 }
0x1b40   :  { %3398 = vmatprep.subr.bf16.mxu0 %v3710_v3 }
0x1c0d   :  { %v1548_v53 = vpop.f32.mrb[12].mxu0 }
0x1c0e   :  { %v1549_v57 = vadd.f32 %v1548_v53, %v4029_v15  ;;  %v3172_v33 = vpop.f32.mrb[13].mxu0 }
0x1c10   :  { %1560 = vrot.lane.b32.xlu0 %v1549_v57, %s3714_s18  ;;  %v1552_v46 = vadd.f32 %v1549_v57, %v1476_v45 }
0x1c12   :  { %v2877_v47 = vmul.f32 -1.442695, %v1552_v46 }
0x1c14   :  { %3553 = vpow2.f32 %v2877_v47 }
0x1c1e   :  { %v3554_v0 = vpop.eup %3553 }
0x1c1f   :  { %v1556_v49 = vadd.f32 1.0, %v3554_v0  ;;  %v1680_v0 = vsel %vm3835_vm2, %v4163_v34, %v4195_v16 }
0x1c21   :  { %3555 = vrcp.f32 %v1556_v49 }
0x1c2b   :  { %v3556_v50 = vpop.eup %3555 }
0x1c2c   :  { %v1570_v7 = vsub.f32 1.0, %v3556_v50  ;;  %v1576_v2 = vmul.f32 %v3556_v50, %v1475_v30 }
0x1c82   :  { %v1561_v35 = vpop.permute.xlu0 %1560 }
0x1c83   :  { %v1563_v48 = vmul.f32 %v3556_v50, %v1561_v35 }
0x1c85   :  { %1565 = vrot.lane.b32.xlu1 %v1563_v48, %s3714_s18 }
0x1cf7   :  { %v1566_v51 = vpop.permute.xlu1 %1565 }
0x1cf8   :  { %v1568_v58 = vadd.f32 %v1566_v51, %v1476_v45 }
0x1cfa   :  { %3557 = vtanh.f32 %v1568_v58 }
0x1d04   :  { %v3558_v1 = vpop.eup %3557 }
0x1d05   :  { %1572 = vrot.lane.b32.xlu0 %v3558_v1, %s3715_s19 }
0x1d77   :  { %v1573_v63 = vpop.permute.xlu0 %1572 }
0x1d78   :  { %v1575_v8 = vmul.f32 %v1573_v63, %v1570_v7 }
0x1d7a   :  { %v1577_v9 = vadd.f32 %v1576_v2, %v1575_v8 }
0x1d7c   :  { %1580 = vrot.lane.b32.xlu1 %v1577_v9, %s3715_s19 }
0x1dee   :  { %v4181_v11 = vpop.permute.xlu1 %1580 }
0x1def   :  { %3182 = vmatmul.mubr.msk.f32.vlgmr.msra.gmra.mrb[12].mxu1 %vm151_vm1, %v4181_v11 }
0x1df0   :  { %3394 = vmatpush3.bf16.msra.mxu1 %v4009_v61  ;;  %3203 = vmatprep.mubr.msk.f32.mxu1 %vm3711_vm0, %v3712_v4 }
0x1df1   :  { %3395 = vmatprep.subr.bf16.mxu1 %v3710_v3 }
0x1df4   :  { %3397 = vmatpush3.bf16.msra.mxu1 %v4012_v59 }
0x1df5   :  { %3404 = vmatprep.subr.bf16.mxu1 %v3710_v3 }
0x1ec2   :  { %v1650_v36 = vpop.f32.mrb[12].mxu1 }
0x1ec3   :  { %v1651_v12 = vadd.f32 %v1650_v36, %v4029_v15  ;;  %v3183_v13 = vpop.f32.mrb[13].mxu1 }
0x1ec5   :  { %1662 = vrot.lane.b32.xlu0 %v1651_v12, %s3714_s18  ;;  %v1654_v56 = vadd.f32 %v1651_v12, %v1578_v55 }
0x1ec7   :  { %v2879_v21 = vmul.f32 -1.442695, %v1654_v56 }
0x1ec9   :  { %3559 = vpow2.f32 %v2879_v21 }
0x1ed3   :  { %v3560_v23 = vpop.eup %3559 }
0x1ed4   :  { %v1658_v14 = vadd.f32 1.0, %v3560_v23 }
0x1ed6   :  { %3561 = vrcp.f32 %v1658_v14 }
0x1ee0   :  { %v3562_v25 = vpop.eup %3561 }
0x1ee1   :  { %v1672_v29 = vsub.f32 1.0, %v3562_v25  ;;  %v1678_v53 = vmul.f32 %v3562_v25, %v1577_v9 }
0x1f37   :  { %v1663_v26 = vpop.permute.xlu0 %1662 }
0x1f38   :  { %v1665_v27 = vmul.f32 %v3562_v25, %v1663_v26 }
0x1f3a   :  { %1667 = vrot.lane.b32.xlu1 %v1665_v27, %s3714_s18 }
0x1fac   :  { %v1668_v43 = vpop.permute.xlu1 %1667 }
0x1fad   :  { %v1670_v28 = vadd.f32 %v1668_v43, %v1578_v55 }
0x1faf   :  { %3563 = vtanh.f32 %v1670_v28 }
0x1fb9   :  { %v3564_v6 = vpop.eup %3563 }
0x1fba   :  { %1674 = vrot.lane.b32.xlu0 %v3564_v6, %s3715_s19 }
0x202c   :  { %v1675_v30 = vpop.permute.xlu0 %1674 }
0x202d   :  { %v1677_v57 = vmul.f32 %v1675_v30, %v1672_v29 }
0x202f   :  { %v1679_v33 = vadd.f32 %v1678_v53, %v1677_v57 }
0x2031   :  { %1682 = vrot.lane.b32.xlu1 %v1679_v33, %s3715_s19 }
0x20a3   :  { %v4204_v39 = vpop.permute.xlu1 %1682 }
0x20a4   :  { %3193 = vmatmul.mubr.msk.f32.vlgmr.msra.gmra.mrb[14].mxu0 %vm151_vm1, %v4204_v39 }
0x20a5   :  { %3400 = vmatpush3.bf16.msra.mxu0 %v4009_v61  ;;  %3214 = vmatprep.mubr.msk.f32.mxu0 %vm3711_vm0, %v3712_v4 }
0x20a6   :  { %3401 = vmatprep.subr.bf16.mxu0 %v3710_v3 }
0x20a9   :  { %3403 = vmatpush3.bf16.msra.mxu0 %v4012_v59 }
0x20aa   :  { %3410 = vmatprep.subr.bf16.mxu0 %v3710_v3 }
0x2177   :  { %v1752_v45 = vpop.f32.mrb[14].mxu0 }
0x2178   :  { %v1753_v46 = vadd.f32 %v1752_v45, %v4029_v15  ;;  %v3194_v47 = vpop.f32.mrb[15].mxu0 }
0x217a   :  { %1764 = vrot.lane.b32.xlu0 %v1753_v46, %s3714_s18  ;;  %v1756_v49 = vadd.f32 %v1753_v46, %v1680_v0 }
0x217c   :  { %v2881_v50 = vmul.f32 -1.442695, %v1756_v49 }
0x217e   :  { %3565 = vpow2.f32 %v2881_v50 }
0x2188   :  { %v3566_v35 = vpop.eup %3565 }
0x2189   :  { %v1760_v48 = vadd.f32 1.0, %v3566_v35  ;;  %v1884_v35 = vsel %vm3835_vm2, %v4109_v37, %v4140_v60 }
0x218b   :  { %3567 = vrcp.f32 %v1760_v48 }
0x2195   :  { %v3568_v51 = vpop.eup %3567 }
0x2196   :  { %v1774_v8 = vsub.f32 1.0, %v3568_v51  ;;  %v1780_v36 = vmul.f32 %v3568_v51, %v1679_v33 }
0x21ec   :  { %v1765_v58 = vpop.permute.xlu0 %1764 }
0x21ed   :  { %v1767_v1 = vmul.f32 %v3568_v51, %v1765_v58 }
0x21ef   :  { %1769 = vrot.lane.b32.xlu1 %v1767_v1, %s3714_s18 }
0x2261   :  { %v1770_v7 = vpop.permute.xlu1 %1769 }
0x2262   :  { %v1772_v63 = vadd.f32 %v1770_v7, %v1680_v0 }
0x2264   :  { %3569 = vtanh.f32 %v1772_v63 }
0x226e   :  { %v3570_v2 = vpop.eup %3569 }
0x226f   :  { %1776 = vrot.lane.b32.xlu0 %v3570_v2, %s3715_s19 }
0x22e1   :  { %v1777_v9 = vpop.permute.xlu0 %1776 }
0x22e2   :  { %v1779_v12 = vmul.f32 %v1777_v9, %v1774_v8 }
0x22e4   :  { %v1781_v13 = vadd.f32 %v1780_v36, %v1779_v12 }
0x22e6   :  { %1784 = vrot.lane.b32.xlu1 %v1781_v13, %s3715_s19 }
0x2358   :  { %v4223_v55 = vpop.permute.xlu1 %1784 }
0x2359   :  { %3204 = vmatmul.mubr.msk.f32.vlgmr.msra.gmra.mrb[14].mxu1 %vm151_vm1, %v4223_v55 }
0x235a   :  { %3406 = vmatpush3.bf16.msra.mxu1 %v4009_v61  ;;  %3225 = vmatprep.mubr.msk.f32.mxu1 %vm3711_vm0, %v3712_v4  ;;  %v1782_v61 = vsel %vm3835_vm2, %v4172_v44, %v4168_v42 }
0x235b   :  { %3407 = vmatprep.subr.bf16.mxu1 %v3710_v3 }
0x235e   :  { %3409 = vmatpush3.bf16.msra.mxu1 %v4012_v59 }
0x235f   :  { %3434 = vmatprep.subr.bf16.mxu1 %v3710_v3 }
0x242c   :  { %v1854_v56 = vpop.f32.mrb[14].mxu1 }
0x242d   :  { %v1855_v21 = vadd.f32 %v1854_v56, %v4029_v15  ;;  %v3205_v23 = vpop.f32.mrb[15].mxu1 }
0x242f   :  { %1866 = vrot.lane.b32.xlu0 %v1855_v21, %s3714_s18  ;;  %v1858_v14 = vadd.f32 %v1855_v21, %v1782_v61 }
0x2431   :  { %v2883_v25 = vmul.f32 -1.442695, %v1858_v14 }
0x2433   :  { %3571 = vpow2.f32 %v2883_v25 }
0x243d   :  { %v3572_v26 = vpop.eup %3571 }
0x243e   :  { %v1862_v27 = vadd.f32 1.0, %v3572_v26 }
0x2440   :  { %3573 = vrcp.f32 %v1862_v27  ;;  %v1986_v27 = vsel %vm3835_vm2, %v4113_v38, %v4117_v40 }
0x244a   :  { %v3574_v59 = vpop.eup %3573 }
0x244b   :  { %v1876_v53 = vsub.f32 1.0, %v3574_v59  ;;  %v1882_v33 = vmul.f32 %v3574_v59, %v1781_v13 }
0x24a1   :  { %v1867_v43 = vpop.permute.xlu0 %1866 }
0x24a2   :  { %v1869_v28 = vmul.f32 %v3574_v59, %v1867_v43 }
0x24a4   :  { %1871 = vrot.lane.b32.xlu1 %v1869_v28, %s3714_s18 }
0x2516   :  { %v1872_v6 = vpop.permute.xlu1 %1871 }
0x2517   :  { %v1874_v29 = vadd.f32 %v1872_v6, %v1782_v61 }
0x2519   :  { %3575 = vtanh.f32 %v1874_v29 }
0x2523   :  { %v3576_v30 = vpop.eup %3575 }
0x2524   :  { %1878 = vrot.lane.b32.xlu0 %v3576_v30, %s3715_s19 }
0x2596   :  { %v1879_v57 = vpop.permute.xlu0 %1878 }
0x2597   :  { %v1881_v45 = vmul.f32 %v1879_v57, %v1876_v53 }
0x2599   :  { %v1883_v46 = vadd.f32 %v1882_v33, %v1881_v45  ;;  %v4275_v45 = vld [vmem:[#allocation2 + $0x180] sm:$0xff] }
0x259b   :  { %1886 = vrot.lane.b32.xlu1 %v1883_v46, %s3715_s19 }
0x260d   :  { %v4242_v47 = vpop.permute.xlu1 %1886 }
0x260e   :  { %3215 = vmatmul.mubr.msk.f32.vlgmr.msra.gmra.mrb[16].mxu0 %vm151_vm1, %v4242_v47  ;;  %v4273_v33 = vsel %vm96_vm3, %v4181_v11, %v4242_v47 }
0x260f   :  { %3260 = vmatprep.mubr.msk.f32.mxu0 %vm3711_vm0, %v3712_v4 }
0x26e1   :  { %v1956_v0 = vpop.f32.mrb[16].mxu0 }
0x26e2   :  { %v1957_v49 = vadd.f32 %v1956_v0, %v4029_v15  ;;  %v3216_v50 = vpop.f32.mrb[17].mxu0 }
0x26e4   :  { %1968 = vrot.lane.b32.xlu0 %v1957_v49, %s3714_s18  ;;  %v1960_v48 = vadd.f32 %v1957_v49, %v1884_v35 }
0x26e6   :  { %v2885_v51 = vmul.f32 -1.442695, %v1960_v48 }
0x26e8   :  { %3577 = vpow2.f32 %v2885_v51 }
0x26f2   :  { %v3578_v58 = vpop.eup %3577 }
0x26f3   :  { %v1964_v1 = vadd.f32 1.0, %v3578_v58 }
0x26f5   :  { %3579 = vrcp.f32 %v1964_v1 }
0x26ff   :  { %v3580_v7 = vpop.eup %3579 }
0x2700   :  { %v1978_v12 = vsub.f32 1.0, %v3580_v7  ;;  %v1984_v56 = vmul.f32 %v3580_v7, %v1883_v46  ;;  %v2110_v46 = vrot.slane %v4275_v45, %v2109_v54 }
0x2702   :  { %v2113_v0 = vmul.f32 %v2110_v46, %v4273_v33 }
0x2704   :  { %v2126_v49 = vsel %vm2119_vm4, %v2113_v0, 0.0 }
0x2756   :  { %v1969_v63 = vpop.permute.xlu0 %1968 }
0x2757   :  { %v1971_v2 = vmul.f32 %v3580_v7, %v1969_v63  ;;  %v4291_v63 = vsel %vm96_vm3, %v4223_v55, %v4204_v39 }
0x2759   :  { %1973 = vrot.lane.b32.xlu1 %v1971_v2, %s3714_s18 }
0x27cb   :  { %v1974_v8 = vpop.permute.xlu1 %1973 }
0x27cc   :  { %v1976_v9 = vadd.f32 %v1974_v8, %v1884_v35  ;;  %v2115_v8 = vmul.f32 %v2110_v46, %v4291_v63 }
0x27ce   :  { %3581 = vtanh.f32 %v1976_v9 }
0x27d8   :  { %v3582_v36 = vpop.eup %3581 }
0x27d9   :  { %1980 = vrot.lane.b32.xlu0 %v3582_v36, %s3715_s19  ;;  %v2132_v36 = vsel %vm2119_vm4, %v2115_v8, 0.0  ;;  %v2900_v8 = vld [vmem:[%s4562_s3 + $0x4] ss:$0 sm:$0xff] }
0x284b   :  { %v1981_v13 = vpop.permute.xlu0 %1980 }
0x284c   :  { %v1983_v21 = vmul.f32 %v1981_v13, %v1978_v12 }
0x284e   :  { %v1985_v23 = vadd.f32 %v1984_v56, %v1983_v21  ;;  %v2888_v56 = vld [vmem:[%s4561_s2] ss:$0 sm:$0xff] }
0x284f   :  { %v2198_v21 = vrot.slane %v2888_v56, %v3764_v10  ;;  %v2902_v56 = vld [vmem:[%s4562_s3 + $0x6] ss:$0 sm:$0xff] }
0x2850   :  { %1988 = vrot.lane.b32.xlu1 %v1985_v23, %s3715_s19 }
0x28c2   :  { %v1989_v61 = vpop.permute.xlu1 %1988 }
0x28c3   :  { %3226 = vmatmul.mubr.msk.f32.vlgmr.msra.gmra.mrb[16].mxu1 %vm151_vm1, %v1989_v61  ;;  %v4284_v1 = vsel %vm96_vm3, %v4149_v22, %v1989_v61  ;;  %v4298_v9 = vsel %vm96_vm3, %v1989_v61, %v4149_v22  ;;  %v2890_v22 = vld [vmem:[%s4561_s2 + $0x2] ss:$0 sm:$0xff]  ;;  %v2891_v61 = vld [vmem:[%s4561_s2 + $0x3] ss:$0 sm:$0xff] }
0x28c4   :  { %3295 = vmatprep.mubr.msk.f32.mxu1 %vm3711_vm0, %v3712_v4  ;;  %v2112_v7 = vmul.f32 %v2110_v46, %v4284_v1  ;;  %v2117_v12 = vmul.f32 %v2110_v46, %v4298_v9 }
0x28c6   :  { %v2123_v2 = vsel %vm2119_vm4, %v2112_v7, 0.0  ;;  %v2138_v13 = vsel %vm2119_vm4, %v2117_v12, 0.0 }
0x2996   :  { %v2058_v14 = vpop.f32.mrb[16].mxu1 }
0x2997   :  { %v2059_v25 = vadd.f32 %v2058_v14, %v4029_v15  ;;  %v3227_v26 = vpop.f32.mrb[17].mxu1  ;;  %v2219_v14 = vrot.slane %v2891_v61, %v3764_v10 }
0x2999   :  { %2070 = vrot.lane.b32.xlu0 %v2059_v25, %s3714_s18  ;;  %v2062_v59 = vadd.f32 %v2059_v25, %v1986_v27  ;;  %v2893_v25 = vld [vmem:[%s4561_s2 + $0x5] ss:$0 sm:$0xff] }
0x299a   :  { %v2233_v26 = vrot.slane %v2893_v25, %v3764_v10 }
0x299b   :  { %v2887_v43 = vmul.f32 -1.442695, %v2062_v59 }
0x299d   :  { %3583 = vpow2.f32 %v2887_v43 }
0x29a7   :  { %v3584_v28 = vpop.eup %3583 }
0x29a8   :  { %v2066_v6 = vadd.f32 1.0, %v3584_v28 }
0x29aa   :  { %3585 = vrcp.f32 %v2066_v6  ;;  %v4337_v6 = vsel %vm96_vm3, %v4204_v39, %v4223_v55 }
0x29b4   :  { %v3586_v29 = vpop.eup %3585 }
0x29b5   :  { %v2080_v50 = vsub.f32 1.0, %v3586_v29  ;;  %v2086_v48 = vmul.f32 %v3586_v29, %v1985_v23  ;;  %v2212_v23 = vrot.slane %v2890_v22, %v3764_v10 }
0x2a0b   :  { %v2071_v30 = vpop.permute.xlu0 %2070 }
0x2a0c   :  { %v2073_v4 = vmul.f32 %v3586_v29, %v2071_v30 }
0x2a0e   :  { %2075 = vrot.lane.b32.xlu1 %v2073_v4, %s3714_s18  ;;  %v2114_v4 = vmul.f32 %v2110_v46, %v4337_v6 }
0x2a80   :  { %v2076_v15 = vpop.permute.xlu1 %2075 }
0x2a81   :  { %v2078_v53 = vadd.f32 %v2076_v15, %v1986_v27  ;;  %v2895_v27 = vld [vmem:[%s4561_s2 + $0x7] ss:$0 sm:$0xff]  ;;  %v4346_v15 = vsel %vm96_vm3, %v4242_v47, %v4181_v11  ;;  %v2889_v11 = vld [vmem:[%s4561_s2 + $0x1] ss:$0 sm:$0xff] }
0x2a82   :  { %v2247_v59 = vrot.slane %v2895_v27, %v3764_v10  ;;  %v2205_v47 = vrot.slane %v2889_v11, %v3764_v10 }
0x2a83   :  { %3587 = vtanh.f32 %v2078_v53  ;;  %v2129_v53 = vsel %vm2119_vm4, %v2114_v4, 0.0 }
0x2a8d   :  { %v3588_v57 = vpop.eup %3587 }
0x2a8e   :  { %2082 = vrot.lane.b32.xlu0 %v3588_v57, %s3715_s19  ;;  %v2116_v57 = vmul.f32 %v2110_v46, %v4346_v15 }
0x2a90   :  { %v2135_v55 = vsel %vm2119_vm4, %v2116_v57, 0.0 }
0x2aad   :  { %2127 = vadd.xlane.f32.xlu0 %v2126_v49 }
0x2b00   :  { %v2083_v35 = vpop.permute.xlu0 %2082 }
0x2b01   :  { %v2085_v51 = vmul.f32 %v2083_v35, %v2080_v50  ;;  %v3716_v50 = vmov 0  }
0x2b02   :  { %3473 = vset.pattern.permute.xlu1 %v3716_v50  ;;  %3472 = vset.pattern.permute.xlu0 %v3716_v50 }
0x2b03   :  { %v2087_v58 = vadd.f32 %v2086_v48, %v2085_v51  ;;  %v2898_v51 = vld [vmem:[%s4562_s3 + $0x2] ss:$0 sm:$0xff] }
0x2b05   :  { %2090 = vrot.lane.b32.xlu1 %v2087_v58, %s3715_s19 }
0x2b29   :  { %2124 = vadd.xlane.f32.xlu1 %v2123_v2 }
0x2b2d   :  { %2133 = vadd.xlane.f32.xlu1 %v2132_v36 }
0x2b31   :  { %2139 = vadd.xlane.f32.xlu1 %v2138_v13 }
0x2b3a   :  { %v2128_v58 = vpop.xlane.xlu0 %2127 }
0x2b3b   :  { %v2514_v2 = vadd.f32 %v2898_v51, %v2128_v58 }
0x2b3d   :  { %3589 = vtanh.f32 %v2514_v2 }
0x2b42   :  { %2248 = vrot.lane.b32.xlu1 %v2198_v21, %s3715_s19 }
0x2b46   :  { %2252 = vrot.lane.b32.xlu1 %v2212_v23, %s3715_s19  ;;  %v2896_v23 = vld [vmem:[%s4562_s3] ss:$0 sm:$0xff] }
0x2b47   :  { %v3590_v25 = vpop.eup %3589 }
0x2b4a   :  { %2254 = vrot.lane.b32.xlu1 %v2219_v14, %s3715_s19 }
0x2b4e   :  { %2258 = vrot.lane.b32.xlu1 %v2233_v26, %s3715_s19  ;;  %v2899_v26 = vld [vmem:[%s4562_s3 + $0x3] ss:$0 sm:$0xff] }
0x2b52   :  { %2262 = vrot.lane.b32.xlu1 %v2247_v59, %s3715_s19 }
0x2b77   :  { %v2091_v43 = vpop.permute.xlu1 %2090 }
0x2b78   :  { %v4331_v28 = vsel %vm96_vm3, %v4126_v31, %v2091_v43  ;;  %v4353_v39 = vsel %vm96_vm3, %v2091_v43, %v4126_v31  ;;  %v2226_v31 = vrot.slane %v2892_v41, %v3764_v10 }
0x2b79   :  { %v2111_v29 = vmul.f32 %v2110_v46, %v4331_v28  ;;  %v2118_v54 = vmul.f32 %v2110_v46, %v4353_v39  ;;  %v2894_v46 = vld [vmem:[%s4561_s2 + $0x6] ss:$0 sm:$0xff] }
0x2b7a   :  { %v2240_v49 = vrot.slane %v2894_v46, %v3764_v10  ;;  %v2897_v10 = vld [vmem:[%s4562_s3 + $0x1] ss:$0 sm:$0xff] }
0x2b7b   :  { %v2120_v30 = vsel %vm2119_vm4, %v2111_v29, 0.0  ;;  %v2141_v0 = vsel %vm2119_vm4, %v2118_v54, 0.0  ;;  %v2532_v29 = vmul.f32 1.442695, %v3590_v25 }
0x2b7c   :  { %2121 = vadd.xlane.f32.xlu0 %v2120_v30 }
0x2b80   :  { %2130 = vadd.xlane.f32.xlu0 %v2129_v53  ;;  %v2901_v53 = vld [vmem:[%s4562_s3 + $0x5] ss:$0 sm:$0xff] }
0x2b84   :  { %2136 = vadd.xlane.f32.xlu0 %v2135_v55 }
0x2b88   :  { %2142 = vadd.xlane.f32.xlu0 %v2141_v0 }
0x2b9e   :  { %2250 = vrot.lane.b32.xlu0 %v2205_v47, %s3715_s19 }
0x2ba2   :  { %2256 = vrot.lane.b32.xlu0 %v2226_v31, %s3715_s19  ;;  %v2903_v31 = vld [vmem:[%s4562_s3 + $0x7] ss:$0 sm:$0xff]  ;;  %s3719_s3 = smov [#allocation5]  }
0x2ba6   :  { %2260 = vrot.lane.b32.xlu0 %v2240_v49, %s3715_s19 }
0x2bb6   :  { %v2125_v35 = vpop.xlane.xlu1 %2124 }
0x2bb7   :  { %v2513_v36 = vadd.f32 %v2897_v10, %v2125_v35 }
0x2bb9   :  { %3591 = vtanh.f32 %v2513_v36 }
0x2bba   :  { %v2134_v48 = vpop.xlane.xlu1 %2133 }
0x2bbb   :  { %v2516_v13 = vadd.f32 %v2900_v8, %v2134_v48 }
0x2bbd   :  { %3593 = vtanh.f32 %v2516_v13 }
0x2bbe   :  { %v2140_v7 = vpop.xlane.xlu1 %2139 }
0x2bbf   :  { %v2518_v21 = vadd.f32 %v2902_v56, %v2140_v7 }
0x2bc1   :  { %3595 = vtanh.f32 %v2518_v21 }
0x2bc2   :  { %v2249_v12 = vpop.permute.xlu1 %2248 }
0x2bc3   :  { %v3592_v43 = vpop.eup %3591  ;;  %v2272_v4 = vadd.f32 %v2249_v12, %v4117_v40 }
0x2bc4   :  { %v2530_v55 = vmul.f32 1.442695, %v3592_v43 }
0x2bc6   :  { %v2253_v22 = vpop.permute.xlu1 %2252 }
0x2bc7   :  { %v3594_v57 = vpop.eup %3593  ;;  %v2274_v0 = vadd.f32 %v2253_v22, %v4168_v42 }
0x2bc8   :  { %v2536_v41 = vmul.f32 1.442695, %v3594_v57 }
0x2bca   :  { %v2255_v27 = vpop.permute.xlu1 %2254 }
0x2bcb   :  { %v3596_v40 = vpop.eup %3595  ;;  %v2275_v35 = vadd.f32 %v2255_v27, %v4195_v16 }
0x2bcc   :  { %v2540_v51 = vmul.f32 1.442695, %v3596_v40 }
0x2bce   :  { %v2259_v11 = vpop.permute.xlu1 %2258 }
0x2bcf   :  { %v2277_v10 = vadd.f32 %v2259_v11, %v4172_v44 }
0x2bd2   :  { %v2263_v58 = vpop.permute.xlu1 %2262 }
0x2bd3   :  { %v2279_v36 = vadd.f32 %v2263_v58, %v4113_v38 }
0x2c09   :  { %v2122_v61 = vpop.xlane.xlu0 %2121 }
0x2c0a   :  { %v2512_v14 = vadd.f32 %v2896_v23, %v2122_v61 }
0x2c0c   :  { %3597 = vtanh.f32 %v2512_v14 }
0x2c0d   :  { %v2131_v59 = vpop.xlane.xlu0 %2130 }
0x2c0e   :  { %v2515_v30 = vadd.f32 %v2899_v26, %v2131_v59 }
0x2c10   :  { %3599 = vtanh.f32 %v2515_v30 }
0x2c11   :  { %v2137_v54 = vpop.xlane.xlu0 %2136  ;;  %3601 = vpow2.f32 %v2532_v29 }
0x2c12   :  { %v2517_v47 = vadd.f32 %v2901_v53, %v2137_v54  ;;  %3603 = vtanh.f32 %v2272_v4 }
0x2c14   :  { %3605 = vtanh.f32 %v2517_v47 }
0x2c15   :  { %3607 = vpow2.f32 %v2530_v55  ;;  %v2143_v46 = vpop.xlane.xlu0 %2142 }
0x2c16   :  { %v3598_v49 = vpop.eup %3597  ;;  %3609 = vtanh.f32 %v2274_v0  ;;  %v2519_v48 = vadd.f32 %v2903_v31, %v2143_v46 }
0x2c17   :  { %3611 = vpow2.f32 %v2536_v41  ;;  %v2528_v42 = vmul.f32 1.442695, %v3598_v49 }
0x2c18   :  { %3613 = vtanh.f32 %v2519_v48 }
0x2c19   :  { %3615 = vpow2.f32 %v2528_v42  ;;  %v2251_v7 = vpop.permute.xlu0 %2250 }
0x2c1a   :  { %v3600_v2 = vpop.eup %3599  ;;  %3617 = vtanh.f32 %v2275_v35  ;;  %v2273_v8 = vadd.f32 %v2251_v7, %v4140_v60 }
0x2c1b   :  { %3619 = vpow2.f32 %v2540_v51  ;;  %v2534_v12 = vmul.f32 1.442695, %v3600_v2  ;;  %v4405_v13 = vpop.eup %3601 }
0x2c1c   :  { %3621 = vtanh.f32 %v2273_v8  ;;  %v3604_v16 = vpop.eup %3603 }
0x2c1d   :  { %3623 = vpow2.f32 %v2534_v12  ;;  %v2257_v56 = vpop.permute.xlu0 %2256  ;;  %v2288_v27 = vmul.f32 1.442695, %v3604_v16 }
0x2c1e   :  { %v3606_v21 = vpop.eup %3605  ;;  %3625 = vtanh.f32 %v2277_v10  ;;  %v2276_v22 = vadd.f32 %v2257_v56, %v4163_v34 }
0x2c1f   :  { %v4408_v23 = vpop.eup %3607  ;;  %3627 = vtanh.f32 %v2279_v36  ;;  %v2538_v44 = vmul.f32 1.442695, %v3606_v21 }
0x2c20   :  { %v3610_v61 = vpop.eup %3609  ;;  %3629 = vtanh.f32 %v2276_v22  ;;  %v2546_v34 = vsel %vm2544_vm5, %v4408_v23, 0.0 }
0x2c21   :  { %v4410_v60 = vpop.eup %3611  ;;  %3631 = vpow2.f32 %v2538_v44  ;;  %v2261_v38 = vpop.permute.xlu0 %2260  ;;  %v2292_v29 = vmul.f32 1.442695, %v3610_v61 }
0x2c22   :  { %v3614_v14 = vpop.eup %3613  ;;  %v2278_v25 = vadd.f32 %v2261_v38, %v4109_v37  ;;  %v2548_v37 = vsel %vm2544_vm5, %v4405_v13, 0.0  ;;  %v2552_v49 = vsel %vm2544_vm5, %v4410_v60, 0.0 }
0x2c23   :  { %v4413_v26 = vpop.eup %3615  ;;  %v2542_v59 = vmul.f32 1.442695, %v3614_v14 }
0x2c24   :  { %v3618_v43 = vpop.eup %3617  ;;  %v2545_v30 = vsel %vm2544_vm5, %v4413_v26, 0.0  ;;  %3633 = vtanh.f32 %v2278_v25 }
0x2c25   :  { %v4419_v4 = vpop.eup %3619  ;;  %v2547_v53 = vadd.f32 %v2546_v34, %v2545_v30  ;;  %3635 = vpow2.f32 %v2542_v59  ;;  %v2294_v54 = vmul.f32 1.442695, %v3618_v43 }
0x2c26   :  { %v3622_v57 = vpop.eup %3621  ;;  %3637 = vpow2.f32 %v2288_v27  ;;  %v2556_v10 = vsel %vm2544_vm5, %v4419_v4, 0.0 }
0x2c27   :  { %v3624_v55 = vpop.eup %3623  ;;  %v2549_v0 = vadd.f32 %v2548_v37, %v2547_v53  ;;  %v2290_v11 = vmul.f32 1.442695, %v3622_v57  ;;  %3639 = vpow2.f32 %v2292_v29 }
0x2c28   :  { %v3626_v47 = vpop.eup %3625  ;;  %v2550_v41 = vsel %vm2544_vm5, %v3624_v55, 0.0 }
0x2c29   :  { %v3628_v31 = vpop.eup %3627  ;;  %v2551_v40 = vadd.f32 %v2550_v41, %v2549_v0  ;;  %3641 = vpow2.f32 %v2290_v11  ;;  %v2298_v48 = vmul.f32 1.442695, %v3626_v47 }
0x2c2a   :  { %v3630_v46 = vpop.eup %3629  ;;  %3643 = vpow2.f32 %v2294_v54  ;;  %v2302_v8 = vmul.f32 1.442695, %v3628_v31 }
0x2c2b   :  { %v3632_v35 = vpop.eup %3631  ;;  %v2553_v51 = vadd.f32 %v2552_v49, %v2551_v40  ;;  %v2296_v42 = vmul.f32 1.442695, %v3630_v46 }
0x2c2c   :  { %v2554_v58 = vsel %vm2544_vm5, %v3632_v35, 0.0 }
0x2c2d   :  { %v2555_v7 = vadd.f32 %v2554_v58, %v2553_v51  ;;  %3645 = vpow2.f32 %v2296_v42 }
0x2c2e   :  { %v3634_v2 = vpop.eup %3633  ;;  %3647 = vpow2.f32 %v2298_v48 }
0x2c2f   :  { %v3636_v36 = vpop.eup %3635  ;;  %v2557_v12 = vadd.f32 %v2556_v10, %v2555_v7  ;;  %v2300_v16 = vmul.f32 1.442695, %v3634_v2  ;;  %v2640_v10 = vsel %vm2119_vm4, %v4331_v28, 0.0 }
0x2c30   :  { %v2558_v56 = vsel %vm2544_vm5, %v3636_v36, 0.0  ;;  %v3638_v21 = vpop.eup %3637 }
0x2c31   :  { %v2559_v22 = vadd.f32 %v2558_v56, %v2557_v12  ;;  %3649 = vpow2.f32 %v2300_v16  ;;  %v4430_v44 = vpop.eup %3639  ;;  %v2305_v38 = vsel %vm2304_vm6, %v3638_v21, 0.0  ;;  %v2641_v16 = vsel %vm2119_vm4, %v4284_v1, 0.0 }
0x2c32   :  { %3651 = vpow2.f32 %v2302_v8  ;;  %v2308_v59 = vsel %vm2304_vm6, %v4430_v44, 0.0  ;;  %v2642_v56 = vadd.f32 %v2641_v16, %v2640_v10  ;;  %v51_v16 = vld [vmem:[#allocation2 + $0x98] sm:$0xff] }
0x2c33   :  { %v3642_v61 = vpop.eup %3641  ;;  %3653 = vrcp.f32 %v2559_v22 }
0x2c34   :  { %v2306_v14 = vsel %vm2304_vm6, %v3642_v61, 0.0  ;;  %v4434_v25 = vpop.eup %3643 }
0x2c35   :  { %v2307_v27 = vadd.f32 %v2306_v14, %v2305_v38  ;;  %v2310_v29 = vsel %vm2304_vm6, %v4434_v25, 0.0  ;;  %v2643_v14 = vsel %vm2119_vm4, %v4273_v33, 0.0 }
0x2c37   :  { %v3646_v43 = vpop.eup %3645  ;;  %v2309_v34 = vadd.f32 %v2308_v59, %v2307_v27  ;;  %v2644_v27 = vadd.f32 %v2643_v14, %v2642_v56  ;;  %v56_v14 = vld [vmem:[#allocation2 + $0xc0] sm:$0xff] }
0x2c38   :  { %v4440_v30 = vpop.eup %3647  ;;  %v2312_v57 = vsel %vm2304_vm6, %v3646_v43, 0.0 }
0x2c39   :  { %v2311_v53 = vadd.f32 %v2310_v29, %v2309_v34  ;;  %v2314_v11 = vsel %vm2304_vm6, %v4440_v30, 0.0 }
0x2c3b   :  { %v3650_v37 = vpop.eup %3649  ;;  %v2313_v54 = vadd.f32 %v2312_v57, %v2311_v53  ;;  %v2645_v53 = vsel %vm2119_vm4, %v4337_v6, 0.0 }
0x2c3c   :  { %v4443_v0 = vpop.eup %3651  ;;  %v2316_v31 = vsel %vm2304_vm6, %v3650_v37, 0.0  ;;  %v2646_v57 = vadd.f32 %v2645_v53, %v2644_v27  ;;  %v57_v27 = vld [vmem:[#allocation2 + $0xc8] sm:$0xff] }
0x2c3d   :  { %v3654_v47 = vpop.eup %3653  ;;  %v2315_v41 = vadd.f32 %v2314_v11, %v2313_v54  ;;  %v2318_v49 = vsel %vm2304_vm6, %v4443_v0, 0.0  ;;  %v61_v53 = vld [vmem:[#allocation2 + $0xe8] sm:$0xff] }
0x2c3e   :  { %v2562_v40 = vmul.f32 %v3654_v47, %v4408_v23  ;;  %v2561_v46 = vmul.f32 %v3654_v47, %v4413_v26  ;;  %v2563_v58 = vmul.f32 %v3654_v47, %v4405_v13  ;;  %v2564_v7 = vmul.f32 %v3654_v47, %v3624_v55 }
0x2c3f   :  { %v2317_v48 = vadd.f32 %v2316_v31, %v2315_v41  ;;  %v2565_v26 = vmul.f32 %v3654_v47, %v4410_v60  ;;  %v2566_v12 = vmul.f32 %v3654_v47, %v3632_v35  ;;  %v2567_v22 = vmul.f32 %v3654_v47, %v4419_v4 }
0x2c40   :  { %v2570_v51 = vadd.f32 1e-10, %v2562_v40  ;;  %v2569_v42 = vadd.f32 1e-10, %v2561_v46  ;;  %v2571_v8 = vadd.f32 1e-10, %v2563_v58  ;;  %v2568_v38 = vmul.f32 %v3654_v47, %v3636_v36 }
0x2c41   :  { %v2319_v2 = vadd.f32 %v2318_v49, %v2317_v48  ;;  %v2572_v23 = vadd.f32 1e-10, %v2564_v7  ;;  %v2573_v13 = vadd.f32 1e-10, %v2565_v26  ;;  %v2574_v55 = vadd.f32 1e-10, %v2566_v12 }
0x2c42   :  { %2584 = vperm.xlu1 %3473, %v2570_v51   ;;  %2579 = vperm.xlu0 %3472, %v2569_v42   ;;  %v2575_v59 = vadd.f32 1e-10, %v2567_v22  ;;  %v2576_v60 = vadd.f32 1e-10, %v2568_v38  ;;  %v3717_v47 = vmov 96   ;;  %v2647_v41 = vsel %vm2119_vm4, %v4291_v63, 0.0 }
0x2c43   :  { %3655 = vrcp.f32 %v2319_v2  ;;  %v2648_v31 = vadd.f32 %v2647_v41, %v2646_v57  ;;  %v2651_v42 = vsel %vm2119_vm4, %v4298_v9, 0.0  ;;  %v50_v26 = vld [vmem:[#allocation2 + $0x90] sm:$0xff]  ;;  %v55_v22 = vld [vmem:[#allocation2 + $0xb8] sm:$0xff] }
0x2c44   :  { %v3414_v56 = vpack.c.bf16 %v51_v16, %v50_v26  ;;  %v2661_v26 = vsel %vm2119_vm4, %v4291_v63, -inf  ;;  %v2665_v16 = vsel %vm2119_vm4, %v4298_v9, -inf }
0x2c46   :  { %2589 = vperm.xlu1 %3473, %v2571_v8   ;;  %2594 = vperm.xlu0 %3472, %v2572_v23   ;;  %v49_v23 = vld [vmem:[#allocation2 + $0x88] sm:$0xff] }
0x2c4a   :  { %2599 = vperm.xlu1 %3473, %v2573_v13   ;;  %2604 = vperm.xlu0 %3472, %v2574_v55   ;;  %v54_v55 = vld [vmem:[#allocation2 + $0xb0] sm:$0xff] }
0x2c4b   :  { %v3420_v38 = vpack.c.bf16 %v55_v22, %v54_v55 }
0x2c4d   :  { %v3656_v35 = vpop.eup %3655 }
0x2c4e   :  { %2609 = vperm.xlu1 %3473, %v2575_v59   ;;  %2614 = vperm.xlu0 %3472, %v2576_v60   ;;  %v2322_v34 = vmul.f32 %v3656_v35, %v3642_v61  ;;  %v2321_v29 = vmul.f32 %v3656_v35, %v3638_v21  ;;  %v2325_v36 = vmul.f32 %v3656_v35, %v3646_v43  ;;  %v2649_v43 = vsel %vm2119_vm4, %v4346_v15, 0.0  ;;  %v58_v60 = vld [vmem:[#allocation2 + $0xd0] sm:$0xff] }
0x2c4f   :  { %v2323_v11 = vmul.f32 %v3656_v35, %v4430_v44  ;;  %v2327_v40 = vmul.f32 %v3656_v35, %v3650_v37  ;;  %v2324_v46 = vmul.f32 %v3656_v35, %v4434_v25  ;;  %v2650_v44 = vadd.f32 %v2649_v43, %v2648_v31 }
0x2c50   :  { %v2330_v54 = vadd.f32 1e-10, %v2322_v34  ;;  %v2329_v4 = vadd.f32 1e-10, %v2321_v29  ;;  %v2333_v61 = vadd.f32 1e-10, %v2325_v36  ;;  %v2326_v51 = vmul.f32 %v3656_v35, %v4440_v30 }
0x2c51   :  { %v2331_v21 = vadd.f32 1e-10, %v2323_v11  ;;  %v2335_v49 = vadd.f32 1e-10, %v2327_v40  ;;  %v2332_v48 = vadd.f32 1e-10, %v2324_v46  ;;  %v2652_v58 = vadd.f32 %v2651_v42, %v2650_v44 }
0x2c52   :  { %3474 = vset.pattern.permute.xlu1 %v3717_v47  ;;  %3475 = vset.pattern.permute.xlu0 %v3717_v47  ;;  %v2334_v7 = vadd.f32 1e-10, %v2326_v51  ;;  %v2328_v37 = vmul.f32 %v3656_v35, %v4443_v0  ;;  %v2653_v25 = vsel %vm2119_vm4, %v4353_v39, 0.0  ;;  %v48_v30 = vld [vmem:[#allocation2 + $0x80] sm:$0xff]  ;;  %v3423_v59 = vpack.c.bf16 %v57_v27, %v56_v14  ;;  %v59_v35 = vld [vmem:[#allocation2 + $0xd8] sm:$0xff]  ;;  %v62_v44 = vld [vmem:[#allocation2 + $0xf0] sm:$0xff] }
0x2c53   :  { %2351 = vperm.xlu0 %3475, %v2330_v54   ;;  %2339 = vperm.xlu1 %3474, %v2329_v4   ;;  %v2654_v2 = vadd.f32 %v2653_v25, %v2652_v58  ;;  %v3411_v12 = vpack.c.bf16 %v49_v23, %v48_v30  ;;  %v52_v0 = vld [vmem:[#allocation2 + $0xa0] sm:$0xff]  ;;  %v3426_v34 = vpack.c.bf16 %v59_v35, %v58_v60  ;;  %v2667_v30 = vsel %vm2119_vm4, %v4353_v39, -inf }
0x2c54   :  { %v2336_v10 = vadd.f32 1e-10, %v2328_v37  ;;  %v60_v29 = vld [vmem:[#allocation2 + $0xe0] sm:$0xff]  ;;  %v2659_v60 = vsel %vm2119_vm4, %v4273_v33, -inf  ;;  %v2663_v35 = vsel %vm2119_vm4, %v4346_v15, -inf }
0x2c55   :  { %v2656_v8 = vmul.f32 0.125, %v2654_v2  ;;  %3412 = vmatpush3.bf16.msra.mxu0 %v3411_v12  ;;  %v3429_v57 = vpack.c.bf16 %v61_v53, %v60_v29  ;;  %v2658_v12 = vsel %vm2119_vm4, %v4284_v1, -inf }
0x2c56   :  { %3413 = vmatprep.subr.bf16.mxu0 %v3710_v3 }
0x2c57   :  { %2387 = vperm.xlu0 %3475, %v2333_v61   ;;  %2363 = vperm.xlu1 %3474, %v2331_v21  }
0x2c59   :  { %3415 = vmatpush3.bf16.msra.mxu0 %v3414_v56 }
0x2c5a   :  { %3416 = vmatprep.subr.bf16.mxu0 %v3710_v3 }
0x2c5b   :  { %2411 = vperm.xlu0 %3475, %v2335_v49   ;;  %2375 = vperm.xlu1 %3474, %v2332_v48   ;;  %v63_v49 = vld [vmem:[#allocation2 + $0xf8] sm:$0xff] }
0x2c5c   :  { %v3432_v58 = vpack.c.bf16 %v63_v49, %v62_v44  ;;  %v75_v44 = vld [vmem:[#allocation2 + $0x158] sm:$0xff] }
0x2c5f   :  { %2399 = vperm.xlu1 %3474, %v2334_v7   ;;  %3476 = vset.pattern.permute.xlu0 %v3716_v50  ;;  %v53_v50 = vld [vmem:[#allocation2 + $0xa8] sm:$0xff] }
0x2c60   :  { %v3417_v13 = vpack.c.bf16 %v53_v50, %v52_v0  ;;  %v64_v50 = vld [vmem:[#allocation2 + $0x100] sm:$0xff] }
0x2c62   :  { %3418 = vmatpush3.bf16.msra.mxu0 %v3417_v13  ;;  %v65_v13 = vld [vmem:[#allocation2 + $0x108] sm:$0xff] }
0x2c63   :  { %2423 = vperm.xlu1 %3474, %v2336_v10   ;;  %3419 = vmatprep.subr.bf16.mxu0 %v3710_v3  ;;  %v2660_v10 = vsel %vm2119_vm4, %v4337_v6, -inf  ;;  %v3435_v14 = vpack.c.bf16 %v65_v13, %v64_v50 }
0x2c65   :  { %3436 = vmatpush3.bf16.msra.mxu1 %v3435_v14 }
0x2c66   :  { %3421 = vmatpush3.bf16.msra.mxu0 %v3420_v38  ;;  %3437 = vmatprep.subr.bf16.mxu1 %v3710_v3 }
0x2c67   :  { %2677 = vrot.lane.b32.xlu1 %v2656_v8, %s3714_s18  ;;  %3422 = vmatprep.subr.bf16.mxu0 %v3710_v3  ;;  %v2657_v8 = vsel %vm2119_vm4, %v4331_v28, -inf }
0x2c68   :  { %v2662_v27 = vmax.f32 %v2657_v8, %v2661_v26 }
0x2c6a   :  { %3424 = vmatpush3.bf16.msra.mxu0 %v3423_v59  ;;  %v2668_v59 = vmax.f32 %v2660_v10, %v2667_v30 }
0x2c6b   :  { %3425 = vmatprep.subr.bf16.mxu0 %v3710_v3 }
0x2c6e   :  { %3427 = vmatpush3.bf16.msra.mxu0 %v3426_v34 }
0x2c6f   :  { %3428 = vmatprep.subr.bf16.mxu0 %v3710_v3 }
0x2c72   :  { %3430 = vmatpush3.bf16.msra.mxu0 %v3429_v57  ;;  %v2664_v57 = vmax.f32 %v2658_v12, %v2663_v35 }
0x2c73   :  { %3431 = vmatprep.subr.bf16.mxu0 %v3710_v3 }
0x2c76   :  { %3433 = vmatpush3.bf16.msra.mxu0 %v3432_v58  ;;  %v3718_v58 = vmov 269488144  }
0x2cc1   :  { %v2580_v54 = vpop.permute.xlu0 %2579  ;;  %v2585_v4 = vpop.permute.xlu1 %2584 }
0x2cc2   :  { %v2617_v36 = vmul.f32 %v2580_v54, %v4331_v28  ;;  %v2618_v11 = vmul.f32 %v2585_v4, %v4284_v1  ;;  %v66_v28 = vld [vmem:[#allocation2 + $0x110] sm:$0xff]  ;;  %v69_v54 = vld [vmem:[#allocation2 + $0x128] sm:$0xff] }
0x2cc4   :  { %v2625_v47 = vsel %vm2119_vm4, %v2617_v36, 0.0  ;;  %v2626_v41 = vsel %vm2119_vm4, %v2618_v11, 0.0  ;;  %v2669_v11 = vmax.f32 %v2662_v27, %v2664_v57 }
0x2cc5   :  { %v2595_v31 = vpop.permute.xlu0 %2594  ;;  %v2590_v61 = vpop.permute.xlu1 %2589  ;;  %v2627_v46 = vadd.f32 %v2626_v41, %v2625_v47  ;;  %v71_v41 = vld [vmem:[#allocation2 + $0x138] sm:$0xff] }
0x2cc6   :  { %v2620_v21 = vmul.f32 %v2595_v31, %v4337_v6  ;;  %v2619_v40 = vmul.f32 %v2590_v61, %v4273_v33 }
0x2cc8   :  { %v2628_v43 = vsel %vm2119_vm4, %v2619_v40, 0.0  ;;  %v2630_v7 = vsel %vm2119_vm4, %v2620_v21, 0.0  ;;  %v72_v21 = vld [vmem:[#allocation2 + $0x140] sm:$0xff]  ;;  %v73_v40 = vld [vmem:[#allocation2 + $0x148] sm:$0xff] }
0x2cc9   :  { %v2629_v48 = vadd.f32 %v2628_v43, %v2627_v46  ;;  %v2605_v51 = vpop.permute.xlu0 %2604  ;;  %v2600_v42 = vpop.permute.xlu1 %2599  ;;  %v3447_v46 = vpack.c.bf16 %v73_v40, %v72_v21  ;;  %v74_v43 = vld [vmem:[#allocation2 + $0x150] sm:$0xff] }
0x2cca   :  { %v2622_v37 = vmul.f32 %v2605_v51, %v4346_v15  ;;  %v2621_v25 = vmul.f32 %v2600_v42, %v4291_v63  ;;  %v67_v63 = vld [vmem:[#allocation2 + $0x118] sm:$0xff]  ;;  %v70_v15 = vld [vmem:[#allocation2 + $0x130] sm:$0xff]  ;;  %v3450_v49 = vpack.c.bf16 %v75_v44, %v74_v43  ;;  %v77_v51 = vld [vmem:[#allocation2 + $0x168] sm:$0xff] }
0x2ccb   :  { %v2631_v2 = vadd.f32 %v2630_v7, %v2629_v48  ;;  %v3438_v29 = vpack.c.bf16 %v67_v63, %v66_v28  ;;  %v3444_v61 = vpack.c.bf16 %v71_v41, %v70_v15  ;;  %v76_v48 = vld [vmem:[#allocation2 + $0x160] sm:$0xff]  ;;  %v2343_v7 = vunpack.c.l.s4 %v3718_v58 }
0x2ccc   :  { %v2632_v23 = vsel %vm2119_vm4, %v2621_v25, 0.0  ;;  %v2634_v55 = vsel %vm2119_vm4, %v2622_v37, 0.0  ;;  %v3453_v42 = vpack.c.bf16 %v77_v51, %v76_v48 }
0x2ccd   :  { %v2633_v56 = vadd.f32 %v2632_v23, %v2631_v2  ;;  %v2615_v0 = vpop.permute.xlu0 %2614  ;;  %v2610_v6 = vpop.permute.xlu1 %2609  ;;  %3439 = vmatpush3.bf16.msra.mxu1 %v3438_v29  ;;  %v2344_v25 = vunpack.c.0.s8 %v2343_v7 }
0x2cce   :  { %v2624_v22 = vmul.f32 %v2615_v0, %v4353_v39  ;;  %v2623_v38 = vmul.f32 %v2610_v6, %v4298_v9  ;;  %v2666_v39 = vmax.f32 %v2659_v60, %v2665_v16  ;;  %v68_v9 = vld [vmem:[#allocation2 + $0x120] sm:$0xff]  ;;  %3440 = vmatprep.subr.bf16.mxu1 %v3710_v3 }
0x2ccf   :  { %v2635_v1 = vadd.f32 %v2634_v55, %v2633_v56  ;;  %v3441_v33 = vpack.c.bf16 %v69_v54, %v68_v9  ;;  %v2347_v10 = vsub.s32 %v2344_v25, %v3761_v5 }
0x2cd0   :  { %v2636_v34 = vsel %vm2119_vm4, %v2623_v38, 0.0  ;;  %v2638_v4 = vsel %vm2119_vm4, %v2624_v22, 0.0  ;;  %v2670_v47 = vmax.f32 %v2666_v39, %v2668_v59 }
0x2cd1   :  { %v2637_v53 = vadd.f32 %v2636_v34, %v2635_v1  ;;  %3442 = vmatpush3.bf16.msra.mxu1 %v3441_v33 }
0x2cd2   :  { %v2671_v31 = vmax.f32 %v2669_v11, %v2670_v47  ;;  %3443 = vmatprep.subr.bf16.mxu1 %v3710_v3  ;;  %v2340_v37 = vpop.permute.xlu1 %2339  ;;  %v2352_v8 = vpop.permute.xlu0 %2351 }
0x2cd3   :  { %v2639_v36 = vadd.f32 %v2638_v4, %v2637_v53  ;;  %v2360_v30 = vrot.slane %v2352_v8, %v2347_v10  ;;  %v2348_v23 = vrot.slane %v2340_v37, %v2347_v10 }
0x2cd5   :  { %2673 = vrot.lane.b32.xlu0 %v2639_v36, %s3713_s0  ;;  %3445 = vmatpush3.bf16.msra.mxu1 %v3444_v61  ;;  %v2434_v16 = vmul.f32 %v2360_v30, %v4066_v17  ;;  %v2433_v56 = vmul.f32 %v2348_v23, %v4077_v32  ;;  %s2845_s0 = sshll.u32 %s3719_s3, 4  ;;  %s2846_s0 = int_to_ptr.vmem [resolvable:$true] %s2845_s0 }
0x2cd6   :  { %3446 = vmatprep.subr.bf16.mxu1 %v3710_v3  ;;  %v2364_v2 = vpop.permute.xlu1 %2363  ;;  %s3680_s18 = scalar_lea.vmem %s2846_s0, 32  ;;  %p3685_p9 = scmp.lt.s32.totalorder %s2846_s0, %s2846_s0 }
0x2cd7   :  { %v2372_v12 = vrot.slane %v2364_v2, %v2347_v10  ;;  %v2442_v50 = vsel %vm2119_vm4, %v2434_v16, 0.0  ;;  %v2441_v13 = vsel %vm2119_vm4, %v2433_v56, 0.0  ;;  %p3681_p8 = scmp.ne.s32.totalorder %s2846_s0, %s3680_s18  ;;  %p3686_p10 = scmp.lt.s32.totalorder %s3680_s18, %s3680_s18 }
0x2cd8   :  { %v2443_v14 = vadd.f32 %v2442_v50, %v2441_v13 }
0x2cd9   :  { %2681 = vrot.lane.b32.xlu0 %v2671_v31, %s3715_s19  ;;  %3448 = vmatpush3.bf16.msra.mxu1 %v3447_v46  ;;  %v2435_v6 = vmul.f32 %v2372_v12, %v4038_v62  ;;  %v79_v31 = vld [vmem:[#allocation2 + $0x178] sm:$0xff]  ;;  %p3687_p11 = por %p3686_p10, %p3685_p9 }
0x2cda   :  { %3449 = vmatprep.subr.bf16.mxu1 %v3710_v3  ;;  %v2376_v26 = vpop.permute.xlu1 %2375 }
0x2cdb   :  { %v2384_v0 = vrot.slane %v2376_v26, %v2347_v10  ;;  %v2444_v38 = vsel %vm2119_vm4, %v2435_v6, 0.0  ;;  %p3688_p12 = pnand %p3687_p11, %p3681_p8 }
0x2cdc   :  { %v2445_v27 = vadd.f32 %v2444_v38, %v2443_v14 }
0x2cdd   :  { %3451 = vmatpush3.bf16.msra.mxu1 %v3450_v49  ;;  %v2436_v28 = vmul.f32 %v2384_v0, %v4050_v19  ;;  %v2766_v49 = vsub.s32 5, %v3761_v5 }
0x2cde   :  { %3452 = vmatprep.subr.bf16.mxu1 %v3710_v3  ;;  %v2400_v55 = vpop.permute.xlu1 %2399 }
0x2cdf   :  { %v2446_v63 = vsel %vm2119_vm4, %v2436_v28, 0.0  ;;  %v2408_v17 = vrot.slane %v2400_v55, %v2347_v10  ;;  %v2767_v48 = vrot.slane %v4275_v45, %v2766_v49 }
0x2ce0   :  { %v2447_v62 = vadd.f32 %v2446_v63, %v2445_v27 }
0x2ce1   :  { %3454 = vmatpush3.bf16.msra.mxu1 %v3453_v42  ;;  %v2438_v1 = vmul.f32 %v2408_v17, %v4044_v18 }
0x2ce2   :  { %3455 = vmatprep.subr.bf16.mxu1 %v3710_v3  ;;  %v2388_v3 = vpop.permute.xlu0 %2387  ;;  %v2424_v60 = vpop.permute.xlu1 %2423 }
0x2ce3   :  { %v2396_v22 = vrot.slane %v2388_v3, %v2347_v10  ;;  %v2450_v29 = vsel %vm2119_vm4, %v2438_v1, 0.0  ;;  %v2432_v53 = vrot.slane %v2424_v60, %v2347_v10 }
0x2ce5   :  { %v2437_v32 = vmul.f32 %v2396_v22, %v4056_v20  ;;  %v2440_v9 = vmul.f32 %v2432_v53, %v4082_v52  ;;  %v2691_v52 = vsub.s32 4, %v3761_v5 }
0x2ce6   :  { %v2412_v59 = vpop.permute.xlu0 %2411  ;;  %v2678_v47 = vpop.permute.xlu1 %2677 }
0x2ce7   :  { %v2448_v35 = vsel %vm2119_vm4, %v2437_v32, 0.0  ;;  %v2420_v34 = vrot.slane %v2412_v59, %v2347_v10  ;;  %v2454_v4 = vsel %vm2119_vm4, %v2440_v9, 0.0  ;;  %v2692_v21 = vrot.slane %v4275_v45, %v2691_v52 }
0x2ce8   :  { %v2449_v19 = vadd.f32 %v2448_v35, %v2447_v62 }
0x2ce9   :  { %v2439_v57 = vmul.f32 %v2420_v34, %v4072_v24  ;;  %v78_v24 = vld [vmem:[#allocation2 + $0x170] sm:$0xff] }
0x2cea   :  { %v2451_v39 = vadd.f32 %v2450_v29, %v2449_v19  ;;  %v3456_v61 = vpack.c.bf16 %v79_v31, %v78_v24 }
0x2ceb   :  { %v2452_v54 = vsel %vm2119_vm4, %v2439_v57, 0.0 }
0x2cec   :  { %v2453_v20 = vadd.f32 %v2452_v54, %v2451_v39  ;;  %3457 = vmatpush3.bf16.msra.mxu1 %v3456_v61 }
0x2cee   :  { %v2455_v36 = vadd.f32 %v2454_v4, %v2453_v20 }
0x2d47   :  { %v2674_v18 = vpop.permute.xlu0 %2673 }
0x2d48   :  { %v2684_v11 = vsel %vm151_vm1, %v2455_v36, %v2674_v18 }
0x2d49   :  { %v2686_v15 = vsel %vm2685_vm7, %v2684_v11, %v2678_v47 }
0x2d4b   :  { %v2682_v33 = vpop.permute.xlu0 %2681 }
0x2d4c   :  { %v2688_v41 = vsel %vm2687_vm8, %v2686_v15, %v2682_v33 }
0x2d4d   :  { %3261 = vmatmul.mubr.f32.vlgmr.msra.gmra.mrb[18].mxu0 %v2688_v41 }
0x2e20   :  { %v2759_v40 = vpop.f32.mrb[18].mxu0 }
0x2e21   :  { %v2760_v46 = vadd.f32 %v2759_v40, %v2692_v21  ;;  %v3262_v43 = vpop.f32.mrb[19].mxu0 }
0x2e23   :  { %v2763_v44 = vmax.f32 %v2760_v46, 0.0 }
0x2e25   :  { %3296 = vmatmul.mubr.f32.vlgmr.msra.gmra.mrb[18].mxu1 %v2763_v44 }
0x2ef8   :  { %v2834_v51 = vpop.f32.mrb[18].mxu1 }
0x2ef9   :  { %v2835_v42 = vadd.f32 %v2834_v51, %v2767_v48  ;;  %v3297_v58 = vpop.f32.mrb[19].mxu1 }
0x2efb   :  { %2838 = vst [vmem:[#allocation5] sm:$0x3] %v2835_v42 }
0x2efc   :  { %3691 = shalt.err (!%p3688_p12)
}
0x2efd   :  { %s3692_s27 = scalar_lea.hbm %s4563_s4, 32 }
0x2efe   :  { %p3693_p13 = scmp.ne.s32.totalorder %s4563_s4, %s3692_s27  ;;  %p3696_p0 = scmp.lt.u32.totalorder %s3692_s27, %s4563_s4 }
0x2f00   :  { %p3698_p1 = pnand %p3696_p0, %p3693_p13 }
0x2f02   :  { %3701 = shalt.err (!%p3698_p1)
}
0x2f03   :  { %2848 = dma.vmem_to_hbm [thread:$0]  %s2846_s0, 32, %s4563_s4, [#allocation4]  }
0x2f04   :  { %3704 = dma.done.wait [#allocation4], 32  }
0x2f05   :  { %3705 = vsyncadd [#allocation4], 4294967264 }
0x2f06   :  { %2852 = vsyncpa [#allocation3], 1 }
0x2f07   :  { %2853 = vsyncpa [#allocation4], 1 }

</bundles_post_ra>
